<compile_context>
chip_gen: v7x
topology: tpu7x:2x2x1
jax: 0.10.0
libtpu: 0.0.40
codegen_flags: <defaults>
</compile_context>

<pallas_src>
import numpy as np

import jax
import jax.numpy as jnp
from jax.experimental import pallas as pl
from jax.experimental.pallas import tpu as pltpu

# rows of the packed vertical depthwise-weight array `dwv` (7x1, 11x1, 21x1)
O71, O11_1, O21_1 = 0, 7, 18
# rows of the packed lane-dense per-channel vector array `lvec`
(BNS, BNB, B55, B17, B71, B111, B11_1, B121, B21_1,
 CWB, BC, CHB, HB1, WB1) = range(14)
# planes of the packed square-weight array `sq`
HW1, HW2, WW1, WW2, WC1 = range(5)


def dam_kernel(x_ref, band5_ref, band3_ref, dwv_ref, lvec_ref, sq_ref, o_ref):
    NB, H, WC = x_ref.shape
    NBH = NB * H

    def lv(i):                                   # one (1, WC) lane-tiled row
        return lvec_ref[i:i + 1, :]

    xs3 = x_ref[...]                             # (NB, H, W*C) lane-dense NHWC
    xs2 = xs3.reshape(NBH, WC)

    # ---------------- CoordAtt (all intermediates lane-dense) ---------------
    # H branch: mean-over-W pooling, conv1 and BN1(eval) are folded into one
    # zero-padded (WC, WC) weight, so the relu/add below run on full 128-lane
    # vregs; conv_h's weight is W-broadcast so a_h is already lane-dense.
    y_h = jnp.maximum(
        jnp.dot(xs2, sq_ref[HW1], preferred_element_type=jnp.float32)
        + lv(HB1), 0.0)
    a_h = jax.nn.sigmoid(
        jnp.dot(y_h, sq_ref[HW2], preferred_element_type=jnp.float32)
        + lv(CHB))                               # (NB*H, W*C)

    # W branch: mean over H (sublane reduce), block-diagonal kron(I_W, .)
    # conv1+BN1 and conv_w weights (zero-padded to WC lanes).
    x_w = jnp.mean(xs3, axis=1)                  # (NB, W*C)
    y_w = jnp.maximum(
        jnp.dot(x_w, sq_ref[WW1], preferred_element_type=jnp.float32)
        + lv(WB1), 0.0)
    a_w = jax.nn.sigmoid(
        jnp.dot(y_w, sq_ref[WW2], preferred_element_type=jnp.float32)
        + lv(CWB))                               # (NB, W*C)

    # ca(x) = x * a_w * a_h ; DAM multiplies by x again, then BN(eval) + ReLU.
    t3 = xs3 * xs3 * a_h.reshape(NB, H, WC) * a_w[:, None, :]
    inp3 = jnp.maximum(t3 * lv(BNS) + lv(BNB), 0.0)
    inp2 = inp3.reshape(NBH, WC)

    # ---------------- depthwise convolutions ---------------------------------
    # W-direction taps run on the MXU as banded matrices; H-direction taps are
    # in-register sublane shifts (pltpu.roll on the XLU) with a halo mask --
    # no VMEM scratch round-trips and nothing grid-state dependent.
    row = jax.lax.broadcasted_iota(jnp.int32, (NB, H, WC), 1)

    def shift_rows(v3, dh):
        # y[:, i, :] = v3[:, i + dh, :] inside the image, 0 in the halo.
        if dh == 0:
            return v3
        r = pltpu.roll(v3, shift=(-dh) % H, axis=1)
        mask = (row < H - dh) if dh > 0 else (row >= -dh)
        return jnp.where(mask, r, 0.0)

    # 5x5: ONE (WC, 5*WC) weight push covers the W-taps of all 5 kernel rows;
    # the H offsets are applied with rolls of the matmul result (the per-row
    # band matmul commutes with the row shift).
    h5 = jnp.dot(inp2, band5_ref[...], preferred_element_type=jnp.float32)
    acc = h5[:, 2 * WC:3 * WC].reshape(NB, H, WC)          # dh = 0 seeds acc
    for ki in (0, 1, 3, 4):
        dh = ki - 2
        if abs(dh) >= H:
            continue                                       # fully off-image
        acc = acc + shift_rows(
            h5[:, ki * WC:(ki + 1) * WC].reshape(NB, H, WC), dh)
    x_init3 = acc + lv(B55)
    x_init2 = x_init3.reshape(NBH, WC)

    # Branches (1x7->7x1), (1x11->11x1), (1x21->21x1): the three horizontal
    # convs share ONE (WC, 3*WC) weight push; the verticals are roll+fma
    # chains folded into a running sum so only one branch is live at a time.
    hcat = jnp.dot(x_init2, band3_ref[...], preferred_element_type=jnp.float32)
    xsum = x_init3
    for bi, (b_h, woff, kk, b_v) in enumerate(((B17, O71, 7, B71),
                                               (B111, O11_1, 11, B11_1),
                                               (B121, O21_1, 21, B21_1))):
        h3 = (hcat[:, bi * WC:(bi + 1) * WC] + lv(b_h)).reshape(NB, H, WC)
        ph = kk // 2
        v3 = None
        for ki in range(kk):
            dh = ki - ph
            if abs(dh) >= H:
                continue                                   # fully off-image
            term = dwv_ref[woff + ki:woff + ki + 1, :] * shift_rows(h3, dh)
            v3 = term if v3 is None else v3 + term
        xsum = xsum + v3 + lv(b_v)

    # ---- shared 1x1 conv (block-diag), gate by inputs, same conv again -----
    # Both dots use the identical RHS back-to-back so the weight push can be
    # reused / stay staged in the MXU.
    wcbd = sq_ref[WC1]
    bc = lv(BC)
    xsum2 = xsum.reshape(NBH, WC)
    att = jnp.dot(xsum2, wcbd, preferred_element_type=jnp.float32) + bc
    out = jnp.dot(att * inp2, wcbd, preferred_element_type=jnp.float32) + bc
    o_ref[...] = out.reshape(NB, H, WC)


def pack_params(p, W):
    """Pack the per-layer tensors into a few lane-dense constant arrays."""
    C = p['wc'].shape[0]
    MIP = p['c1w'].shape[1]
    WC = W * C

    def lane_tile(v):                               # (1, K) -> (1, W*K)
        return np.tile(np.asarray(v, np.float32).reshape(1, -1), (1, W))

    def band_matrix(wgt_kc):
        """(K, C) horizontal depthwise taps -> (W*C, W*C) banded matrix so
        that y = x @ M equals the 1xK depthwise cross-correlation with zero
        padding, for lane-dense x with lane index w*C + c."""
        wgt = np.asarray(wgt_kc, np.float32)
        K = wgt.shape[0]
        pw = K // 2
        m = np.zeros((WC, WC), np.float32)
        cidx = np.arange(C)
        for w_out in range(W):
            for kj in range(K):
                w_in = w_out + kj - pw
                if 0 <= w_in < W:
                    m[w_in * C + cidx, w_out * C + cidx] = wgt[kj, :]
        return m

    w55 = np.asarray(p['w55'], np.float32)
    band5 = np.concatenate([band_matrix(w55[ki * 5:(ki + 1) * 5, :])
                            for ki in range(5)], axis=1)       # (WC, 5*WC)
    band3 = np.concatenate([band_matrix(p['w17']), band_matrix(p['w111']),
                            band_matrix(p['w121'])], axis=1)   # (WC, 3*WC)

    dwv = np.concatenate([np.tile(np.asarray(p[k], np.float32), (1, W))
                          for k in ('w71', 'w11_1', 'w21_1')],
                         axis=0)                               # (39, W*C)

    # conv1 + BN1(eval) folded:  y = relu(x @ (c1w*s) + (c1b*s + b))
    c1w = np.asarray(p['c1w'], np.float32)
    c1b = np.asarray(p['c1b'], np.float32).reshape(-1)
    s1 = np.asarray(p['bn1s'], np.float32).reshape(-1)
    b1 = np.asarray(p['bn1b'], np.float32).reshape(-1)
    c1w_s = c1w * s1[None, :]
    b1_f = c1b * s1 + b1

    hb1 = np.zeros((1, WC), np.float32)
    hb1[0, :MIP] = b1_f                                        # H-branch bias
    wb1 = np.zeros((1, WC), np.float32)
    wb1[0, :W * MIP] = np.tile(b1_f, W)                        # W-branch bias

    lvec = np.concatenate(
        [lane_tile(p[k]) for k in
         ('bns', 'bnb', 'b55', 'b17', 'b71', 'b111',
          'b11_1', 'b121', 'b21_1', 'cwb', 'bc', 'chb')] + [hb1, wb1],
        axis=0)                                                # (14, W*C)

    chw = np.asarray(p['chw'], np.float32)
    cww = np.asarray(p['cww'], np.float32)
    wc = np.asarray(p['wc'], np.float32)
    eye_w = np.eye(W, dtype=np.float32)

    hw1 = np.zeros((WC, WC), np.float32)
    hw1[:, :MIP] = np.tile(c1w_s / W, (W, 1))   # W-pool + conv1 + bn1 (H br.)
    hw2 = np.zeros((WC, WC), np.float32)
    hw2[:MIP, :] = np.tile(chw, (1, W))         # conv_h, broadcast over W
    ww1 = np.zeros((WC, WC), np.float32)
    ww1[:, :W * MIP] = np.kron(eye_w, c1w_s)    # conv1 + bn1 per W position
    ww2 = np.zeros((WC, WC), np.float32)
    ww2[:W * MIP, :] = np.kron(eye_w, cww)      # conv_w per W position
    wc1 = np.kron(eye_w, wc)                    # shared 1x1 conv
    sq = np.stack([hw1, hw2, ww1, ww2, wc1], axis=0)           # (5, WC, WC)

    return [jnp.asarray(band5), jnp.asarray(band3), jnp.asarray(dwv),
            jnp.asarray(lvec), jnp.asarray(sq)]


def _default_nb(N):
    """One grid step per TensorCore: nb = N on single-TC chips (v5e/v6e),
    nb = N / 2 on v7x so both TensorCores get a 'parallel' grid step."""
    n_tc = 1
    try:
        kind = jax.devices()[0].device_kind.lower()
        if "v7" in kind or "tpu7" in kind:
            n_tc = 2
    except Exception:
        pass
    nb = max(1, N // max(1, n_tc))
    while N % nb:
        nb -= 1
    return nb


def dam_pallas_nhwc(x_nhwc, p, nb=None):
    """DAM forward on an NHWC input (preferred: no layout transposes)."""
    N, H, W, C = x_nhwc.shape
    WC = W * C
    assert WC % 128 == 0, "lane-dense DAM kernel assumes W*C % 128 == 0"
    if nb is None:
        nb = _default_nb(N)
    assert N % nb == 0, "batch must be divisible by the per-step batch block"

    x = x_nhwc.astype(jnp.float32).reshape(N, H, WC)   # lane-dense slab
    params = pack_params(p, W)

    def fullspec(a):
        nd = a.ndim
        return pl.BlockSpec(a.shape, lambda n, _nd=nd: (0,) * _nd)

    in_specs = [pl.BlockSpec((nb, H, WC), lambda n: (n, 0, 0))]
    in_specs += [fullspec(a) for a in params]

    out = pl.pallas_call(
        dam_kernel,
        out_shape=jax.ShapeDtypeStruct((N, H, WC), jnp.float32),
        grid_spec=pltpu.PrefetchScalarGridSpec(
            num_scalar_prefetch=0,
            grid=(N // nb,),
            in_specs=in_specs,
            out_specs=pl.BlockSpec((nb, H, WC), lambda n: (n, 0, 0))),
        compiler_params=pltpu.CompilerParams(
            dimension_semantics=("parallel",)),
    )(x, *params)

    return out.reshape(N, H, W, C)


def dam_pallas(x_nchw, p, nb=None):
    """NCHW drop-in adapter (costs two XLA transposes around the kernel)."""
    x = jnp.transpose(x_nchw, (0, 2, 3, 1))
    out = dam_pallas_nhwc(x, p, nb=nb)
    return jnp.transpose(out, (0, 3, 1, 2))


def make_params(key, C):
    MIP = max(8, C // 32)
    ks = list(jax.random.split(key, 40))
    it = iter(ks)

    def nrm(shape, s):
        return (s * jax.random.normal(next(it), shape)).astype(jnp.float32)

    def bn_fold(nc):
        gamma = 1.0 + 0.1 * jax.random.normal(next(it), (nc,))
        beta = 0.1 * jax.random.normal(next(it), (nc,))
        mean = 0.1 * jax.random.normal(next(it), (nc,))
        var = jax.random.uniform(next(it), (nc,), minval=0.5, maxval=1.5)
        s = gamma / jnp.sqrt(var + 1e-5)
        b = beta - mean * s
        return (s.reshape(1, nc).astype(jnp.float32),
                b.reshape(1, nc).astype(jnp.float32))

    p = {}
    p['c1w'] = nrm((C, MIP), 0.3)
    p['c1b'] = nrm((1, MIP), 0.1)
    p['bn1s'], p['bn1b'] = bn_fold(MIP)
    p['chw'] = nrm((MIP, C), 0.3)
    p['chb'] = nrm((1, C), 0.1)
    p['cww'] = nrm((MIP, C), 0.3)
    p['cwb'] = nrm((1, C), 0.1)
    p['bns'], p['bnb'] = bn_fold(C)
    for name, k in [('55', 25), ('17', 7), ('71', 7), ('111', 11),
                    ('11_1', 11), ('121', 21), ('21_1', 21)]:
        p['w' + name] = nrm((k, C), 0.2)
        p['b' + name] = nrm((1, C), 0.05)
    p['wc'] = nrm((C, C), 0.3)
    p['bc'] = nrm((1, C), 0.1)
    return p


def dam_reference(x_nchw, p):
    """Pure-JAX reference (lax convs) for checking the Pallas lowering."""
    x = jnp.transpose(x_nchw, (0, 2, 3, 1)).astype(jnp.float32)   # NHWC
    N, H, W, C = x.shape
    x_h = jnp.mean(x, axis=2)          # (N, H, C)
    x_w = jnp.mean(x, axis=1)          # (N, W, C)

    def mip_branch(v):
        y = v @ p['c1w'] + p['c1b']
        return jnp.maximum(y * p['bn1s'] + p['bn1b'], 0.0)

    a_h = jax.nn.sigmoid(mip_branch(x_h) @ p['chw'] + p['chb'])
    a_w = jax.nn.sigmoid(mip_branch(x_w) @ p['cww'] + p['cwb'])
    ca = x * a_w[:, None, :, :] * a_h[:, :, None, :]
    inp = jnp.maximum((ca * x) * p['bns'] + p['bnb'], 0.0)

    def dw(v, w, b, kh, kw):
        k = w.reshape(kh, kw, 1, C)
        y = jax.lax.conv_general_dilated(
            v, k, window_strides=(1, 1),
            padding=[(kh // 2, kh // 2), (kw // 2, kw // 2)],
            dimension_numbers=('NHWC', 'HWIO', 'NHWC'),
            feature_group_count=C)
        return y + b

    x_init = dw(inp, p['w55'], p['b55'], 5, 5)
    x1 = dw(dw(x_init, p['w17'], p['b17'], 1, 7), p['w71'], p['b71'], 7, 1)
    x2 = dw(dw(x_init, p['w111'], p['b111'], 1, 11),
            p['w11_1'], p['b11_1'], 11, 1)
    x3 = dw(dw(x_init, p['w121'], p['b121'], 1, 21),
            p['w21_1'], p['b21_1'], 21, 1)
    xs = x1 + x2 + x3 + x_init
    att = xs @ p['wc'] + p['bc']
    out = (att * inp) @ p['wc'] + p['bc']
    return jnp.transpose(out, (0, 3, 1, 2))


if __name__ == "__main__":
    N, C, H, W = 4, 16, 8, 8          # in_channels = ou_channels = 16, mip = 8
    key = jax.random.PRNGKey(0)
    kx, kp = jax.random.split(key)
    x = jax.random.normal(kx, (N, C, H, W), dtype=jnp.float32)
    params = make_params(kp, C)

    out = jax.block_until_ready(dam_pallas(x, params))
    ref = dam_reference(x, params)
    err = float(jnp.max(jnp.abs(out - ref)))
    assert out.shape == (N, C, H, W)
    assert err < 2e-3, f"max abs error vs reference: {err}"
    print("KERNEL_OK")
</pallas_src>

<mosaic_0001>
module attributes {stable_mosaic.version = 11 : i64} {
  func.func @dam_kernel(%arg0: i32, %arg1: memref<4x8x128xf32, #tpu.memory_space<vmem>>, %arg2: memref<128x640xf32, #tpu.memory_space<vmem>>, %arg3: memref<128x384xf32, #tpu.memory_space<vmem>>, %arg4: memref<39x128xf32, #tpu.memory_space<vmem>>, %arg5: memref<14x128xf32, #tpu.memory_space<vmem>>, %arg6: memref<5x128x128xf32, #tpu.memory_space<vmem>>, %arg7: memref<4x8x128xf32, #tpu.memory_space<vmem>>) attributes {dimension_semantics = [#tpu.dimension_semantics<parallel>], iteration_bounds = array<i64: 1>, scalar_prefetch = 0 : i64, scratch_operands = 0 : i64, tpu.core_type = #tpu.core_type<tc>, window_params = [{transform_indices = @transform_0, window_bounds = array<i64: 4, 8, 128>}, {pipeline_mode = #tpu.pipeline_mode<synchronous>, transform_indices = @transform_1, window_bounds = array<i64: 128, 640>}, {pipeline_mode = #tpu.pipeline_mode<synchronous>, transform_indices = @transform_2, window_bounds = array<i64: 128, 384>}, {pipeline_mode = #tpu.pipeline_mode<synchronous>, transform_indices = @transform_3, window_bounds = array<i64: 39, 128>}, {pipeline_mode = #tpu.pipeline_mode<synchronous>, transform_indices = @transform_4, window_bounds = array<i64: 14, 128>}, {pipeline_mode = #tpu.pipeline_mode<synchronous>, transform_indices = @transform_5, window_bounds = array<i64: 5, 128, 128>}, {transform_indices = @transform_6, window_bounds = array<i64: 4, 8, 128>}]} {
    %c0 = arith.constant 0 : index
    %c0_0 = arith.constant 0 : index
    %c0_1 = arith.constant 0 : index
    %0 = vector.load %arg1[%c0, %c0_0, %c0_1] : memref<4x8x128xf32, #tpu.memory_space<vmem>>, vector<4x8x128xf32>
    %1 = vector.shape_cast %0 : vector<4x8x128xf32> to vector<32x128xf32>
    %c0_2 = arith.constant 0 : index
    %c0_3 = arith.constant 0 : index
    %c0_4 = arith.constant 0 : index
    %2 = vector.load %arg6[%c0_2, %c0_3, %c0_4] : memref<5x128x128xf32, #tpu.memory_space<vmem>>, vector<1x128x128xf32>
    %3 = vector.shape_cast %2 : vector<1x128x128xf32> to vector<128x128xf32>
    %cst = arith.constant dense<0.000000e+00> : vector<32x128xf32>
    %4 = tpu.matmul %1, %3, %cst {dimension_numbers = #tpu.dot_dimension_numbers<[1], [0], [0], [1], [0, 0, 1, 1], [], []>} : vector<32x128xf32>, vector<128x128xf32>, vector<32x128xf32> -> vector<32x128xf32>
    %c12 = arith.constant 12 : index
    %c0_5 = arith.constant 0 : index
    %5 = vector.load %arg5[%c12, %c0_5] : memref<14x128xf32, #tpu.memory_space<vmem>>, vector<1x128xf32>
    %6 = vector.broadcast %5 : vector<1x128xf32> to vector<32x128xf32>
    %7 = arith.addf %4, %6 : vector<32x128xf32>
    %cst_6 = arith.constant 0.000000e+00 : f32
    %8 = vector.broadcast %cst_6 : f32 to vector<32x128xf32>
    %9 = arith.maximumf %7, %8 : vector<32x128xf32>
    %c1 = arith.constant 1 : index
    %c0_7 = arith.constant 0 : index
    %c0_8 = arith.constant 0 : index
    %10 = vector.load %arg6[%c1, %c0_7, %c0_8] : memref<5x128x128xf32, #tpu.memory_space<vmem>>, vector<1x128x128xf32>
    %11 = vector.shape_cast %10 : vector<1x128x128xf32> to vector<128x128xf32>
    %cst_9 = arith.constant dense<0.000000e+00> : vector<32x128xf32>
    %12 = tpu.matmul %9, %11, %cst_9 {dimension_numbers = #tpu.dot_dimension_numbers<[1], [0], [0], [1], [0, 0, 1, 1], [], []>} : vector<32x128xf32>, vector<128x128xf32>, vector<32x128xf32> -> vector<32x128xf32>
    %c11 = arith.constant 11 : index
    %c0_10 = arith.constant 0 : index
    %13 = vector.load %arg5[%c11, %c0_10] : memref<14x128xf32, #tpu.memory_space<vmem>>, vector<1x128xf32>
    %14 = vector.broadcast %13 : vector<1x128xf32> to vector<32x128xf32>
    %15 = arith.addf %12, %14 : vector<32x128xf32>
    %16 = arith.negf %15 : vector<32x128xf32>
    %17 = math.exp %16 : vector<32x128xf32>
    %cst_11 = arith.constant 1.000000e+00 : f32
    %18 = vector.broadcast %cst_11 : f32 to vector<32x128xf32>
    %19 = arith.addf %18, %17 : vector<32x128xf32>
    %20 = arith.divf %18, %19 : vector<32x128xf32>
    %cst_12 = arith.constant dense<0.000000e+00> : vector<4x128xf32>
    %21 = vector.multi_reduction <add>, %0, %cst_12 [1] : vector<4x8x128xf32> to vector<4x128xf32>
    %cst_13 = arith.constant 8.000000e+00 : f32
    %22 = vector.broadcast %cst_13 : f32 to vector<4x128xf32>
    %23 = arith.divf %21, %22 : vector<4x128xf32>
    %c2 = arith.constant 2 : index
    %c0_14 = arith.constant 0 : index
    %c0_15 = arith.constant 0 : index
    %24 = vector.load %arg6[%c2, %c0_14, %c0_15] : memref<5x128x128xf32, #tpu.memory_space<vmem>>, vector<1x128x128xf32>
    %25 = vector.shape_cast %24 : vector<1x128x128xf32> to vector<128x128xf32>
    %cst_16 = arith.constant dense<0.000000e+00> : vector<4x128xf32>
    %26 = tpu.matmul %23, %25, %cst_16 {dimension_numbers = #tpu.dot_dimension_numbers<[1], [0], [0], [1], [0, 0, 1, 1], [], []>} : vector<4x128xf32>, vector<128x128xf32>, vector<4x128xf32> -> vector<4x128xf32>
    %c13 = arith.constant 13 : index
    %c0_17 = arith.constant 0 : index
    %27 = vector.load %arg5[%c13, %c0_17] : memref<14x128xf32, #tpu.memory_space<vmem>>, vector<1x128xf32>
    %28 = vector.broadcast %27 : vector<1x128xf32> to vector<4x128xf32>
    %29 = arith.addf %26, %28 : vector<4x128xf32>
    %cst_18 = arith.constant 0.000000e+00 : f32
    %30 = vector.broadcast %cst_18 : f32 to vector<4x128xf32>
    %31 = arith.maximumf %29, %30 : vector<4x128xf32>
    %c3 = arith.constant 3 : index
    %c0_19 = arith.constant 0 : index
    %c0_20 = arith.constant 0 : index
    %32 = vector.load %arg6[%c3, %c0_19, %c0_20] : memref<5x128x128xf32, #tpu.memory_space<vmem>>, vector<1x128x128xf32>
    %33 = vector.shape_cast %32 : vector<1x128x128xf32> to vector<128x128xf32>
    %cst_21 = arith.constant dense<0.000000e+00> : vector<4x128xf32>
    %34 = tpu.matmul %31, %33, %cst_21 {dimension_numbers = #tpu.dot_dimension_numbers<[1], [0], [0], [1], [0, 0, 1, 1], [], []>} : vector<4x128xf32>, vector<128x128xf32>, vector<4x128xf32> -> vector<4x128xf32>
    %c9 = arith.constant 9 : index
    %c0_22 = arith.constant 0 : index
    %35 = vector.load %arg5[%c9, %c0_22] : memref<14x128xf32, #tpu.memory_space<vmem>>, vector<1x128xf32>
    %36 = vector.broadcast %35 : vector<1x128xf32> to vector<4x128xf32>
    %37 = arith.addf %34, %36 : vector<4x128xf32>
    %38 = arith.negf %37 : vector<4x128xf32>
    %39 = math.exp %38 : vector<4x128xf32>
    %cst_23 = arith.constant 1.000000e+00 : f32
    %40 = vector.broadcast %cst_23 : f32 to vector<4x128xf32>
    %41 = arith.addf %40, %39 : vector<4x128xf32>
    %42 = arith.divf %40, %41 : vector<4x128xf32>
    %43 = arith.mulf %0, %0 : vector<4x8x128xf32>
    %44 = vector.shape_cast %20 : vector<32x128xf32> to vector<4x8x128xf32>
    %45 = arith.mulf %43, %44 : vector<4x8x128xf32>
    %46 = vector.shape_cast %42 : vector<4x128xf32> to vector<4x1x128xf32>
    %47 = vector.broadcast %46 : vector<4x1x128xf32> to vector<4x8x128xf32>
    %48 = arith.mulf %45, %47 : vector<4x8x128xf32>
    %c0_24 = arith.constant 0 : index
    %c0_25 = arith.constant 0 : index
    %49 = vector.load %arg5[%c0_24, %c0_25] : memref<14x128xf32, #tpu.memory_space<vmem>>, vector<1x128xf32>
    %50 = vector.shape_cast %49 : vector<1x128xf32> to vector<1x1x128xf32>
    %51 = vector.broadcast %50 : vector<1x1x128xf32> to vector<4x8x128xf32>
    %52 = arith.mulf %48, %51 : vector<4x8x128xf32>
    %c1_26 = arith.constant 1 : index
    %c0_27 = arith.constant 0 : index
    %53 = vector.load %arg5[%c1_26, %c0_27] : memref<14x128xf32, #tpu.memory_space<vmem>>, vector<1x128xf32>
    %54 = vector.shape_cast %53 : vector<1x128xf32> to vector<1x1x128xf32>
    %55 = vector.broadcast %54 : vector<1x1x128xf32> to vector<4x8x128xf32>
    %56 = arith.addf %52, %55 : vector<4x8x128xf32>
    %cst_28 = arith.constant 0.000000e+00 : f32
    %57 = vector.broadcast %cst_28 : f32 to vector<4x8x128xf32>
    %58 = arith.maximumf %56, %57 : vector<4x8x128xf32>
    %59 = vector.shape_cast %58 : vector<4x8x128xf32> to vector<32x128xf32>
    %60 = tpu.iota {dimensions = array<i32: 1>} : vector<4x8x128xi32>
    %c0_29 = arith.constant 0 : index
    %c0_30 = arith.constant 0 : index
    %61 = vector.load %arg2[%c0_29, %c0_30] : memref<128x640xf32, #tpu.memory_space<vmem>>, vector<128x640xf32>
    %cst_31 = arith.constant dense<0.000000e+00> : vector<32x640xf32>
    %62 = tpu.matmul %59, %61, %cst_31 {dimension_numbers = #tpu.dot_dimension_numbers<[1], [0], [0], [1], [0, 0, 1, 1], [], []>} : vector<32x128xf32>, vector<128x640xf32>, vector<32x640xf32> -> vector<32x640xf32>
    %63 = vector.extract_strided_slice %62 {offsets = [0, 256], sizes = [32, 128], strides = [1, 1]} : vector<32x640xf32> to vector<32x128xf32>
    %64 = vector.shape_cast %63 : vector<32x128xf32> to vector<4x8x128xf32>
    %65 = vector.extract_strided_slice %62 {offsets = [0, 0], sizes = [32, 128], strides = [1, 1]} : vector<32x640xf32> to vector<32x128xf32>
    %66 = vector.shape_cast %65 : vector<32x128xf32> to vector<4x8x128xf32>
    %c2_i32 = arith.constant 2 : i32
    %67 = tpu.dynamic_rotate %66 by %c2_i32 dim 1 : vector<4x8x128xf32>, i32 -> vector<4x8x128xf32>
    %c2_i32_32 = arith.constant 2 : i32
    %68 = vector.broadcast %c2_i32_32 : i32 to vector<4x8x128xi32>
    %69 = arith.cmpi sge, %60, %68 : vector<4x8x128xi32>
    %cst_33 = arith.constant 0.000000e+00 : f32
    %70 = vector.broadcast %cst_33 : f32 to vector<4x8x128xf32>
    %71 = arith.select %69, %67, %70 : vector<4x8x128xi1>, vector<4x8x128xf32>
    %72 = arith.addf %64, %71 : vector<4x8x128xf32>
    %73 = vector.extract_strided_slice %62 {offsets = [0, 128], sizes = [32, 128], strides = [1, 1]} : vector<32x640xf32> to vector<32x128xf32>
    %74 = vector.shape_cast %73 : vector<32x128xf32> to vector<4x8x128xf32>
    %c1_i32 = arith.constant 1 : i32
    %75 = tpu.dynamic_rotate %74 by %c1_i32 dim 1 : vector<4x8x128xf32>, i32 -> vector<4x8x128xf32>
    %c1_i32_34 = arith.constant 1 : i32
    %76 = vector.broadcast %c1_i32_34 : i32 to vector<4x8x128xi32>
    %77 = arith.cmpi sge, %60, %76 : vector<4x8x128xi32>
    %cst_35 = arith.constant 0.000000e+00 : f32
    %78 = vector.broadcast %cst_35 : f32 to vector<4x8x128xf32>
    %79 = arith.select %77, %75, %78 : vector<4x8x128xi1>, vector<4x8x128xf32>
    %80 = arith.addf %72, %79 : vector<4x8x128xf32>
    %81 = vector.extract_strided_slice %62 {offsets = [0, 384], sizes = [32, 128], strides = [1, 1]} : vector<32x640xf32> to vector<32x128xf32>
    %82 = vector.shape_cast %81 : vector<32x128xf32> to vector<4x8x128xf32>
    %c7_i32 = arith.constant 7 : i32
    %83 = tpu.dynamic_rotate %82 by %c7_i32 dim 1 : vector<4x8x128xf32>, i32 -> vector<4x8x128xf32>
    %c7_i32_36 = arith.constant 7 : i32
    %84 = vector.broadcast %c7_i32_36 : i32 to vector<4x8x128xi32>
    %85 = arith.cmpi slt, %60, %84 : vector<4x8x128xi32>
    %cst_37 = arith.constant 0.000000e+00 : f32
    %86 = vector.broadcast %cst_37 : f32 to vector<4x8x128xf32>
    %87 = arith.select %85, %83, %86 : vector<4x8x128xi1>, vector<4x8x128xf32>
    %88 = arith.addf %80, %87 : vector<4x8x128xf32>
    %89 = vector.extract_strided_slice %62 {offsets = [0, 512], sizes = [32, 128], strides = [1, 1]} : vector<32x640xf32> to vector<32x128xf32>
    %90 = vector.shape_cast %89 : vector<32x128xf32> to vector<4x8x128xf32>
    %c6_i32 = arith.constant 6 : i32
    %91 = tpu.dynamic_rotate %90 by %c6_i32 dim 1 : vector<4x8x128xf32>, i32 -> vector<4x8x128xf32>
    %c6_i32_38 = arith.constant 6 : i32
    %92 = vector.broadcast %c6_i32_38 : i32 to vector<4x8x128xi32>
    %93 = arith.cmpi slt, %60, %92 : vector<4x8x128xi32>
    %cst_39 = arith.constant 0.000000e+00 : f32
    %94 = vector.broadcast %cst_39 : f32 to vector<4x8x128xf32>
    %95 = arith.select %93, %91, %94 : vector<4x8x128xi1>, vector<4x8x128xf32>
    %96 = arith.addf %88, %95 : vector<4x8x128xf32>
    %c2_40 = arith.constant 2 : index
    %c0_41 = arith.constant 0 : index
    %97 = vector.load %arg5[%c2_40, %c0_41] : memref<14x128xf32, #tpu.memory_space<vmem>>, vector<1x128xf32>
    %98 = vector.shape_cast %97 : vector<1x128xf32> to vector<1x1x128xf32>
    %99 = vector.broadcast %98 : vector<1x1x128xf32> to vector<4x8x128xf32>
    %100 = arith.addf %96, %99 : vector<4x8x128xf32>
    %101 = vector.shape_cast %100 : vector<4x8x128xf32> to vector<32x128xf32>
    %c0_42 = arith.constant 0 : index
    %c0_43 = arith.constant 0 : index
    %102 = vector.load %arg3[%c0_42, %c0_43] : memref<128x384xf32, #tpu.memory_space<vmem>>, vector<128x384xf32>
    %cst_44 = arith.constant dense<0.000000e+00> : vector<32x384xf32>
    %103 = tpu.matmul %101, %102, %cst_44 {dimension_numbers = #tpu.dot_dimension_numbers<[1], [0], [0], [1], [0, 0, 1, 1], [], []>} : vector<32x128xf32>, vector<128x384xf32>, vector<32x384xf32> -> vector<32x384xf32>
    %104 = vector.extract_strided_slice %103 {offsets = [0, 0], sizes = [32, 128], strides = [1, 1]} : vector<32x384xf32> to vector<32x128xf32>
    %c3_45 = arith.constant 3 : index
    %c0_46 = arith.constant 0 : index
    %105 = vector.load %arg5[%c3_45, %c0_46] : memref<14x128xf32, #tpu.memory_space<vmem>>, vector<1x128xf32>
    %106 = vector.broadcast %105 : vector<1x128xf32> to vector<32x128xf32>
    %107 = arith.addf %104, %106 : vector<32x128xf32>
    %108 = vector.shape_cast %107 : vector<32x128xf32> to vector<4x8x128xf32>
    %c0_47 = arith.constant 0 : index
    %c0_48 = arith.constant 0 : index
    %109 = vector.load %arg4[%c0_47, %c0_48] : memref<39x128xf32, #tpu.memory_space<vmem>>, vector<1x128xf32>
    %c3_i32 = arith.constant 3 : i32
    %110 = tpu.dynamic_rotate %108 by %c3_i32 dim 1 : vector<4x8x128xf32>, i32 -> vector<4x8x128xf32>
    %c3_i32_49 = arith.constant 3 : i32
    %111 = vector.broadcast %c3_i32_49 : i32 to vector<4x8x128xi32>
    %112 = arith.cmpi sge, %60, %111 : vector<4x8x128xi32>
    %cst_50 = arith.constant 0.000000e+00 : f32
    %113 = vector.broadcast %cst_50 : f32 to vector<4x8x128xf32>
    %114 = arith.select %112, %110, %113 : vector<4x8x128xi1>, vector<4x8x128xf32>
    %115 = vector.shape_cast %109 : vector<1x128xf32> to vector<1x1x128xf32>
    %116 = vector.broadcast %115 : vector<1x1x128xf32> to vector<4x8x128xf32>
    %117 = arith.mulf %116, %114 : vector<4x8x128xf32>
    %c1_51 = arith.constant 1 : index
    %c0_52 = arith.constant 0 : index
    %118 = vector.load %arg4[%c1_51, %c0_52] : memref<39x128xf32, #tpu.memory_space<vmem>>, vector<1x128xf32>
    %c2_i32_53 = arith.constant 2 : i32
    %119 = tpu.dynamic_rotate %108 by %c2_i32_53 dim 1 : vector<4x8x128xf32>, i32 -> vector<4x8x128xf32>
    %c2_i32_54 = arith.constant 2 : i32
    %120 = vector.broadcast %c2_i32_54 : i32 to vector<4x8x128xi32>
    %121 = arith.cmpi sge, %60, %120 : vector<4x8x128xi32>
    %cst_55 = arith.constant 0.000000e+00 : f32
    %122 = vector.broadcast %cst_55 : f32 to vector<4x8x128xf32>
    %123 = arith.select %121, %119, %122 : vector<4x8x128xi1>, vector<4x8x128xf32>
    %124 = vector.shape_cast %118 : vector<1x128xf32> to vector<1x1x128xf32>
    %125 = vector.broadcast %124 : vector<1x1x128xf32> to vector<4x8x128xf32>
    %126 = arith.mulf %125, %123 : vector<4x8x128xf32>
    %127 = arith.addf %117, %126 : vector<4x8x128xf32>
    %c2_56 = arith.constant 2 : index
    %c0_57 = arith.constant 0 : index
    %128 = vector.load %arg4[%c2_56, %c0_57] : memref<39x128xf32, #tpu.memory_space<vmem>>, vector<1x128xf32>
    %c1_i32_58 = arith.constant 1 : i32
    %129 = tpu.dynamic_rotate %108 by %c1_i32_58 dim 1 : vector<4x8x128xf32>, i32 -> vector<4x8x128xf32>
    %c1_i32_59 = arith.constant 1 : i32
    %130 = vector.broadcast %c1_i32_59 : i32 to vector<4x8x128xi32>
    %131 = arith.cmpi sge, %60, %130 : vector<4x8x128xi32>
    %cst_60 = arith.constant 0.000000e+00 : f32
    %132 = vector.broadcast %cst_60 : f32 to vector<4x8x128xf32>
    %133 = arith.select %131, %129, %132 : vector<4x8x128xi1>, vector<4x8x128xf32>
    %134 = vector.shape_cast %128 : vector<1x128xf32> to vector<1x1x128xf32>
    %135 = vector.broadcast %134 : vector<1x1x128xf32> to vector<4x8x128xf32>
    %136 = arith.mulf %135, %133 : vector<4x8x128xf32>
    %137 = arith.addf %127, %136 : vector<4x8x128xf32>
    %c3_61 = arith.constant 3 : index
    %c0_62 = arith.constant 0 : index
    %138 = vector.load %arg4[%c3_61, %c0_62] : memref<39x128xf32, #tpu.memory_space<vmem>>, vector<1x128xf32>
    %139 = vector.shape_cast %138 : vector<1x128xf32> to vector<1x1x128xf32>
    %140 = vector.broadcast %139 : vector<1x1x128xf32> to vector<4x8x128xf32>
    %141 = arith.mulf %140, %108 : vector<4x8x128xf32>
    %142 = arith.addf %137, %141 : vector<4x8x128xf32>
    %c4 = arith.constant 4 : index
    %c0_63 = arith.constant 0 : index
    %143 = vector.load %arg4[%c4, %c0_63] : memref<39x128xf32, #tpu.memory_space<vmem>>, vector<1x128xf32>
    %c7_i32_64 = arith.constant 7 : i32
    %144 = tpu.dynamic_rotate %108 by %c7_i32_64 dim 1 : vector<4x8x128xf32>, i32 -> vector<4x8x128xf32>
    %c7_i32_65 = arith.constant 7 : i32
    %145 = vector.broadcast %c7_i32_65 : i32 to vector<4x8x128xi32>
    %146 = arith.cmpi slt, %60, %145 : vector<4x8x128xi32>
    %cst_66 = arith.constant 0.000000e+00 : f32
    %147 = vector.broadcast %cst_66 : f32 to vector<4x8x128xf32>
    %148 = arith.select %146, %144, %147 : vector<4x8x128xi1>, vector<4x8x128xf32>
    %149 = vector.shape_cast %143 : vector<1x128xf32> to vector<1x1x128xf32>
    %150 = vector.broadcast %149 : vector<1x1x128xf32> to vector<4x8x128xf32>
    %151 = arith.mulf %150, %148 : vector<4x8x128xf32>
    %152 = arith.addf %142, %151 : vector<4x8x128xf32>
    %c5 = arith.constant 5 : index
    %c0_67 = arith.constant 0 : index
    %153 = vector.load %arg4[%c5, %c0_67] : memref<39x128xf32, #tpu.memory_space<vmem>>, vector<1x128xf32>
    %c6_i32_68 = arith.constant 6 : i32
    %154 = tpu.dynamic_rotate %108 by %c6_i32_68 dim 1 : vector<4x8x128xf32>, i32 -> vector<4x8x128xf32>
    %c6_i32_69 = arith.constant 6 : i32
    %155 = vector.broadcast %c6_i32_69 : i32 to vector<4x8x128xi32>
    %156 = arith.cmpi slt, %60, %155 : vector<4x8x128xi32>
    %cst_70 = arith.constant 0.000000e+00 : f32
    %157 = vector.broadcast %cst_70 : f32 to vector<4x8x128xf32>
    %158 = arith.select %156, %154, %157 : vector<4x8x128xi1>, vector<4x8x128xf32>
    %159 = vector.shape_cast %153 : vector<1x128xf32> to vector<1x1x128xf32>
    %160 = vector.broadcast %159 : vector<1x1x128xf32> to vector<4x8x128xf32>
    %161 = arith.mulf %160, %158 : vector<4x8x128xf32>
    %162 = arith.addf %152, %161 : vector<4x8x128xf32>
    %c6 = arith.constant 6 : index
    %c0_71 = arith.constant 0 : index
    %163 = vector.load %arg4[%c6, %c0_71] : memref<39x128xf32, #tpu.memory_space<vmem>>, vector<1x128xf32>
    %c5_i32 = arith.constant 5 : i32
    %164 = tpu.dynamic_rotate %108 by %c5_i32 dim 1 : vector<4x8x128xf32>, i32 -> vector<4x8x128xf32>
    %c5_i32_72 = arith.constant 5 : i32
    %165 = vector.broadcast %c5_i32_72 : i32 to vector<4x8x128xi32>
    %166 = arith.cmpi slt, %60, %165 : vector<4x8x128xi32>
    %cst_73 = arith.constant 0.000000e+00 : f32
    %167 = vector.broadcast %cst_73 : f32 to vector<4x8x128xf32>
    %168 = arith.select %166, %164, %167 : vector<4x8x128xi1>, vector<4x8x128xf32>
    %169 = vector.shape_cast %163 : vector<1x128xf32> to vector<1x1x128xf32>
    %170 = vector.broadcast %169 : vector<1x1x128xf32> to vector<4x8x128xf32>
    %171 = arith.mulf %170, %168 : vector<4x8x128xf32>
    %172 = arith.addf %162, %171 : vector<4x8x128xf32>
    %173 = arith.addf %100, %172 : vector<4x8x128xf32>
    %c4_74 = arith.constant 4 : index
    %c0_75 = arith.constant 0 : index
    %174 = vector.load %arg5[%c4_74, %c0_75] : memref<14x128xf32, #tpu.memory_space<vmem>>, vector<1x128xf32>
    %175 = vector.shape_cast %174 : vector<1x128xf32> to vector<1x1x128xf32>
    %176 = vector.broadcast %175 : vector<1x1x128xf32> to vector<4x8x128xf32>
    %177 = arith.addf %173, %176 : vector<4x8x128xf32>
    %178 = vector.extract_strided_slice %103 {offsets = [0, 128], sizes = [32, 128], strides = [1, 1]} : vector<32x384xf32> to vector<32x128xf32>
    %c5_76 = arith.constant 5 : index
    %c0_77 = arith.constant 0 : index
    %179 = vector.load %arg5[%c5_76, %c0_77] : memref<14x128xf32, #tpu.memory_space<vmem>>, vector<1x128xf32>
    %180 = vector.broadcast %179 : vector<1x128xf32> to vector<32x128xf32>
    %181 = arith.addf %178, %180 : vector<32x128xf32>
    %182 = vector.shape_cast %181 : vector<32x128xf32> to vector<4x8x128xf32>
    %c7 = arith.constant 7 : index
    %c0_78 = arith.constant 0 : index
    %183 = vector.load %arg4[%c7, %c0_78] : memref<39x128xf32, #tpu.memory_space<vmem>>, vector<1x128xf32>
    %c5_i32_79 = arith.constant 5 : i32
    %184 = tpu.dynamic_rotate %182 by %c5_i32_79 dim 1 : vector<4x8x128xf32>, i32 -> vector<4x8x128xf32>
    %c5_i32_80 = arith.constant 5 : i32
    %185 = vector.broadcast %c5_i32_80 : i32 to vector<4x8x128xi32>
    %186 = arith.cmpi sge, %60, %185 : vector<4x8x128xi32>
    %cst_81 = arith.constant 0.000000e+00 : f32
    %187 = vector.broadcast %cst_81 : f32 to vector<4x8x128xf32>
    %188 = arith.select %186, %184, %187 : vector<4x8x128xi1>, vector<4x8x128xf32>
    %189 = vector.shape_cast %183 : vector<1x128xf32> to vector<1x1x128xf32>
    %190 = vector.broadcast %189 : vector<1x1x128xf32> to vector<4x8x128xf32>
    %191 = arith.mulf %190, %188 : vector<4x8x128xf32>
    %c8 = arith.constant 8 : index
    %c0_82 = arith.constant 0 : index
    %192 = vector.load %arg4[%c8, %c0_82] : memref<39x128xf32, #tpu.memory_space<vmem>>, vector<1x128xf32>
    %c4_i32 = arith.constant 4 : i32
    %193 = tpu.dynamic_rotate %182 by %c4_i32 dim 1 : vector<4x8x128xf32>, i32 -> vector<4x8x128xf32>
    %c4_i32_83 = arith.constant 4 : i32
    %194 = vector.broadcast %c4_i32_83 : i32 to vector<4x8x128xi32>
    %195 = arith.cmpi sge, %60, %194 : vector<4x8x128xi32>
    %cst_84 = arith.constant 0.000000e+00 : f32
    %196 = vector.broadcast %cst_84 : f32 to vector<4x8x128xf32>
    %197 = arith.select %195, %193, %196 : vector<4x8x128xi1>, vector<4x8x128xf32>
    %198 = vector.shape_cast %192 : vector<1x128xf32> to vector<1x1x128xf32>
    %199 = vector.broadcast %198 : vector<1x1x128xf32> to vector<4x8x128xf32>
    %200 = arith.mulf %199, %197 : vector<4x8x128xf32>
    %201 = arith.addf %191, %200 : vector<4x8x128xf32>
    %c9_85 = arith.constant 9 : index
    %c0_86 = arith.constant 0 : index
    %202 = vector.load %arg4[%c9_85, %c0_86] : memref<39x128xf32, #tpu.memory_space<vmem>>, vector<1x128xf32>
    %c3_i32_87 = arith.constant 3 : i32
    %203 = tpu.dynamic_rotate %182 by %c3_i32_87 dim 1 : vector<4x8x128xf32>, i32 -> vector<4x8x128xf32>
    %c3_i32_88 = arith.constant 3 : i32
    %204 = vector.broadcast %c3_i32_88 : i32 to vector<4x8x128xi32>
    %205 = arith.cmpi sge, %60, %204 : vector<4x8x128xi32>
    %cst_89 = arith.constant 0.000000e+00 : f32
    %206 = vector.broadcast %cst_89 : f32 to vector<4x8x128xf32>
    %207 = arith.select %205, %203, %206 : vector<4x8x128xi1>, vector<4x8x128xf32>
    %208 = vector.shape_cast %202 : vector<1x128xf32> to vector<1x1x128xf32>
    %209 = vector.broadcast %208 : vector<1x1x128xf32> to vector<4x8x128xf32>
    %210 = arith.mulf %209, %207 : vector<4x8x128xf32>
    %211 = arith.addf %201, %210 : vector<4x8x128xf32>
    %c10 = arith.constant 10 : index
    %c0_90 = arith.constant 0 : index
    %212 = vector.load %arg4[%c10, %c0_90] : memref<39x128xf32, #tpu.memory_space<vmem>>, vector<1x128xf32>
    %c2_i32_91 = arith.constant 2 : i32
    %213 = tpu.dynamic_rotate %182 by %c2_i32_91 dim 1 : vector<4x8x128xf32>, i32 -> vector<4x8x128xf32>
    %c2_i32_92 = arith.constant 2 : i32
    %214 = vector.broadcast %c2_i32_92 : i32 to vector<4x8x128xi32>
    %215 = arith.cmpi sge, %60, %214 : vector<4x8x128xi32>
    %cst_93 = arith.constant 0.000000e+00 : f32
    %216 = vector.broadcast %cst_93 : f32 to vector<4x8x128xf32>
    %217 = arith.select %215, %213, %216 : vector<4x8x128xi1>, vector<4x8x128xf32>
    %218 = vector.shape_cast %212 : vector<1x128xf32> to vector<1x1x128xf32>
    %219 = vector.broadcast %218 : vector<1x1x128xf32> to vector<4x8x128xf32>
    %220 = arith.mulf %219, %217 : vector<4x8x128xf32>
    %221 = arith.addf %211, %220 : vector<4x8x128xf32>
    %c11_94 = arith.constant 11 : index
    %c0_95 = arith.constant 0 : index
    %222 = vector.load %arg4[%c11_94, %c0_95] : memref<39x128xf32, #tpu.memory_space<vmem>>, vector<1x128xf32>
    %c1_i32_96 = arith.constant 1 : i32
    %223 = tpu.dynamic_rotate %182 by %c1_i32_96 dim 1 : vector<4x8x128xf32>, i32 -> vector<4x8x128xf32>
    %c1_i32_97 = arith.constant 1 : i32
    %224 = vector.broadcast %c1_i32_97 : i32 to vector<4x8x128xi32>
    %225 = arith.cmpi sge, %60, %224 : vector<4x8x128xi32>
    %cst_98 = arith.constant 0.000000e+00 : f32
    %226 = vector.broadcast %cst_98 : f32 to vector<4x8x128xf32>
    %227 = arith.select %225, %223, %226 : vector<4x8x128xi1>, vector<4x8x128xf32>
    %228 = vector.shape_cast %222 : vector<1x128xf32> to vector<1x1x128xf32>
    %229 = vector.broadcast %228 : vector<1x1x128xf32> to vector<4x8x128xf32>
    %230 = arith.mulf %229, %227 : vector<4x8x128xf32>
    %231 = arith.addf %221, %230 : vector<4x8x128xf32>
    %c12_99 = arith.constant 12 : index
    %c0_100 = arith.constant 0 : index
    %232 = vector.load %arg4[%c12_99, %c0_100] : memref<39x128xf32, #tpu.memory_space<vmem>>, vector<1x128xf32>
    %233 = vector.shape_cast %232 : vector<1x128xf32> to vector<1x1x128xf32>
    %234 = vector.broadcast %233 : vector<1x1x128xf32> to vector<4x8x128xf32>
    %235 = arith.mulf %234, %182 : vector<4x8x128xf32>
    %236 = arith.addf %231, %235 : vector<4x8x128xf32>
    %c13_101 = arith.constant 13 : index
    %c0_102 = arith.constant 0 : index
    %237 = vector.load %arg4[%c13_101, %c0_102] : memref<39x128xf32, #tpu.memory_space<vmem>>, vector<1x128xf32>
    %c7_i32_103 = arith.constant 7 : i32
    %238 = tpu.dynamic_rotate %182 by %c7_i32_103 dim 1 : vector<4x8x128xf32>, i32 -> vector<4x8x128xf32>
    %c7_i32_104 = arith.constant 7 : i32
    %239 = vector.broadcast %c7_i32_104 : i32 to vector<4x8x128xi32>
    %240 = arith.cmpi slt, %60, %239 : vector<4x8x128xi32>
    %cst_105 = arith.constant 0.000000e+00 : f32
    %241 = vector.broadcast %cst_105 : f32 to vector<4x8x128xf32>
    %242 = arith.select %240, %238, %241 : vector<4x8x128xi1>, vector<4x8x128xf32>
    %243 = vector.shape_cast %237 : vector<1x128xf32> to vector<1x1x128xf32>
    %244 = vector.broadcast %243 : vector<1x1x128xf32> to vector<4x8x128xf32>
    %245 = arith.mulf %244, %242 : vector<4x8x128xf32>
    %246 = arith.addf %236, %245 : vector<4x8x128xf32>
    %c14 = arith.constant 14 : index
    %c0_106 = arith.constant 0 : index
    %247 = vector.load %arg4[%c14, %c0_106] : memref<39x128xf32, #tpu.memory_space<vmem>>, vector<1x128xf32>
    %c6_i32_107 = arith.constant 6 : i32
    %248 = tpu.dynamic_rotate %182 by %c6_i32_107 dim 1 : vector<4x8x128xf32>, i32 -> vector<4x8x128xf32>
    %c6_i32_108 = arith.constant 6 : i32
    %249 = vector.broadcast %c6_i32_108 : i32 to vector<4x8x128xi32>
    %250 = arith.cmpi slt, %60, %249 : vector<4x8x128xi32>
    %cst_109 = arith.constant 0.000000e+00 : f32
    %251 = vector.broadcast %cst_109 : f32 to vector<4x8x128xf32>
    %252 = arith.select %250, %248, %251 : vector<4x8x128xi1>, vector<4x8x128xf32>
    %253 = vector.shape_cast %247 : vector<1x128xf32> to vector<1x1x128xf32>
    %254 = vector.broadcast %253 : vector<1x1x128xf32> to vector<4x8x128xf32>
    %255 = arith.mulf %254, %252 : vector<4x8x128xf32>
    %256 = arith.addf %246, %255 : vector<4x8x128xf32>
    %c15 = arith.constant 15 : index
    %c0_110 = arith.constant 0 : index
    %257 = vector.load %arg4[%c15, %c0_110] : memref<39x128xf32, #tpu.memory_space<vmem>>, vector<1x128xf32>
    %c5_i32_111 = arith.constant 5 : i32
    %258 = tpu.dynamic_rotate %182 by %c5_i32_111 dim 1 : vector<4x8x128xf32>, i32 -> vector<4x8x128xf32>
    %c5_i32_112 = arith.constant 5 : i32
    %259 = vector.broadcast %c5_i32_112 : i32 to vector<4x8x128xi32>
    %260 = arith.cmpi slt, %60, %259 : vector<4x8x128xi32>
    %cst_113 = arith.constant 0.000000e+00 : f32
    %261 = vector.broadcast %cst_113 : f32 to vector<4x8x128xf32>
    %262 = arith.select %260, %258, %261 : vector<4x8x128xi1>, vector<4x8x128xf32>
    %263 = vector.shape_cast %257 : vector<1x128xf32> to vector<1x1x128xf32>
    %264 = vector.broadcast %263 : vector<1x1x128xf32> to vector<4x8x128xf32>
    %265 = arith.mulf %264, %262 : vector<4x8x128xf32>
    %266 = arith.addf %256, %265 : vector<4x8x128xf32>
    %c16 = arith.constant 16 : index
    %c0_114 = arith.constant 0 : index
    %267 = vector.load %arg4[%c16, %c0_114] : memref<39x128xf32, #tpu.memory_space<vmem>>, vector<1x128xf32>
    %c4_i32_115 = arith.constant 4 : i32
    %268 = tpu.dynamic_rotate %182 by %c4_i32_115 dim 1 : vector<4x8x128xf32>, i32 -> vector<4x8x128xf32>
    %c4_i32_116 = arith.constant 4 : i32
    %269 = vector.broadcast %c4_i32_116 : i32 to vector<4x8x128xi32>
    %270 = arith.cmpi slt, %60, %269 : vector<4x8x128xi32>
    %cst_117 = arith.constant 0.000000e+00 : f32
    %271 = vector.broadcast %cst_117 : f32 to vector<4x8x128xf32>
    %272 = arith.select %270, %268, %271 : vector<4x8x128xi1>, vector<4x8x128xf32>
    %273 = vector.shape_cast %267 : vector<1x128xf32> to vector<1x1x128xf32>
    %274 = vector.broadcast %273 : vector<1x1x128xf32> to vector<4x8x128xf32>
    %275 = arith.mulf %274, %272 : vector<4x8x128xf32>
    %276 = arith.addf %266, %275 : vector<4x8x128xf32>
    %c17 = arith.constant 17 : index
    %c0_118 = arith.constant 0 : index
    %277 = vector.load %arg4[%c17, %c0_118] : memref<39x128xf32, #tpu.memory_space<vmem>>, vector<1x128xf32>
    %c3_i32_119 = arith.constant 3 : i32
    %278 = tpu.dynamic_rotate %182 by %c3_i32_119 dim 1 : vector<4x8x128xf32>, i32 -> vector<4x8x128xf32>
    %c3_i32_120 = arith.constant 3 : i32
    %279 = vector.broadcast %c3_i32_120 : i32 to vector<4x8x128xi32>
    %280 = arith.cmpi slt, %60, %279 : vector<4x8x128xi32>
    %cst_121 = arith.constant 0.000000e+00 : f32
    %281 = vector.broadcast %cst_121 : f32 to vector<4x8x128xf32>
    %282 = arith.select %280, %278, %281 : vector<4x8x128xi1>, vector<4x8x128xf32>
    %283 = vector.shape_cast %277 : vector<1x128xf32> to vector<1x1x128xf32>
    %284 = vector.broadcast %283 : vector<1x1x128xf32> to vector<4x8x128xf32>
    %285 = arith.mulf %284, %282 : vector<4x8x128xf32>
    %286 = arith.addf %276, %285 : vector<4x8x128xf32>
    %287 = arith.addf %177, %286 : vector<4x8x128xf32>
    %c6_122 = arith.constant 6 : index
    %c0_123 = arith.constant 0 : index
    %288 = vector.load %arg5[%c6_122, %c0_123] : memref<14x128xf32, #tpu.memory_space<vmem>>, vector<1x128xf32>
    %289 = vector.shape_cast %288 : vector<1x128xf32> to vector<1x1x128xf32>
    %290 = vector.broadcast %289 : vector<1x1x128xf32> to vector<4x8x128xf32>
    %291 = arith.addf %287, %290 : vector<4x8x128xf32>
    %292 = vector.extract_strided_slice %103 {offsets = [0, 256], sizes = [32, 128], strides = [1, 1]} : vector<32x384xf32> to vector<32x128xf32>
    %c7_124 = arith.constant 7 : index
    %c0_125 = arith.constant 0 : index
    %293 = vector.load %arg5[%c7_124, %c0_125] : memref<14x128xf32, #tpu.memory_space<vmem>>, vector<1x128xf32>
    %294 = vector.broadcast %293 : vector<1x128xf32> to vector<32x128xf32>
    %295 = arith.addf %292, %294 : vector<32x128xf32>
    %296 = vector.shape_cast %295 : vector<32x128xf32> to vector<4x8x128xf32>
    %c21 = arith.constant 21 : index
    %c0_126 = arith.constant 0 : index
    %297 = vector.load %arg4[%c21, %c0_126] : memref<39x128xf32, #tpu.memory_space<vmem>>, vector<1x128xf32>
    %c7_i32_127 = arith.constant 7 : i32
    %298 = tpu.dynamic_rotate %296 by %c7_i32_127 dim 1 : vector<4x8x128xf32>, i32 -> vector<4x8x128xf32>
    %c7_i32_128 = arith.constant 7 : i32
    %299 = vector.broadcast %c7_i32_128 : i32 to vector<4x8x128xi32>
    %300 = arith.cmpi sge, %60, %299 : vector<4x8x128xi32>
    %cst_129 = arith.constant 0.000000e+00 : f32
    %301 = vector.broadcast %cst_129 : f32 to vector<4x8x128xf32>
    %302 = arith.select %300, %298, %301 : vector<4x8x128xi1>, vector<4x8x128xf32>
    %303 = vector.shape_cast %297 : vector<1x128xf32> to vector<1x1x128xf32>
    %304 = vector.broadcast %303 : vector<1x1x128xf32> to vector<4x8x128xf32>
    %305 = arith.mulf %304, %302 : vector<4x8x128xf32>
    %c22 = arith.constant 22 : index
    %c0_130 = arith.constant 0 : index
    %306 = vector.load %arg4[%c22, %c0_130] : memref<39x128xf32, #tpu.memory_space<vmem>>, vector<1x128xf32>
    %c6_i32_131 = arith.constant 6 : i32
    %307 = tpu.dynamic_rotate %296 by %c6_i32_131 dim 1 : vector<4x8x128xf32>, i32 -> vector<4x8x128xf32>
    %c6_i32_132 = arith.constant 6 : i32
    %308 = vector.broadcast %c6_i32_132 : i32 to vector<4x8x128xi32>
    %309 = arith.cmpi sge, %60, %308 : vector<4x8x128xi32>
    %cst_133 = arith.constant 0.000000e+00 : f32
    %310 = vector.broadcast %cst_133 : f32 to vector<4x8x128xf32>
    %311 = arith.select %309, %307, %310 : vector<4x8x128xi1>, vector<4x8x128xf32>
    %312 = vector.shape_cast %306 : vector<1x128xf32> to vector<1x1x128xf32>
    %313 = vector.broadcast %312 : vector<1x1x128xf32> to vector<4x8x128xf32>
    %314 = arith.mulf %313, %311 : vector<4x8x128xf32>
    %315 = arith.addf %305, %314 : vector<4x8x128xf32>
    %c23 = arith.constant 23 : index
    %c0_134 = arith.constant 0 : index
    %316 = vector.load %arg4[%c23, %c0_134] : memref<39x128xf32, #tpu.memory_space<vmem>>, vector<1x128xf32>
    %c5_i32_135 = arith.constant 5 : i32
    %317 = tpu.dynamic_rotate %296 by %c5_i32_135 dim 1 : vector<4x8x128xf32>, i32 -> vector<4x8x128xf32>
    %c5_i32_136 = arith.constant 5 : i32
    %318 = vector.broadcast %c5_i32_136 : i32 to vector<4x8x128xi32>
    %319 = arith.cmpi sge, %60, %318 : vector<4x8x128xi32>
    %cst_137 = arith.constant 0.000000e+00 : f32
    %320 = vector.broadcast %cst_137 : f32 to vector<4x8x128xf32>
    %321 = arith.select %319, %317, %320 : vector<4x8x128xi1>, vector<4x8x128xf32>
    %322 = vector.shape_cast %316 : vector<1x128xf32> to vector<1x1x128xf32>
    %323 = vector.broadcast %322 : vector<1x1x128xf32> to vector<4x8x128xf32>
    %324 = arith.mulf %323, %321 : vector<4x8x128xf32>
    %325 = arith.addf %315, %324 : vector<4x8x128xf32>
    %c24 = arith.constant 24 : index
    %c0_138 = arith.constant 0 : index
    %326 = vector.load %arg4[%c24, %c0_138] : memref<39x128xf32, #tpu.memory_space<vmem>>, vector<1x128xf32>
    %c4_i32_139 = arith.constant 4 : i32
    %327 = tpu.dynamic_rotate %296 by %c4_i32_139 dim 1 : vector<4x8x128xf32>, i32 -> vector<4x8x128xf32>
    %c4_i32_140 = arith.constant 4 : i32
    %328 = vector.broadcast %c4_i32_140 : i32 to vector<4x8x128xi32>
    %329 = arith.cmpi sge, %60, %328 : vector<4x8x128xi32>
    %cst_141 = arith.constant 0.000000e+00 : f32
    %330 = vector.broadcast %cst_141 : f32 to vector<4x8x128xf32>
    %331 = arith.select %329, %327, %330 : vector<4x8x128xi1>, vector<4x8x128xf32>
    %332 = vector.shape_cast %326 : vector<1x128xf32> to vector<1x1x128xf32>
    %333 = vector.broadcast %332 : vector<1x1x128xf32> to vector<4x8x128xf32>
    %334 = arith.mulf %333, %331 : vector<4x8x128xf32>
    %335 = arith.addf %325, %334 : vector<4x8x128xf32>
    %c25 = arith.constant 25 : index
    %c0_142 = arith.constant 0 : index
    %336 = vector.load %arg4[%c25, %c0_142] : memref<39x128xf32, #tpu.memory_space<vmem>>, vector<1x128xf32>
    %c3_i32_143 = arith.constant 3 : i32
    %337 = tpu.dynamic_rotate %296 by %c3_i32_143 dim 1 : vector<4x8x128xf32>, i32 -> vector<4x8x128xf32>
    %c3_i32_144 = arith.constant 3 : i32
    %338 = vector.broadcast %c3_i32_144 : i32 to vector<4x8x128xi32>
    %339 = arith.cmpi sge, %60, %338 : vector<4x8x128xi32>
    %cst_145 = arith.constant 0.000000e+00 : f32
    %340 = vector.broadcast %cst_145 : f32 to vector<4x8x128xf32>
    %341 = arith.select %339, %337, %340 : vector<4x8x128xi1>, vector<4x8x128xf32>
    %342 = vector.shape_cast %336 : vector<1x128xf32> to vector<1x1x128xf32>
    %343 = vector.broadcast %342 : vector<1x1x128xf32> to vector<4x8x128xf32>
    %344 = arith.mulf %343, %341 : vector<4x8x128xf32>
    %345 = arith.addf %335, %344 : vector<4x8x128xf32>
    %c26 = arith.constant 26 : index
    %c0_146 = arith.constant 0 : index
    %346 = vector.load %arg4[%c26, %c0_146] : memref<39x128xf32, #tpu.memory_space<vmem>>, vector<1x128xf32>
    %c2_i32_147 = arith.constant 2 : i32
    %347 = tpu.dynamic_rotate %296 by %c2_i32_147 dim 1 : vector<4x8x128xf32>, i32 -> vector<4x8x128xf32>
    %c2_i32_148 = arith.constant 2 : i32
    %348 = vector.broadcast %c2_i32_148 : i32 to vector<4x8x128xi32>
    %349 = arith.cmpi sge, %60, %348 : vector<4x8x128xi32>
    %cst_149 = arith.constant 0.000000e+00 : f32
    %350 = vector.broadcast %cst_149 : f32 to vector<4x8x128xf32>
    %351 = arith.select %349, %347, %350 : vector<4x8x128xi1>, vector<4x8x128xf32>
    %352 = vector.shape_cast %346 : vector<1x128xf32> to vector<1x1x128xf32>
    %353 = vector.broadcast %352 : vector<1x1x128xf32> to vector<4x8x128xf32>
    %354 = arith.mulf %353, %351 : vector<4x8x128xf32>
    %355 = arith.addf %345, %354 : vector<4x8x128xf32>
    %c27 = arith.constant 27 : index
    %c0_150 = arith.constant 0 : index
    %356 = vector.load %arg4[%c27, %c0_150] : memref<39x128xf32, #tpu.memory_space<vmem>>, vector<1x128xf32>
    %c1_i32_151 = arith.constant 1 : i32
    %357 = tpu.dynamic_rotate %296 by %c1_i32_151 dim 1 : vector<4x8x128xf32>, i32 -> vector<4x8x128xf32>
    %c1_i32_152 = arith.constant 1 : i32
    %358 = vector.broadcast %c1_i32_152 : i32 to vector<4x8x128xi32>
    %359 = arith.cmpi sge, %60, %358 : vector<4x8x128xi32>
    %cst_153 = arith.constant 0.000000e+00 : f32
    %360 = vector.broadcast %cst_153 : f32 to vector<4x8x128xf32>
    %361 = arith.select %359, %357, %360 : vector<4x8x128xi1>, vector<4x8x128xf32>
    %362 = vector.shape_cast %356 : vector<1x128xf32> to vector<1x1x128xf32>
    %363 = vector.broadcast %362 : vector<1x1x128xf32> to vector<4x8x128xf32>
    %364 = arith.mulf %363, %361 : vector<4x8x128xf32>
    %365 = arith.addf %355, %364 : vector<4x8x128xf32>
    %c28 = arith.constant 28 : index
    %c0_154 = arith.constant 0 : index
    %366 = vector.load %arg4[%c28, %c0_154] : memref<39x128xf32, #tpu.memory_space<vmem>>, vector<1x128xf32>
    %367 = vector.shape_cast %366 : vector<1x128xf32> to vector<1x1x128xf32>
    %368 = vector.broadcast %367 : vector<1x1x128xf32> to vector<4x8x128xf32>
    %369 = arith.mulf %368, %296 : vector<4x8x128xf32>
    %370 = arith.addf %365, %369 : vector<4x8x128xf32>
    %c29 = arith.constant 29 : index
    %c0_155 = arith.constant 0 : index
    %371 = vector.load %arg4[%c29, %c0_155] : memref<39x128xf32, #tpu.memory_space<vmem>>, vector<1x128xf32>
    %c7_i32_156 = arith.constant 7 : i32
    %372 = tpu.dynamic_rotate %296 by %c7_i32_156 dim 1 : vector<4x8x128xf32>, i32 -> vector<4x8x128xf32>
    %c7_i32_157 = arith.constant 7 : i32
    %373 = vector.broadcast %c7_i32_157 : i32 to vector<4x8x128xi32>
    %374 = arith.cmpi slt, %60, %373 : vector<4x8x128xi32>
    %cst_158 = arith.constant 0.000000e+00 : f32
    %375 = vector.broadcast %cst_158 : f32 to vector<4x8x128xf32>
    %376 = arith.select %374, %372, %375 : vector<4x8x128xi1>, vector<4x8x128xf32>
    %377 = vector.shape_cast %371 : vector<1x128xf32> to vector<1x1x128xf32>
    %378 = vector.broadcast %377 : vector<1x1x128xf32> to vector<4x8x128xf32>
    %379 = arith.mulf %378, %376 : vector<4x8x128xf32>
    %380 = arith.addf %370, %379 : vector<4x8x128xf32>
    %c30 = arith.constant 30 : index
    %c0_159 = arith.constant 0 : index
    %381 = vector.load %arg4[%c30, %c0_159] : memref<39x128xf32, #tpu.memory_space<vmem>>, vector<1x128xf32>
    %c6_i32_160 = arith.constant 6 : i32
    %382 = tpu.dynamic_rotate %296 by %c6_i32_160 dim 1 : vector<4x8x128xf32>, i32 -> vector<4x8x128xf32>
    %c6_i32_161 = arith.constant 6 : i32
    %383 = vector.broadcast %c6_i32_161 : i32 to vector<4x8x128xi32>
    %384 = arith.cmpi slt, %60, %383 : vector<4x8x128xi32>
    %cst_162 = arith.constant 0.000000e+00 : f32
    %385 = vector.broadcast %cst_162 : f32 to vector<4x8x128xf32>
    %386 = arith.select %384, %382, %385 : vector<4x8x128xi1>, vector<4x8x128xf32>
    %387 = vector.shape_cast %381 : vector<1x128xf32> to vector<1x1x128xf32>
    %388 = vector.broadcast %387 : vector<1x1x128xf32> to vector<4x8x128xf32>
    %389 = arith.mulf %388, %386 : vector<4x8x128xf32>
    %390 = arith.addf %380, %389 : vector<4x8x128xf32>
    %c31 = arith.constant 31 : index
    %c0_163 = arith.constant 0 : index
    %391 = vector.load %arg4[%c31, %c0_163] : memref<39x128xf32, #tpu.memory_space<vmem>>, vector<1x128xf32>
    %c5_i32_164 = arith.constant 5 : i32
    %392 = tpu.dynamic_rotate %296 by %c5_i32_164 dim 1 : vector<4x8x128xf32>, i32 -> vector<4x8x128xf32>
    %c5_i32_165 = arith.constant 5 : i32
    %393 = vector.broadcast %c5_i32_165 : i32 to vector<4x8x128xi32>
    %394 = arith.cmpi slt, %60, %393 : vector<4x8x128xi32>
    %cst_166 = arith.constant 0.000000e+00 : f32
    %395 = vector.broadcast %cst_166 : f32 to vector<4x8x128xf32>
    %396 = arith.select %394, %392, %395 : vector<4x8x128xi1>, vector<4x8x128xf32>
    %397 = vector.shape_cast %391 : vector<1x128xf32> to vector<1x1x128xf32>
    %398 = vector.broadcast %397 : vector<1x1x128xf32> to vector<4x8x128xf32>
    %399 = arith.mulf %398, %396 : vector<4x8x128xf32>
    %400 = arith.addf %390, %399 : vector<4x8x128xf32>
    %c32 = arith.constant 32 : index
    %c0_167 = arith.constant 0 : index
    %401 = vector.load %arg4[%c32, %c0_167] : memref<39x128xf32, #tpu.memory_space<vmem>>, vector<1x128xf32>
    %c4_i32_168 = arith.constant 4 : i32
    %402 = tpu.dynamic_rotate %296 by %c4_i32_168 dim 1 : vector<4x8x128xf32>, i32 -> vector<4x8x128xf32>
    %c4_i32_169 = arith.constant 4 : i32
    %403 = vector.broadcast %c4_i32_169 : i32 to vector<4x8x128xi32>
    %404 = arith.cmpi slt, %60, %403 : vector<4x8x128xi32>
    %cst_170 = arith.constant 0.000000e+00 : f32
    %405 = vector.broadcast %cst_170 : f32 to vector<4x8x128xf32>
    %406 = arith.select %404, %402, %405 : vector<4x8x128xi1>, vector<4x8x128xf32>
    %407 = vector.shape_cast %401 : vector<1x128xf32> to vector<1x1x128xf32>
    %408 = vector.broadcast %407 : vector<1x1x128xf32> to vector<4x8x128xf32>
    %409 = arith.mulf %408, %406 : vector<4x8x128xf32>
    %410 = arith.addf %400, %409 : vector<4x8x128xf32>
    %c33 = arith.constant 33 : index
    %c0_171 = arith.constant 0 : index
    %411 = vector.load %arg4[%c33, %c0_171] : memref<39x128xf32, #tpu.memory_space<vmem>>, vector<1x128xf32>
    %c3_i32_172 = arith.constant 3 : i32
    %412 = tpu.dynamic_rotate %296 by %c3_i32_172 dim 1 : vector<4x8x128xf32>, i32 -> vector<4x8x128xf32>
    %c3_i32_173 = arith.constant 3 : i32
    %413 = vector.broadcast %c3_i32_173 : i32 to vector<4x8x128xi32>
    %414 = arith.cmpi slt, %60, %413 : vector<4x8x128xi32>
    %cst_174 = arith.constant 0.000000e+00 : f32
    %415 = vector.broadcast %cst_174 : f32 to vector<4x8x128xf32>
    %416 = arith.select %414, %412, %415 : vector<4x8x128xi1>, vector<4x8x128xf32>
    %417 = vector.shape_cast %411 : vector<1x128xf32> to vector<1x1x128xf32>
    %418 = vector.broadcast %417 : vector<1x1x128xf32> to vector<4x8x128xf32>
    %419 = arith.mulf %418, %416 : vector<4x8x128xf32>
    %420 = arith.addf %410, %419 : vector<4x8x128xf32>
    %c34 = arith.constant 34 : index
    %c0_175 = arith.constant 0 : index
    %421 = vector.load %arg4[%c34, %c0_175] : memref<39x128xf32, #tpu.memory_space<vmem>>, vector<1x128xf32>
    %c2_i32_176 = arith.constant 2 : i32
    %422 = tpu.dynamic_rotate %296 by %c2_i32_176 dim 1 : vector<4x8x128xf32>, i32 -> vector<4x8x128xf32>
    %c2_i32_177 = arith.constant 2 : i32
    %423 = vector.broadcast %c2_i32_177 : i32 to vector<4x8x128xi32>
    %424 = arith.cmpi slt, %60, %423 : vector<4x8x128xi32>
    %cst_178 = arith.constant 0.000000e+00 : f32
    %425 = vector.broadcast %cst_178 : f32 to vector<4x8x128xf32>
    %426 = arith.select %424, %422, %425 : vector<4x8x128xi1>, vector<4x8x128xf32>
    %427 = vector.shape_cast %421 : vector<1x128xf32> to vector<1x1x128xf32>
    %428 = vector.broadcast %427 : vector<1x1x128xf32> to vector<4x8x128xf32>
    %429 = arith.mulf %428, %426 : vector<4x8x128xf32>
    %430 = arith.addf %420, %429 : vector<4x8x128xf32>
    %c35 = arith.constant 35 : index
    %c0_179 = arith.constant 0 : index
    %431 = vector.load %arg4[%c35, %c0_179] : memref<39x128xf32, #tpu.memory_space<vmem>>, vector<1x128xf32>
    %c1_i32_180 = arith.constant 1 : i32
    %432 = tpu.dynamic_rotate %296 by %c1_i32_180 dim 1 : vector<4x8x128xf32>, i32 -> vector<4x8x128xf32>
    %c1_i32_181 = arith.constant 1 : i32
    %433 = vector.broadcast %c1_i32_181 : i32 to vector<4x8x128xi32>
    %434 = arith.cmpi slt, %60, %433 : vector<4x8x128xi32>
    %cst_182 = arith.constant 0.000000e+00 : f32
    %435 = vector.broadcast %cst_182 : f32 to vector<4x8x128xf32>
    %436 = arith.select %434, %432, %435 : vector<4x8x128xi1>, vector<4x8x128xf32>
    %437 = vector.shape_cast %431 : vector<1x128xf32> to vector<1x1x128xf32>
    %438 = vector.broadcast %437 : vector<1x1x128xf32> to vector<4x8x128xf32>
    %439 = arith.mulf %438, %436 : vector<4x8x128xf32>
    %440 = arith.addf %430, %439 : vector<4x8x128xf32>
    %441 = arith.addf %291, %440 : vector<4x8x128xf32>
    %c8_183 = arith.constant 8 : index
    %c0_184 = arith.constant 0 : index
    %442 = vector.load %arg5[%c8_183, %c0_184] : memref<14x128xf32, #tpu.memory_space<vmem>>, vector<1x128xf32>
    %443 = vector.shape_cast %442 : vector<1x128xf32> to vector<1x1x128xf32>
    %444 = vector.broadcast %443 : vector<1x1x128xf32> to vector<4x8x128xf32>
    %445 = arith.addf %441, %444 : vector<4x8x128xf32>
    %c4_185 = arith.constant 4 : index
    %c0_186 = arith.constant 0 : index
    %c0_187 = arith.constant 0 : index
    %446 = vector.load %arg6[%c4_185, %c0_186, %c0_187] : memref<5x128x128xf32, #tpu.memory_space<vmem>>, vector<1x128x128xf32>
    %447 = vector.shape_cast %446 : vector<1x128x128xf32> to vector<128x128xf32>
    %c10_188 = arith.constant 10 : index
    %c0_189 = arith.constant 0 : index
    %448 = vector.load %arg5[%c10_188, %c0_189] : memref<14x128xf32, #tpu.memory_space<vmem>>, vector<1x128xf32>
    %449 = vector.shape_cast %445 : vector<4x8x128xf32> to vector<32x128xf32>
    %cst_190 = arith.constant dense<0.000000e+00> : vector<32x128xf32>
    %450 = tpu.matmul %449, %447, %cst_190 {dimension_numbers = #tpu.dot_dimension_numbers<[1], [0], [0], [1], [0, 0, 1, 1], [], []>} : vector<32x128xf32>, vector<128x128xf32>, vector<32x128xf32> -> vector<32x128xf32>
    %451 = vector.broadcast %448 : vector<1x128xf32> to vector<32x128xf32>
    %452 = arith.addf %450, %451 : vector<32x128xf32>
    %453 = arith.mulf %452, %59 : vector<32x128xf32>
    %cst_191 = arith.constant dense<0.000000e+00> : vector<32x128xf32>
    %454 = tpu.matmul %453, %447, %cst_191 {dimension_numbers = #tpu.dot_dimension_numbers<[1], [0], [0], [1], [0, 0, 1, 1], [], []>} : vector<32x128xf32>, vector<128x128xf32>, vector<32x128xf32> -> vector<32x128xf32>
    %455 = vector.broadcast %448 : vector<1x128xf32> to vector<32x128xf32>
    %456 = arith.addf %454, %455 : vector<32x128xf32>
    %457 = vector.shape_cast %456 : vector<32x128xf32> to vector<4x8x128xf32>
    %c0_192 = arith.constant 0 : index
    %c0_193 = arith.constant 0 : index
    %c0_194 = arith.constant 0 : index
    %458 = vector.load %arg7[%c0_192, %c0_193, %c0_194] : memref<4x8x128xf32, #tpu.memory_space<vmem>>, vector<4x8x128xf32>
    tpu.vector_store %arg7[%c0_192, %c0_193, %c0_194], %457 {strides = array<i32>} : memref<4x8x128xf32, #tpu.memory_space<vmem>>, vector<4x8x128xf32>,
    return
  }
  func.func @transform_0(%arg0: i32) -> (i32, i32, i32) {
    %c0_i32 = arith.constant 0 : i32
    %c0_i32_0 = arith.constant 0 : i32
    %c0_i32_1 = arith.constant 0 : i32
    return %arg0, %c0_i32, %c0_i32_0 : i32, i32, i32
  }
  func.func @transform_1(%arg0: i32) -> (i32, i32) {
    %c0_i32 = arith.constant 0 : i32
    %c0_i32_0 = arith.constant 0 : i32
    %c0_i32_1 = arith.constant 0 : i32
    return %c0_i32, %c0_i32_0 : i32, i32
  }
  func.func @transform_2(%arg0: i32) -> (i32, i32) {
    %c0_i32 = arith.constant 0 : i32
    %c0_i32_0 = arith.constant 0 : i32
    %c0_i32_1 = arith.constant 0 : i32
    return %c0_i32, %c0_i32_0 : i32, i32
  }
  func.func @transform_3(%arg0: i32) -> (i32, i32) {
    %c0_i32 = arith.constant 0 : i32
    %c0_i32_0 = arith.constant 0 : i32
    %c0_i32_1 = arith.constant 0 : i32
    return %c0_i32, %c0_i32_0 : i32, i32
  }
  func.func @transform_4(%arg0: i32) -> (i32, i32) {
    %c0_i32 = arith.constant 0 : i32
    %c0_i32_0 = arith.constant 0 : i32
    %c0_i32_1 = arith.constant 0 : i32
    return %c0_i32, %c0_i32_0 : i32, i32
  }
  func.func @transform_5(%arg0: i32) -> (i32, i32, i32) {
    %c0_i32 = arith.constant 0 : i32
    %c0_i32_0 = arith.constant 0 : i32
    %c0_i32_1 = arith.constant 0 : i32
    %c0_i32_2 = arith.constant 0 : i32
    return %c0_i32, %c0_i32_0, %c0_i32_1 : i32, i32, i32
  }
  func.func @transform_6(%arg0: i32) -> (i32, i32, i32) {
    %c0_i32 = arith.constant 0 : i32
    %c0_i32_0 = arith.constant 0 : i32
    %c0_i32_1 = arith.constant 0 : i32
    return %arg0, %c0_i32, %c0_i32_0 : i32, i32, i32
  }
}

</mosaic_0001>

<bundles_post_ra>
// kernel: tpu_custom_call.1
= control target key start
LH: loop header
LB: loop body
LE: loop exit
PB: predicated region body
PF: predicated region fallthrough
CT: control target
= control target key end

     0   :  { %11 = vsyncpa [#allocation3], 0  ;;  %s4282_s0 = inlined_call_operand.hbm [shape: f32[4,8,128], index: 0, kind: input, shape index: {}]   ;;  %s4283_s1 = inlined_call_operand.hbm [shape: f32[128,640], index: 1, kind: input, shape index: {}]   ;;  %s4284_s2 = inlined_call_operand.hbm [shape: f32[128,384], index: 2, kind: input, shape index: {}]   ;;  %s4285_s3 = inlined_call_operand.hbm [shape: f32[39,128], index: 3, kind: input, shape index: {}]   ;;  %s4286_s4 = inlined_call_operand.hbm [shape: f32[14,128], index: 4, kind: input, shape index: {}]   ;;  %s4287_s5 = inlined_call_operand.hbm [shape: f32[5,128,128], index: 5, kind: input, shape index: {}]   ;;  %s4288_s6 = inlined_call_operand.hbm [shape: f32[4,8,128], index: 6, kind: output, shape index: {}]  }
   0x1   :  { %12 = vsyncpa [#allocation6], 0 }
   0x2   :  { %13 = vsyncpa [#allocation9], 0 }
   0x3   :  { %14 = vsyncpa [#allocation12], 0 }
   0x4   :  { %15 = vsyncpa [#allocation4], 0  ;;  %s3259_s21 = smov [#allocation5]   ;;  %s3095_s25 = scalar_lea.hbm %s4283_s1, 10240 }
   0x5   :  { %s33_s22 = sshll.u32 %s3259_s21, 4  ;;  %p3096_p0 = scmp.ne.s32.totalorder %s4283_s1, %s3095_s25  ;;  %s34_s22 = int_to_ptr.vmem [resolvable:$true] %s33_s22 }
   0x6   :  { %p3099_p1 = scmp.lt.u32.totalorder %s3095_s25, %s4283_s1 }
   0x8   :  { %p3101_p2 = pnand %p3099_p1, %p3096_p0 }
   0xa   :  { %3104 = shalt.err (!%p3101_p2)
}
   0xb   :  { %s3105_s30 = scalar_lea.vmem %s34_s22, 10240  ;;  %p3110_p4 = scmp.lt.s32.totalorder %s34_s22, %s34_s22 }
   0xc   :  { %p3106_p3 = scmp.ne.s32.totalorder %s34_s22, %s3105_s30  ;;  %p3111_p5 = scmp.lt.s32.totalorder %s3105_s30, %s3105_s30 }
   0xe   :  { %p3112_p6 = por %p3111_p5, %p3110_p4 }
  0x10   :  { %p3113_p7 = pnand %p3112_p6, %p3106_p3 }
  0x12   :  { %3116 = shalt.err (!%p3113_p7)
}
  0x13   :  { %s3260_s7 = smov 640   ;;  %s3261_s8 = smov 40  }
  0x14   :  { %39 = dma.hbm_to_vmem [thread:$0]  %s4283_s1, 10240, %s34_s22, [#allocation6], %s3260_s7, %s3260_s7, %s3261_s8  }
  0x15   :  { %s3262_s11 = smov [#allocation8]   ;;  %s3263_s13 = smov [#allocation2]  }
  0x16   :  { %s57_s12 = sshll.u32 %s3262_s11, 4  ;;  %s21_s14 = sshll.u32 %s3263_s13, 4  ;;  %s58_s12 = int_to_ptr.vmem [resolvable:$true] %s57_s12  ;;  %s22_s14 = int_to_ptr.vmem [resolvable:$true] %s21_s14 }
  0x17   :  { %s3117_s17 = scalar_lea.hbm %s4285_s3, 640 }
  0x18   :  { %p3118_p8 = scmp.ne.s32.totalorder %s4285_s3, %s3117_s17  ;;  %p3121_p9 = scmp.lt.u32.totalorder %s3117_s17, %s4285_s3 }
  0x1a   :  { %p3123_p10 = pnand %p3121_p9, %p3118_p8 }
  0x1c   :  { %3126 = shalt.err (!%p3123_p10)
}
  0x1d   :  { %s3127_s1 = scalar_lea.vmem %s58_s12, 640  ;;  %p3132_p12 = scmp.lt.s32.totalorder %s58_s12, %s58_s12 }
  0x1e   :  { %p3128_p11 = scmp.ne.s32.totalorder %s58_s12, %s3127_s1  ;;  %p3133_p13 = scmp.lt.s32.totalorder %s3127_s1, %s3127_s1 }
  0x20   :  { %p3134_p0 = por %p3133_p13, %p3132_p12 }
  0x22   :  { %p3135_p1 = pnand %p3134_p0, %p3128_p11 }
  0x24   :  { %3138 = shalt.err (!%p3135_p1)
}
  0x25   :  { %s3264_s22 = smov 128   ;;  %s3265_s23 = smov 8  }
  0x26   :  { %63 = dma.hbm_to_vmem [thread:$0]  %s4285_s3, 640, %s58_s12, [#allocation9], %s3264_s22, %s3264_s22, %s3265_s23  }
  0x27   :  { %s3139_s28 = scalar_lea.hbm %s4282_s0, 512 }
  0x28   :  { %p3140_p2 = scmp.ne.s32.totalorder %s4282_s0, %s3139_s28  ;;  %p3143_p3 = scmp.lt.u32.totalorder %s3139_s28, %s4282_s0 }
  0x2a   :  { %p3145_p4 = pnand %p3143_p3, %p3140_p2 }
  0x2c   :  { %3148 = shalt.err (!%p3145_p4)
}
  0x2d   :  { %s3149_s9 = scalar_lea.vmem %s22_s14, 512  ;;  %p3154_p6 = scmp.lt.s32.totalorder %s22_s14, %s22_s14 }
  0x2e   :  { %p3150_p5 = scmp.ne.s32.totalorder %s22_s14, %s3149_s9  ;;  %p3155_p7 = scmp.lt.s32.totalorder %s3149_s9, %s3149_s9 }
  0x30   :  { %p3156_p8 = por %p3155_p7, %p3154_p6 }
  0x32   :  { %p3157_p9 = pnand %p3156_p8, %p3150_p5 }
  0x34   :  { %3160 = shalt.err (!%p3157_p9)
}
  0x35   :  { %27 = dma.hbm_to_vmem [thread:$0]  %s4282_s0, 512, %s22_s14, [#allocation3], %s3264_s22, %s3264_s22, %s3265_s23  }
  0x36   :  { %s3266_s11 = smov [#allocation7]   ;;  %s3161_s16 = scalar_lea.hbm %s4284_s2, 6144 }
  0x37   :  { %s45_s12 = sshll.u32 %s3266_s11, 4  ;;  %p3162_p10 = scmp.ne.s32.totalorder %s4284_s2, %s3161_s16  ;;  %s46_s12 = int_to_ptr.vmem [resolvable:$true] %s45_s12 }
  0x38   :  { %p3165_p11 = scmp.lt.u32.totalorder %s3161_s16, %s4284_s2 }
  0x3a   :  { %p3167_p12 = pnand %p3165_p11, %p3162_p10 }
  0x3c   :  { %3170 = shalt.err (!%p3167_p12)
}
  0x3d   :  { %s3171_s21 = scalar_lea.vmem %s46_s12, 6144  ;;  %p3176_p0 = scmp.lt.s32.totalorder %s46_s12, %s46_s12 }
  0x3e   :  { %p3172_p13 = scmp.ne.s32.totalorder %s46_s12, %s3171_s21  ;;  %p3177_p1 = scmp.lt.s32.totalorder %s3171_s21, %s3171_s21 }
  0x40   :  { %p3178_p2 = por %p3177_p1, %p3176_p0 }
  0x42   :  { %p3179_p3 = pnand %p3178_p2, %p3172_p13 }
  0x44   :  { %3182 = shalt.err (!%p3179_p3)
}
  0x45   :  { %s3267_s0 = smov 384   ;;  %s3268_s14 = smov 24  }
  0x46   :  { %51 = dma.hbm_to_vmem [thread:$0]  %s4284_s2, 6144, %s46_s12, [#allocation6], %s3267_s0, %s3267_s0, %s3268_s14  }
  0x47   :  { %s3269_s25 = smov [#allocation10]   ;;  %s3270_s27 = smov [#allocation11]  }
  0x48   :  { %s69_s26 = sshll.u32 %s3269_s25, 4  ;;  %s81_s28 = sshll.u32 %s3270_s27, 4  ;;  %s70_s26 = int_to_ptr.vmem [resolvable:$true] %s69_s26  ;;  %s3365_s28 = int_to_ptr.vmem [resolvable:$true] %s81_s28 }
  0x49   :  { %s3183_s7 = scalar_lea.hbm %s4286_s4, 256 }
  0x4a   :  { %p3184_p4 = scmp.ne.s32.totalorder %s4286_s4, %s3183_s7  ;;  %p3187_p5 = scmp.lt.u32.totalorder %s3183_s7, %s4286_s4 }
  0x4c   :  { %p3189_p6 = pnand %p3187_p5, %p3184_p4 }
  0x4e   :  { %3192 = shalt.err (!%p3189_p6)
}
  0x4f   :  { %s3193_s2 = scalar_lea.vmem %s70_s26, 256  ;;  %p3198_p8 = scmp.lt.s32.totalorder %s70_s26, %s70_s26 }
  0x50   :  { %p3194_p7 = scmp.ne.s32.totalorder %s70_s26, %s3193_s2  ;;  %p3199_p9 = scmp.lt.s32.totalorder %s3193_s2, %s3193_s2 }
  0x52   :  { %p3200_p10 = por %p3199_p9, %p3198_p8 }
  0x54   :  { %p3201_p11 = pnand %p3200_p10, %p3194_p7 }
  0x56   :  { %3204 = shalt.err (!%p3201_p11)
}
  0x57   :  { %75 = dma.hbm_to_vmem [thread:$0]  %s4286_s4, 256, %s70_s26, [#allocation9], %s3264_s22, %s3264_s22, %s3265_s23  }
  0x58   :  { %s3205_s16 = scalar_lea.hbm %s4287_s5, 10240 }
  0x59   :  { %p3206_p12 = scmp.ne.s32.totalorder %s4287_s5, %s3205_s16  ;;  %p3209_p13 = scmp.lt.u32.totalorder %s3205_s16, %s4287_s5 }
  0x5b   :  { %p3211_p0 = pnand %p3209_p13, %p3206_p12 }
  0x5d   :  { %3214 = shalt.err (!%p3211_p0)
}
  0x5e   :  { %s3215_s21 = scalar_lea.vmem %s3365_s28, 10240  ;;  %p3220_p2 = scmp.lt.s32.totalorder %s3365_s28, %s3365_s28 }
  0x5f   :  { %p3216_p1 = scmp.ne.s32.totalorder %s3365_s28, %s3215_s21  ;;  %p3221_p3 = scmp.lt.s32.totalorder %s3215_s21, %s3215_s21 }
  0x61   :  { %p3222_p4 = por %p3221_p3, %p3220_p2 }
  0x63   :  { %p3223_p5 = pnand %p3222_p4, %p3216_p1 }
  0x65   :  { %3226 = shalt.err (!%p3223_p5)
}
  0x66   :  { %87 = dma.hbm_to_vmem [thread:$0]  %s4287_s5, 10240, %s3365_s28, [#allocation12], %s3264_s22, %s3264_s22, %s3265_s23  }
  0x67   :  { %3249 = dma.done.wait [#allocation3], 512  }
  0x68   :  { %3250 = vsyncadd [#allocation3], 4294966784 }
  0x69   :  { %3251 = dma.done.wait [#allocation6], 16384  }
  0x6a   :  { %3252 = vsyncadd [#allocation6], 4294950912 }
  0x6b   :  { %3253 = dma.done.wait [#allocation9], 896  }
  0x6c   :  { %3254 = vsyncadd [#allocation9], 4294966400 }
  0x6d   :  { %3255 = dma.done.wait [#allocation12], 10240  }
  0x6e   :  { %3256 = vsyncadd [#allocation12], 4294957056  ;;  %v110_v0 = vld [vmem:[#allocation11] sm:$0xff]  ;;  %v111_v1 = vld [vmem:[#allocation11 + $0x8] sm:$0xff]  ;;  %v3271_v52 = vmov 0.0|0.0   ;;  %vm3272_vm0 = vmmov 0  }
  0x6f   :  { %v112_v2 = vld [vmem:[#allocation11 + $0x10] sm:$0xff]  ;;  %v2706_v3 = vpack.c.bf16 %v111_v1, %v110_v0  ;;  %v113_v4 = vld [vmem:[#allocation11 + $0x18] sm:$0xff]  ;;  %v114_v6 = vld [vmem:[#allocation11 + $0x20] sm:$0xff]  ;;  %vm406_vm1 = vcmask 1041409   ;;  %vm408_vm2 = vcmask 1042434   ;;  %vm410_vm3 = vcmask 1043459  }
  0x70   :  { %v2710_v5 = vpack.c.bf16 %v113_v4, %v112_v2  ;;  %v115_v7 = vld [vmem:[#allocation11 + $0x28] sm:$0xff]  ;;  %v116_v10 = vld [vmem:[#allocation11 + $0x30] sm:$0xff]  ;;  %v117_v11 = vld [vmem:[#allocation11 + $0x38] sm:$0xff]  ;;  %s3275_s5 = smov [#allocation13]  }
  0x71   :  { %2707 = vmatprep.subr.bf16.mxu0 %v2706_v3  ;;  %v2714_v8 = vpack.c.bf16 %v115_v7, %v114_v6  ;;  %v3402_v9 = vld [vmem:[#allocation2] sm:$0xff]  ;;  %v2718_v12 = vpack.c.bf16 %v117_v11, %v116_v10  ;;  %v118_v13 = vld [vmem:[#allocation11 + $0x40] sm:$0xff]  ;;  %v223_v17 = vld [vmem:[#allocation11 + $0x90] sm:$0xff]  ;;  %s2187_s14 = sshll.u32 %s3275_s5, 4  ;;  %s2188_s14 = int_to_ptr.vmem [resolvable:$true] %s2187_s14 }
  0x72   :  { %2709 = vmatpush3.bf16.msra.mxu0 %v2706_v3  ;;  %2440 = vmatprep.mubr.f32.mxu0 %v3402_v9  ;;  %v119_v14 = vld [vmem:[#allocation11 + $0x48] sm:$0xff]  ;;  %v221_v15 = vld [vmem:[#allocation11 + $0x80] sm:$0xff]  ;;  %v120_v19 = vld [vmem:[#allocation11 + $0x50] sm:$0xff]  ;;  %v351_v46 = vrot.slane %v3402_v9, 4  ;;  %s3227_s1 = scalar_lea.vmem %s2188_s14, 512  ;;  %p3232_p7 = scmp.lt.s32.totalorder %s2188_s14, %s2188_s14 }
  0x73   :  { %2711 = vmatprep.subr.bf16.mxu0 %v2710_v5  ;;  %v222_v16 = vld [vmem:[#allocation11 + $0x88] sm:$0xff]  ;;  %v2722_v18 = vpack.c.bf16 %v119_v14, %v118_v13  ;;  %v224_v21 = vld [vmem:[#allocation11 + $0x98] sm:$0xff]  ;;  %v225_v24 = vld [vmem:[#allocation11 + $0xa0] sm:$0xff]  ;;  %p3228_p6 = scmp.ne.s32.totalorder %s2188_s14, %s3227_s1  ;;  %p3233_p8 = scmp.lt.s32.totalorder %s3227_s1, %s3227_s1 }
  0x74   :  { %v2738_v20 = vpack.c.bf16 %v222_v16, %v221_v15  ;;  %v121_v22 = vld [vmem:[#allocation11 + $0x58] sm:$0xff]  ;;  %v2742_v23 = vpack.c.bf16 %v224_v21, %v223_v17  ;;  %v226_v25 = vld [vmem:[#allocation11 + $0xa8] sm:$0xff]  ;;  %v122_v27 = vld [vmem:[#allocation11 + $0x60] sm:$0xff]  ;;  %v352_v57 = vadd.f32 %v351_v46, %v3402_v9 }
  0x75   :  { %v2726_v26 = vpack.c.bf16 %v121_v22, %v120_v19  ;;  %v2746_v28 = vpack.c.bf16 %v226_v25, %v225_v24  ;;  %v123_v29 = vld [vmem:[#allocation11 + $0x68] sm:$0xff]  ;;  %v227_v30 = vld [vmem:[#allocation11 + $0xb0] sm:$0xff]  ;;  %v228_v31 = vld [vmem:[#allocation11 + $0xb8] sm:$0xff]  ;;  %p3234_p9 = por %p3233_p8, %p3232_p7 }
  0x76   :  { %2713 = vmatpush3.bf16.msra.mxu0 %v2710_v5  ;;  %2739 = vmatprep.subr.bf16.mxu1 %v2738_v20  ;;  %v2730_v32 = vpack.c.bf16 %v123_v29, %v122_v27  ;;  %v124_v33 = vld [vmem:[#allocation11 + $0x70] sm:$0xff]  ;;  %v2750_v34 = vpack.c.bf16 %v228_v31, %v227_v30  ;;  %v125_v35 = vld [vmem:[#allocation11 + $0x78] sm:$0xff]  ;;  %v229_v36 = vld [vmem:[#allocation11 + $0xc0] sm:$0xff]  ;;  %v353_v1 = vrot.slane %v352_v57, 2  ;;  %v3273_v5 = vmov 0.0  }
  0x77   :  { %2715 = vmatprep.subr.bf16.mxu0 %v2714_v8  ;;  %2741 = vmatpush3.bf16.msra.mxu1 %v2738_v20  ;;  %v230_v37 = vld [vmem:[#allocation11 + $0xc8] sm:$0xff]  ;;  %v2734_v38 = vpack.c.bf16 %v125_v35, %v124_v33  ;;  %v231_v40 = vld [vmem:[#allocation11 + $0xd0] sm:$0xff]  ;;  %v232_v41 = vld [vmem:[#allocation11 + $0xd8] sm:$0xff]  ;;  %p3235_p10 = pnand %p3234_p9, %p3228_p6 }
  0x78   :  { %2743 = vmatprep.subr.bf16.mxu1 %v2742_v23  ;;  %v2754_v39 = vpack.c.bf16 %v230_v37, %v229_v36  ;;  %v3405_v42 = vld [vmem:[#allocation2 + $0x8] sm:$0xff]  ;;  %v381_v43 = vld [vmem:[#allocation11 + $0x100] sm:$0xff]  ;;  %v382_v44 = vld [vmem:[#allocation11 + $0x108] sm:$0xff]  ;;  %v2758_v45 = vpack.c.bf16 %v232_v41, %v231_v40  ;;  %v354_v10 = vadd.f32 %v353_v1, %v352_v57 }
  0x79   :  { %v357_v47 = vrot.slane %v3405_v42, 4  ;;  %v3409_v48 = vld [vmem:[#allocation2 + $0x10] sm:$0xff]  ;;  %v233_v49 = vld [vmem:[#allocation11 + $0xe0] sm:$0xff]  ;;  %v234_v50 = vld [vmem:[#allocation11 + $0xe8] sm:$0xff]  ;;  %v2771_v51 = vpack.c.bf16 %v382_v44, %v381_v43 }
  0x7a   :  { %2717 = vmatpush3.bf16.msra.mxu0 %v2714_v8  ;;  %v383_v53 = vld [vmem:[#allocation11 + $0x110] sm:$0xff]  ;;  %v384_v54 = vld [vmem:[#allocation11 + $0x118] sm:$0xff]  ;;  %v363_v55 = vrot.slane %v3409_v48, 4  ;;  %v3413_v56 = vld [vmem:[#allocation2 + $0x18] sm:$0xff]  ;;  %v2762_v59 = vpack.c.bf16 %v234_v50, %v233_v49  ;;  %v355_v17 = vrot.slane %v354_v10, 1 }
  0x7b   :  { %2719 = vmatprep.subr.bf16.mxu0 %v2718_v12  ;;  %2745 = vmatpush3.bf16.msra.mxu1 %v2742_v23  ;;  %v358_v58 = vadd.f32 %v357_v47, %v3405_v42  ;;  %v2774_v60 = vpack.c.bf16 %v384_v54, %v383_v53  ;;  %v369_v61 = vrot.slane %v3413_v56, 4  ;;  %v385_v62 = vld [vmem:[#allocation11 + $0x120] sm:$0xff]  ;;  %v386_v63 = vld [vmem:[#allocation11 + $0x128] sm:$0xff]  ;;  %v387_v6 = vld [vmem:[#allocation11 + $0x130] sm:$0xff] }
  0x7c   :  { %2747 = vmatprep.subr.bf16.mxu1 %v2746_v28  ;;  %v364_v0 = vadd.f32 %v363_v55, %v3409_v48  ;;  %v2777_v3 = vpack.c.bf16 %v386_v63, %v385_v62  ;;  %v388_v7 = vld [vmem:[#allocation11 + $0x138] sm:$0xff]  ;;  %v389_v14 = vld [vmem:[#allocation11 + $0x140] sm:$0xff]  ;;  %v390_v15 = vld [vmem:[#allocation11 + $0x148] sm:$0xff]  ;;  %v356_v24 = vadd.f32 %v355_v17, %v354_v10 }
  0x7d   :  { %v359_v2 = vrot.slane %v358_v58, 2  ;;  %v370_v4 = vadd.f32 %v369_v61, %v3413_v56  ;;  %v2783_v19 = vpack.c.bf16 %v390_v15, %v389_v14  ;;  %v391_v21 = vld [vmem:[#allocation11 + $0x150] sm:$0xff]  ;;  %v392_v22 = vld [vmem:[#allocation11 + $0x158] sm:$0xff]  ;;  %v393_v29 = vld [vmem:[#allocation11 + $0x160] sm:$0xff] }
  0x7e   :  { %2721 = vmatpush3.bf16.msra.mxu0 %v2718_v12  ;;  %v365_v8 = vrot.slane %v364_v0, 2  ;;  %v2780_v12 = vpack.c.bf16 %v388_v7, %v387_v6  ;;  %v394_v30 = vld [vmem:[#allocation11 + $0x168] sm:$0xff]  ;;  %v376_v31 = vmul.f32 0.125, %v356_v24  ;;  %v395_v36 = vld [vmem:[#allocation11 + $0x170] sm:$0xff]  ;;  %v396_v37 = vld [vmem:[#allocation11 + $0x178] sm:$0xff] }
  0x7f   :  { %2723 = vmatprep.subr.bf16.mxu0 %v2722_v18  ;;  %2749 = vmatpush3.bf16.msra.mxu1 %v2746_v28  ;;  %v360_v11 = vadd.f32 %v359_v2, %v358_v58  ;;  %v371_v13 = vrot.slane %v370_v4, 2  ;;  %v2789_v33 = vpack.c.bf16 %v394_v30, %v393_v29  ;;  %v235_v44 = vld [vmem:[#allocation11 + $0xf0] sm:$0xff]  ;;  %v2202_v47 = vld [vmem:[#allocation10 + $0xc] ss:$0 sm:$0xff]  ;;  %v485_v53 = vld [vmem:[#allocation11 + $0x180] sm:$0xff] }
  0x80   :  { %2751 = vmatprep.subr.bf16.mxu1 %v2750_v34  ;;  %v366_v16 = vadd.f32 %v365_v8, %v364_v0  ;;  %v486_v54 = vld [vmem:[#allocation11 + $0x188] sm:$0xff]  ;;  %v487_v61 = vld [vmem:[#allocation11 + $0x190] sm:$0xff]  ;;  %v488_v62 = vld [vmem:[#allocation11 + $0x198] sm:$0xff] }
  0x81   :  { %v372_v20 = vadd.f32 %v371_v13, %v370_v4  ;;  %v2795_v58 = vpack.c.bf16 %v486_v54, %v485_v53  ;;  %v489_v6 = vld [vmem:[#allocation11 + $0x1a0] sm:$0xff]  ;;  %v490_v7 = vld [vmem:[#allocation11 + $0x1a8] sm:$0xff]  ;;  %v491_v10 = vld [vmem:[#allocation11 + $0x1b0] sm:$0xff] }
  0x82   :  { %2725 = vmatpush3.bf16.msra.mxu0 %v2722_v18  ;;  %v361_v18 = vrot.slane %v360_v11, 1  ;;  %v367_v23 = vrot.slane %v366_v16, 1  ;;  %v2801_v8 = vpack.c.bf16 %v490_v7, %v489_v6  ;;  %v493_v13 = vld [vmem:[#allocation11 + $0x1c0] sm:$0xff]  ;;  %v494_v14 = vld [vmem:[#allocation11 + $0x1c8] sm:$0xff]  ;;  %v496_v17 = vld [vmem:[#allocation11 + $0x1d8] sm:$0xff] }
  0x83   :  { %2727 = vmatprep.subr.bf16.mxu0 %v2726_v26  ;;  %2753 = vmatpush3.bf16.msra.mxu1 %v2750_v34  ;;  %v373_v27 = vrot.slane %v372_v20, 1  ;;  %v2807_v15 = vpack.c.bf16 %v494_v14, %v493_v13  ;;  %v2208_v24 = vld [vmem:[#allocation10 + $0xd] ss:$0 sm:$0xff]  ;;  %v664_v30 = vld [vmem:[#allocation5 + $0x8] sm:$0xff]  ;;  %v694_v6 = vld [vmem:[#allocation5 + $0xf8] sm:$0xff] }
  0x84   :  { %2755 = vmatprep.subr.bf16.mxu1 %v2754_v39  ;;  %v362_v25 = vadd.f32 %v361_v18, %v360_v11  ;;  %v368_v28 = vadd.f32 %v367_v23, %v366_v16  ;;  %v492_v11 = vld [vmem:[#allocation11 + $0x1b8] sm:$0xff]  ;;  %v495_v16 = vld [vmem:[#allocation11 + $0x1d0] sm:$0xff]  ;;  %v699_v7 = vld [vmem:[#allocation5 + $0x120] sm:$0xff] }
  0x85   :  { %v374_v34 = vadd.f32 %v373_v27, %v372_v20  ;;  %v2810_v18 = vpack.c.bf16 %v496_v17, %v495_v16  ;;  %v498_v20 = vld [vmem:[#allocation11 + $0x1e8] sm:$0xff]  ;;  %v500_v23 = vld [vmem:[#allocation11 + $0x1f8] sm:$0xff]  ;;  %v680_v53 = vld [vmem:[#allocation5 + $0x88] sm:$0xff] }
  0x86   :  { %2729 = vmatpush3.bf16.msra.mxu0 %v2726_v26  ;;  %v2786_v26 = vpack.c.bf16 %v392_v22, %v391_v21  ;;  %v378_v35 = vmul.f32 0.125, %v368_v28  ;;  %v499_v22 = vld [vmem:[#allocation11 + $0x1f0] sm:$0xff]  ;;  %v701_v14 = vld [vmem:[#allocation5 + $0x130] sm:$0xff] }
  0x87   :  { %2731 = vmatprep.subr.bf16.mxu0 %v2730_v32  ;;  %2757 = vmatpush3.bf16.msra.mxu1 %v2754_v39  ;;  %v2792_v39 = vpack.c.bf16 %v396_v37, %v395_v36  ;;  %v379_v40 = vmul.f32 0.125, %v374_v34  ;;  %v668_v34 = vld [vmem:[#allocation5 + $0x28] sm:$0xff]  ;;  %v671_v37 = vld [vmem:[#allocation5 + $0x40] sm:$0xff] }
  0x88   :  { %2759 = vmatprep.subr.bf16.mxu1 %v2758_v45  ;;  %v700_v16 = vld [vmem:[#allocation5 + $0x128] sm:$0xff] }
  0x8a   :  { %2733 = vmatpush3.bf16.msra.mxu0 %v2730_v32  ;;  %v377_v32 = vmul.f32 0.125, %v362_v25 }
  0x8b   :  { %2735 = vmatprep.subr.bf16.mxu0 %v2734_v38  ;;  %2761 = vmatpush3.bf16.msra.mxu1 %v2758_v45  ;;  %v236_v45 = vld [vmem:[#allocation11 + $0xf8] sm:$0xff] }
  0x8c   :  { %2763 = vmatprep.subr.bf16.mxu1 %v2762_v59  ;;  %v2766_v46 = vpack.c.bf16 %v236_v45, %v235_v44  ;;  %v673_v45 = vld [vmem:[#allocation5 + $0x50] sm:$0xff] }
  0x8e   :  { %2737 = vmatpush3.bf16.msra.mxu0 %v2734_v38  ;;  %v407_v38 = vsel %vm406_vm1, %v377_v32, %v376_v31  ;;  %v669_v31 = vld [vmem:[#allocation5 + $0x30] sm:$0xff] }
  0x8f   :  { %2770 = vmatprep.subr.bf16.mxu0 %v3271_v52  ;;  %2765 = vmatpush3.bf16.msra.mxu1 %v2762_v59  ;;  %v409_v41 = vsel %vm408_vm2, %v378_v35, %v407_v38  ;;  %v2818_v32 = vpack.c.bf16 %v669_v31, %v664_v30  ;;  %v666_v35 = vld [vmem:[#allocation5 + $0x18] sm:$0xff]  ;;  %v665_v38 = vld [vmem:[#allocation5 + $0x10] sm:$0xff] }
  0x90   :  { %v411_v43 = vsel %vm410_vm3, %v379_v40, %v409_v41  ;;  %2767 = vmatprep.subr.bf16.mxu1 %v2766_v46  ;;  %v2850_v40 = vpack.c.bf16 %v671_v37, %v666_v35  ;;  %v714_v31 = vld [vmem:[#allocation5 + $0x198] sm:$0xff] }
  0x91   :  { %2441 = vmatmul.mubr.f32.vlgmr.msra.gmra.mrb[0].mxu0 %v3405_v42  ;;  %v718_v35 = vld [vmem:[#allocation5 + $0x1b8] sm:$0xff] }
  0x92   :  { %2772 = vmatpush3.bf16.msra.mxu0 %v2771_v51  ;;  %2443 = vmatprep.mubr.f32.mxu0 %v3409_v48 }
  0x93   :  { %2773 = vmatprep.subr.bf16.mxu0 %v3271_v52  ;;  %2769 = vmatpush3.bf16.msra.mxu1 %v2766_v46  ;;  %v678_v46 = vld [vmem:[#allocation5 + $0x78] sm:$0xff] }
  0x94   :  { %2794 = vmatprep.subr.bf16.mxu1 %v3271_v52 }
  0x95   :  { %2444 = vmatmul.mubr.f32.gmra.mrb[2].mxu0 %v3413_v56 }
  0x96   :  { %2775 = vmatpush3.bf16.msra.mxu0 %v2774_v60  ;;  %2516 = vmatprep.mubr.msk.f32.mxu0 %vm3272_vm0, %v3273_v5 }
  0x97   :  { %2776 = vmatprep.subr.bf16.mxu0 %v3271_v52 }
  0x9a   :  { %2778 = vmatpush3.bf16.msra.mxu0 %v2777_v3  ;;  %v2798_v3 = vpack.c.bf16 %v488_v62, %v487_v61  ;;  %v688_v61 = vld [vmem:[#allocation5 + $0xc8] sm:$0xff]  ;;  %v686_v62 = vld [vmem:[#allocation5 + $0xb8] sm:$0xff] }
  0x9b   :  { %2779 = vmatprep.subr.bf16.mxu0 %v3271_v52 }
  0x9e   :  { %2781 = vmatpush3.bf16.msra.mxu0 %v2780_v12  ;;  %v2804_v12 = vpack.c.bf16 %v492_v11, %v491_v10  ;;  %v693_v10 = vld [vmem:[#allocation5 + $0xf0] sm:$0xff]  ;;  %v698_v11 = vld [vmem:[#allocation5 + $0x118] sm:$0xff] }
  0x9f   :  { %2782 = vmatprep.subr.bf16.mxu0 %v3271_v52  ;;  %v2832_v13 = vpack.c.bf16 %v698_v11, %v693_v10  ;;  %v2203_v11 = vld [vmem:[#allocation10 + $0xb] ss:$0 sm:$0xff] }
  0xa2   :  { %2784 = vmatpush3.bf16.msra.mxu0 %v2783_v19  ;;  %v497_v19 = vld [vmem:[#allocation11 + $0x1e0] sm:$0xff] }
  0xa3   :  { %2785 = vmatprep.subr.bf16.mxu0 %v3271_v52  ;;  %v2813_v21 = vpack.c.bf16 %v498_v20, %v497_v19  ;;  %v704_v19 = vld [vmem:[#allocation5 + $0x148] sm:$0xff]  ;;  %v709_v20 = vld [vmem:[#allocation5 + $0x170] sm:$0xff] }
  0xa6   :  { %2787 = vmatpush3.bf16.msra.mxu0 %v2786_v26  ;;  %v2816_v26 = vpack.c.bf16 %v500_v23, %v499_v22  ;;  %v703_v22 = vld [vmem:[#allocation5 + $0x140] sm:$0xff]  ;;  %v708_v23 = vld [vmem:[#allocation5 + $0x168] sm:$0xff] }
  0xa7   :  { %2788 = vmatprep.subr.bf16.mxu0 %v3271_v52 }
  0xaa   :  { %2790 = vmatpush3.bf16.msra.mxu0 %v2789_v33  ;;  %v663_v33 = vld [vmem:[#allocation5] sm:$0xff] }
  0xab   :  { %2791 = vmatprep.subr.bf16.mxu0 %v3271_v52  ;;  %v2820_v36 = vpack.c.bf16 %v668_v34, %v663_v33  ;;  %v713_v34 = vld [vmem:[#allocation5 + $0x190] sm:$0xff] }
  0xac   :  { %v2840_v37 = vpack.c.bf16 %v718_v35, %v713_v34 }
  0xae   :  { %2793 = vmatpush3.bf16.msra.mxu0 %v2792_v39  ;;  %v670_v39 = vld [vmem:[#allocation5 + $0x38] sm:$0xff] }
  0xaf   :  { %2819 = vmatprep.subr.bf16.mxu0 %v2818_v32  ;;  %v2852_v41 = vpack.c.bf16 %v670_v39, %v665_v38  ;;  %v719_v32 = vld [vmem:[#allocation5 + $0x1c0] sm:$0xff]  ;;  %v721_v38 = vld [vmem:[#allocation5 + $0x1d0] sm:$0xff] }
  0xb0   :  { %v2838_v33 = vpack.c.bf16 %v719_v32, %v714_v31  ;;  %v715_v39 = vld [vmem:[#allocation5 + $0x1a0] sm:$0xff]  ;;  %v583_v32 = vmul.f32 %v3405_v42, %v3405_v42 }
  0xb1   :  { %2517 = vmatmul.mubr.f32.vlgmr.msra.gmra.mrb[4].mxu0 %v411_v43  ;;  %v679_v43 = vld [vmem:[#allocation5 + $0x80] sm:$0xff] }
  0xb2   :  { %807 = vmatprep.mubr.f32.mxu0 %v3273_v5  ;;  %2821 = vmatpush1.bf16.msra.mxu0 %v2820_v36  ;;  %v716_v36 = vld [vmem:[#allocation5 + $0x1a8] sm:$0xff] }
 0x164   :  { %v2442_v49 = vpop.f32.mrb[0].mxu0 }
 0x165   :  { %v203_v50 = vadd.f32 %v2442_v49, %v2202_v47  ;;  %v197_v51 = vpop.f32.mrb[1].mxu0  ;;  %v2824_v49 = vpack.c.bf16 %v678_v46, %v673_v45  ;;  %v723_v45 = vld [vmem:[#allocation5 + $0x1e0] sm:$0xff] }
 0x166   :  { %v198_v55 = vadd.f32 %v2202_v47, %v197_v51  ;;  %v675_v51 = vld [vmem:[#allocation5 + $0x60] sm:$0xff] }
 0x167   :  { %v217_v60 = vmax.f32 %v203_v50, 0.0  ;;  %v681_v50 = vld [vmem:[#allocation5 + $0x90] sm:$0xff] }
 0x168   :  { %v216_v57 = vmax.f32 %v198_v55, 0.0  ;;  %v2445_v59 = vpop.f32.mrb[2].mxu0  ;;  %v2856_v55 = vpack.c.bf16 %v680_v53, %v675_v51 }
 0x169   :  { %v213_v63 = vadd.f32 %v2445_v59, %v2202_v47  ;;  %v207_v0 = vpop.f32.mrb[3].mxu0 }
 0x16a   :  { %2478 = vmatprep.mubr.f32.mxu1 %v216_v57  ;;  %v208_v1 = vadd.f32 %v2202_v47, %v207_v0  ;;  %v676_v47 = vld [vmem:[#allocation5 + $0x68] sm:$0xff]  ;;  %v691_v0 = vld [vmem:[#allocation5 + $0xe0] sm:$0xff] }
 0x16b   :  { %2479 = vmatmul.mubr.f32.vlgmr.msra.gmra.mrb[0].mxu1 %v217_v60  ;;  %v219_v2 = vmax.f32 %v213_v63, 0.0  ;;  %v2854_v54 = vpack.c.bf16 %v681_v50, %v676_v47  ;;  %v684_v57 = vld [vmem:[#allocation5 + $0xa8] sm:$0xff]  ;;  %v683_v60 = vld [vmem:[#allocation5 + $0xa0] sm:$0xff] }
 0x16c   :  { %2796 = vmatpush3.bf16.msra.mxu1 %v2795_v58  ;;  %v218_v4 = vmax.f32 %v208_v1, 0.0  ;;  %v689_v58 = vld [vmem:[#allocation5 + $0xd0] sm:$0xff]  ;;  %v2828_v63 = vpack.c.bf16 %v688_v61, %v683_v60  ;;  %v728_v47 = vld [vmem:[#allocation5 + $0x208] sm:$0xff]  ;;  %v731_v50 = vld [vmem:[#allocation5 + $0x220] sm:$0xff] }
 0x16d   :  { %2797 = vmatprep.subr.bf16.mxu1 %v3271_v52  ;;  %v2826_v59 = vpack.c.bf16 %v689_v58, %v684_v57  ;;  %v685_v1 = vld [vmem:[#allocation5 + $0xb0] sm:$0xff]  ;;  %v2844_v51 = vpack.c.bf16 %v728_v47, %v723_v45  ;;  %v734_v57 = vld [vmem:[#allocation5 + $0x238] sm:$0xff] }
 0x16e   :  { %2481 = vmatprep.mubr.f32.mxu1 %v218_v4  ;;  %v733_v60 = vld [vmem:[#allocation5 + $0x230] sm:$0xff]  ;;  %v738_v61 = vld [vmem:[#allocation5 + $0x258] sm:$0xff] }
 0x16f   :  { %2482 = vmatmul.mubr.f32.gmra.mrb[2].mxu1 %v219_v2  ;;  %v690_v2 = vld [vmem:[#allocation5 + $0xd8] sm:$0xff] }
 0x170   :  { %2799 = vmatpush3.bf16.msra.mxu1 %v2798_v3  ;;  %2551 = vmatprep.mubr.msk.f32.mxu1 %vm3272_vm0, %v3273_v5  ;;  %v2858_v3 = vpack.c.bf16 %v691_v0, %v686_v62  ;;  %v2860_v4 = vpack.c.bf16 %v690_v2, %v685_v1  ;;  %v736_v0 = vld [vmem:[#allocation5 + $0x248] sm:$0xff]  ;;  %v741_v1 = vld [vmem:[#allocation5 + $0x270] sm:$0xff]  ;;  %v735_v2 = vld [vmem:[#allocation5 + $0x240] sm:$0xff] }
 0x171   :  { %2800 = vmatprep.subr.bf16.mxu1 %v3271_v52 }
 0x174   :  { %2802 = vmatpush3.bf16.msra.mxu1 %v2801_v8  ;;  %v2830_v8 = vpack.c.bf16 %v699_v7, %v694_v6  ;;  %v667_v6 = vld [vmem:[#allocation5 + $0x20] sm:$0xff]  ;;  %v672_v7 = vld [vmem:[#allocation5 + $0x48] sm:$0xff] }
 0x175   :  { %2803 = vmatprep.subr.bf16.mxu1 %v3271_v52  ;;  %v3444_v10 = vpack.c.bf16 %v672_v7, %v667_v6  ;;  %v2212_v6 = vld [vmem:[#allocation10 + $0x1] ss:$0 sm:$0xff] }
 0x178   :  { %2805 = vmatpush3.bf16.msra.mxu1 %v2804_v12  ;;  %v696_v12 = vld [vmem:[#allocation5 + $0x108] sm:$0xff] }
 0x179   :  { %2806 = vmatprep.subr.bf16.mxu1 %v3271_v52  ;;  %v2862_v17 = vpack.c.bf16 %v701_v14, %v696_v12 }
 0x17c   :  { %2808 = vmatpush3.bf16.msra.mxu1 %v2807_v15  ;;  %v695_v15 = vld [vmem:[#allocation5 + $0x100] sm:$0xff] }
 0x17d   :  { %2809 = vmatprep.subr.bf16.mxu1 %v3271_v52 }
 0x180   :  { %2811 = vmatpush3.bf16.msra.mxu1 %v2810_v18  ;;  %v2864_v18 = vpack.c.bf16 %v700_v16, %v695_v15 }
 0x181   :  { %2812 = vmatprep.subr.bf16.mxu1 %v3271_v52 }
 0x184   :  { %2814 = vmatpush3.bf16.msra.mxu1 %v2813_v21  ;;  %v479_v25 = vpop.f32.mrb[4].mxu0  ;;  %v2834_v21 = vpack.c.bf16 %v709_v20, %v704_v19 }
 0x185   :  { %v480_v27 = vadd.f32 %v2208_v24, %v479_v25  ;;  %v2518_v28 = vpop.f32.mrb[5].mxu0  ;;  %2815 = vmatprep.subr.bf16.mxu1 %v3271_v52  ;;  %v674_v52 = vld [vmem:[#allocation5 + $0x58] sm:$0xff]  ;;  %v2836_v25 = vpack.c.bf16 %v708_v23, %v703_v22 }
 0x186   :  { %v2822_v44 = vpack.c.bf16 %v679_v43, %v674_v52  ;;  %v706_v24 = vld [vmem:[#allocation5 + $0x158] sm:$0xff]  ;;  %v724_v43 = vld [vmem:[#allocation5 + $0x1e8] sm:$0xff] }
 0x187   :  { %v483_v29 = vmax.f32 %v480_v27, 0.0  ;;  %v705_v27 = vld [vmem:[#allocation5 + $0x150] sm:$0xff]  ;;  %v710_v28 = vld [vmem:[#allocation5 + $0x178] sm:$0xff] }
 0x188   :  { %2817 = vmatpush3.bf16.msra.mxu1 %v2816_v26  ;;  %2823 = vmatprep.subr.bf16.mxu0 %v2822_v44  ;;  %v711_v26 = vld [vmem:[#allocation5 + $0x180] sm:$0xff]  ;;  %v2868_v30 = vpack.c.bf16 %v710_v28, %v705_v27  ;;  %v729_v44 = vld [vmem:[#allocation5 + $0x210] sm:$0xff] }
 0x189   :  { %2851 = vmatprep.subr.bf16.mxu1 %v2850_v40  ;;  %2825 = vmatpush1.bf16.msra.mxu0 %v2824_v49  ;;  %v720_v40 = vld [vmem:[#allocation5 + $0x1c8] sm:$0xff]  ;;  %v2842_v46 = vpack.c.bf16 %v729_v44, %v724_v43  ;;  %v726_v49 = vld [vmem:[#allocation5 + $0x1f8] sm:$0xff] }
 0x18a   :  { %2827 = vmatprep.subr.bf16.mxu0 %v2826_v59  ;;  %v2872_v52 = vpack.c.bf16 %v720_v40, %v715_v39  ;;  %v2874_v53 = vpack.c.bf16 %v731_v50, %v726_v49  ;;  %v739_v59 = vld [vmem:[#allocation5 + $0x260] sm:$0xff]  ;;  %v2209_v39 = vld [vmem:[#allocation10 + $0x9] ss:$0 sm:$0xff]  ;;  %v3274_v50 = vmov 1966171168  }
 0x18b   :  { %2552 = vmatmul.mubr.f32.vlgmr.msra.gmra.mrb[4].mxu1 %v483_v29  ;;  %v2866_v29 = vpack.c.bf16 %v711_v26, %v706_v24  ;;  %v2846_v62 = vpack.c.bf16 %v739_v59, %v734_v57 }
 0x18c   :  { %896 = vmatprep.mubr.f32.mxu1 %v3273_v5  ;;  %2853 = vmatpush1.bf16.msra.mxu1 %v2852_v41  ;;  %v2870_v41 = vpack.c.bf16 %v721_v38, %v716_v36  ;;  %v585_v36 = vmul.f32 %v3413_v56, %v3413_v56  ;;  %v584_v38 = vmul.f32 %v3409_v48, %v3409_v48  ;;  %v594_v56 = vlaneseq }
 0x18d   :  { %2855 = vmatprep.subr.bf16.mxu1 %v2854_v54  ;;  %2829 = vmatpush1.bf16.msra.mxu0 %v2828_v63  ;;  %v725_v54 = vld [vmem:[#allocation5 + $0x1f0] sm:$0xff]  ;;  %v2848_v63 = vpack.c.bf16 %v738_v61, %v733_v60 }
 0x18e   :  { %2831 = vmatprep.subr.bf16.mxu0 %v2830_v8 }
 0x190   :  { %2857 = vmatpush1.bf16.msra.mxu1 %v2856_v55  ;;  %v730_v55 = vld [vmem:[#allocation5 + $0x218] sm:$0xff] }
 0x191   :  { %2859 = vmatprep.subr.bf16.mxu1 %v2858_v3  ;;  %2833 = vmatpush1.bf16.msra.mxu0 %v2832_v13  ;;  %v2876_v58 = vpack.c.bf16 %v730_v55, %v725_v54  ;;  %v2878_v3 = vpack.c.bf16 %v741_v1, %v736_v0  ;;  %v3455_v54 = vshrl.u32 %v594_v56, 7  ;;  %v2211_v0 = vld [vmem:[#allocation10] ss:$0 sm:$0xff] }
 0x192   :  { %2835 = vmatprep.subr.bf16.mxu0 %v2834_v21 }
 0x193   :  { %vm1010_vm4 = vcmp.ge.s32.totalorder %v3455_v54, 2  ;;  %vm1023_vm5 = vcmp.ge.s32.totalorder %v3455_v54, 1  ;;  %vm1036_vm6 = vcmp.lt.s32.totalorder %v3455_v54, 7  ;;  %vm1049_vm7 = vcmp.lt.s32.totalorder %v3455_v54, 6 }
 0x194   :  { %2861 = vmatpush1.bf16.msra.mxu1 %v2860_v4  ;;  %v740_v4 = vld [vmem:[#allocation5 + $0x268] sm:$0xff]  ;;  %vm1303_vm8 = vcmp.ge.s32.totalorder %v3455_v54, 3  ;;  %vm1418_vm9 = vcmp.lt.s32.totalorder %v3455_v54, 5  ;;  %vm1462_vm10 = vcmp.ge.s32.totalorder %v3455_v54, 5  ;;  %vm1480_vm11 = vcmp.ge.s32.totalorder %v3455_v54, 4 }
 0x195   :  { %2863 = vmatprep.subr.bf16.mxu1 %v2862_v17  ;;  %2837 = vmatpush1.bf16.msra.mxu0 %v2836_v25  ;;  %v2880_v8 = vpack.c.bf16 %v740_v4, %v735_v2  ;;  %vm1633_vm12 = vcmp.lt.s32.totalorder %v3455_v54, 4  ;;  %vm1695_vm13 = vcmp.ge.s32.totalorder %v3455_v54, 7  ;;  %vm1713_vm14 = vcmp.ge.s32.totalorder %v3455_v54, 6 }
 0x196   :  { %2839 = vmatprep.subr.bf16.mxu0 %v2838_v33  ;;  %v582_v33 = vmul.f32 %v3402_v9, %v3402_v9  ;;  %vm1651_vm15 = vcmp.lt.s32.totalorder %v3455_v54, 3  ;;  %vm1934_vm0 = vcmp.lt.s32.totalorder %v3455_v54, 2  ;;  %vm1952_vm1 = vcmp.lt.s32.totalorder %v3455_v54, 1 }
 0x198   :  { %2865 = vmatpush1.bf16.msra.mxu1 %v2864_v18 }
 0x199   :  { %2867 = vmatprep.subr.bf16.mxu1 %v2866_v29  ;;  %2841 = vmatpush1.bf16.msra.mxu0 %v2840_v37 }
 0x19a   :  { %2843 = vmatprep.subr.bf16.mxu0 %v2842_v46 }
 0x19c   :  { %2869 = vmatpush1.bf16.msra.mxu1 %v2868_v30 }
 0x19d   :  { %2871 = vmatprep.subr.bf16.mxu1 %v2870_v41  ;;  %2845 = vmatpush1.bf16.msra.mxu0 %v2844_v51  ;;  %v592_v51 = vunpack.c.l.s4 %v3274_v50 }
 0x19e   :  { %2847 = vmatprep.subr.bf16.mxu0 %v2846_v62 }
 0x1a0   :  { %2873 = vmatpush1.bf16.msra.mxu1 %v2872_v52 }
 0x1a1   :  { %2875 = vmatprep.subr.bf16.mxu1 %v2874_v53  ;;  %2849 = vmatpush1.bf16.msra.mxu0 %v2848_v63  ;;  %v593_v53 = vunpack.c.0.s8 %v592_v51  ;;  %v1072_v51 = vld [vmem:[#allocation7 + $0x28] sm:$0xff] }
 0x1a2   :  { %2883 = vmatprep.subr.bf16.mxu0 %v3444_v10 }
 0x1a3   :  { %v596_v48 = vsub.s32 %v593_v53, %v3455_v54  ;;  %v1074_v53 = vld [vmem:[#allocation7 + $0x38] sm:$0xff] }
 0x1a4   :  { %2877 = vmatpush1.bf16.msra.mxu1 %v2876_v58  ;;  %v617_v58 = vsub.s32 0, %v3455_v54 }
 0x1a5   :  { %2879 = vmatprep.subr.bf16.mxu1 %v2878_v3 }
 0x1a8   :  { %2881 = vmatpush1.bf16.msra.mxu1 %v2880_v8 }
 0x23e   :  { %v2480_v12 = vpop.f32.mrb[0].mxu1 }
 0x23f   :  { %v314_v13 = vadd.f32 %v2480_v12, %v2203_v11  ;;  %v308_v14 = vpop.f32.mrb[1].mxu1 }
 0x240   :  { %v309_v15 = vadd.f32 %v2203_v11, %v308_v14  ;;  %v682_v14 = vld [vmem:[#allocation5 + $0x98] sm:$0xff] }
 0x241   :  { %v2205_v16 = vmul.f32 -1.442695, %v314_v13  ;;  %v677_v13 = vld [vmem:[#allocation5 + $0x70] sm:$0xff] }
 0x242   :  { %v2204_v17 = vmul.f32 -1.442695, %v309_v15  ;;  %v2483_v18 = vpop.f32.mrb[2].mxu1 }
 0x243   :  { %3075 = vpow2.f32 %v2205_v16  ;;  %v324_v19 = vadd.f32 %v2483_v18, %v2203_v11  ;;  %v318_v20 = vpop.f32.mrb[3].mxu1 }
 0x244   :  { %3077 = vpow2.f32 %v2204_v17  ;;  %v319_v21 = vadd.f32 %v2203_v11, %v318_v20 }
 0x245   :  { %v2207_v22 = vmul.f32 -1.442695, %v324_v19  ;;  %v2886_v19 = vpack.c.bf16 %v682_v14, %v677_v13  ;;  %v1085_v14 = vld [vmem:[#allocation7 + $0x90] sm:$0xff] }
 0x246   :  { %v2206_v23 = vmul.f32 -1.442695, %v319_v21 }
 0x247   :  { %3079 = vpow2.f32 %v2207_v22  ;;  %v687_v22 = vld [vmem:[#allocation5 + $0xc0] sm:$0xff] }
 0x248   :  { %3081 = vpow2.f32 %v2206_v23  ;;  %v692_v23 = vld [vmem:[#allocation5 + $0xe8] sm:$0xff] }
 0x24d   :  { %v3076_v24 = vpop.eup %3075 }
 0x24e   :  { %v3078_v25 = vpop.eup %3077  ;;  %v340_v26 = vadd.f32 1.0, %v3076_v24 }
 0x24f   :  { %v339_v27 = vadd.f32 1.0, %v3078_v25  ;;  %v2890_v25 = vpack.c.bf16 %v692_v23, %v687_v22 }
 0x250   :  { %3083 = vrcp.f32 %v340_v26 }
 0x251   :  { %v3080_v28 = vpop.eup %3079  ;;  %3085 = vrcp.f32 %v339_v27 }
 0x252   :  { %v3082_v29 = vpop.eup %3081  ;;  %v342_v30 = vadd.f32 1.0, %v3080_v28  ;;  %v697_v28 = vld [vmem:[#allocation5 + $0x110] sm:$0xff] }
 0x253   :  { %v341_v31 = vadd.f32 1.0, %v3082_v29  ;;  %v702_v29 = vld [vmem:[#allocation5 + $0x138] sm:$0xff] }
 0x254   :  { %3087 = vrcp.f32 %v342_v30  ;;  %v2894_v30 = vpack.c.bf16 %v702_v29, %v697_v28  ;;  %v1096_v29 = vld [vmem:[#allocation7 + $0xe8] sm:$0xff] }
 0x255   :  { %3089 = vrcp.f32 %v341_v31 }
 0x25a   :  { %v3084_v34 = vpop.eup %3083 }
 0x25b   :  { %v3086_v35 = vpop.eup %3085  ;;  %v587_v37 = vmul.f32 %v3084_v34, %v583_v32  ;;  %v707_v32 = vld [vmem:[#allocation5 + $0x160] sm:$0xff] }
 0x25c   :  { %v586_v40 = vmul.f32 %v3086_v35, %v582_v33  ;;  %v712_v33 = vld [vmem:[#allocation5 + $0x188] sm:$0xff] }
 0x25d   :  { %v2898_v35 = vpack.c.bf16 %v712_v33, %v707_v32 }
 0x25e   :  { %v3088_v41 = vpop.eup %3087  ;;  %v572_v52 = vpop.f32.mrb[4].mxu1 }
 0x25f   :  { %v3090_v43 = vpop.eup %3089  ;;  %v573_v44 = vadd.f32 %v2209_v39, %v572_v52  ;;  %v2553_v45 = vpop.f32.mrb[5].mxu1  ;;  %v589_v42 = vmul.f32 %v3088_v41, %v585_v36  ;;  %v717_v36 = vld [vmem:[#allocation5 + $0x1b0] sm:$0xff]  ;;  %v727_v39 = vld [vmem:[#allocation5 + $0x200] sm:$0xff] }
 0x260   :  { %v588_v46 = vmul.f32 %v3090_v43, %v584_v38  ;;  %v737_v52 = vld [vmem:[#allocation5 + $0x250] sm:$0xff]  ;;  %v742_v43 = vld [vmem:[#allocation5 + $0x278] sm:$0xff]  ;;  %v1068_v45 = vld [vmem:[#allocation7 + $0x8] sm:$0xff] }
 0x261   :  { %v2210_v47 = vmul.f32 -1.442695, %v573_v44  ;;  %v2910_v44 = vpack.c.bf16 %v742_v43, %v737_v52  ;;  %v1107_v52 = vld [vmem:[#allocation7 + $0x140] sm:$0xff] }
 0x263   :  { %3091 = vpow2.f32 %v2210_v47  ;;  %v1067_v47 = vld [vmem:[#allocation7] sm:$0xff] }
 0x26d   :  { %v3092_v9 = vpop.eup %3091 }
 0x26e   :  { %v579_v49 = vadd.f32 1.0, %v3092_v9  ;;  %v1070_v9 = vld [vmem:[#allocation7 + $0x18] sm:$0xff] }
 0x26f   :  { %v2916_v50 = vpack.c.bf16 %v1070_v9, %v1067_v47  ;;  %v1108_v47 = vld [vmem:[#allocation7 + $0x148] sm:$0xff] }
 0x270   :  { %3093 = vrcp.f32 %v579_v49  ;;  %v1069_v49 = vld [vmem:[#allocation7 + $0x10] sm:$0xff] }
 0x271   :  { %v2946_v56 = vpack.c.bf16 %v1072_v51, %v1069_v49  ;;  %v1110_v49 = vld [vmem:[#allocation7 + $0x158] sm:$0xff] }
 0x27a   :  { %v3094_v55 = vpop.eup %3093 }
 0x27b   :  { %v597_v57 = vrot.slane %v3094_v55, %v596_v48 }
 0x27d   :  { %v598_v59 = vcombine.high %v597_v57, %v597_v57  ;;  %v605_v60 = vrot.slane %v597_v57, %v596_v48  ;;  %v1073_v57 = vld [vmem:[#allocation7 + $0x30] sm:$0xff] }
 0x27f   :  { %v618_v61 = vrot.slane %v605_v60, %v617_v58  ;;  %v612_v62 = vrot.slane %v598_v59, %v596_v48  ;;  %v613_v63 = vcombine.high %v605_v60, %v605_v60  ;;  %v1077_v48 = vld [vmem:[#allocation7 + $0x50] sm:$0xff]  ;;  %v1075_v59 = vld [vmem:[#allocation7 + $0x40] sm:$0xff] }
 0x280   :  { %v2918_v55 = vpack.c.bf16 %v1077_v48, %v1074_v53  ;;  %v1112_v53 = vld [vmem:[#allocation7 + $0x168] sm:$0xff]  ;;  %v1111_v48 = vld [vmem:[#allocation7 + $0x160] sm:$0xff] }
 0x281   :  { %v635_v1 = vmul.f32 %v618_v61, %v586_v40  ;;  %v622_v2 = vrot.slane %v612_v62, %v617_v58  ;;  %v626_v3 = vrot.slane %v613_v63, %v617_v58  ;;  %v614_v4 = vcombine.high %v612_v62, %v612_v62  ;;  %v732_v40 = vld [vmem:[#allocation5 + $0x228] sm:$0xff]  ;;  %v1078_v61 = vld [vmem:[#allocation7 + $0x58] sm:$0xff] }
 0x282   :  { %v2906_v41 = vpack.c.bf16 %v732_v40, %v727_v39  ;;  %v2950_v62 = vpack.c.bf16 %v1078_v61, %v1075_v59  ;;  %v1080_v63 = vld [vmem:[#allocation7 + $0x68] sm:$0xff] }
 0x283   :  { %v644_v7 = vmul.f32 %v2211_v0, %v635_v1  ;;  %v636_v8 = vmul.f32 %v622_v2, %v587_v37  ;;  %v637_v11 = vmul.f32 %v626_v3, %v588_v46  ;;  %v630_v12 = vrot.slane %v614_v4, %v617_v58  ;;  %v722_v37 = vld [vmem:[#allocation5 + $0x1d8] sm:$0xff]  ;;  %v1076_v58 = vld [vmem:[#allocation7 + $0x48] sm:$0xff]  ;;  %v1079_v2 = vld [vmem:[#allocation7 + $0x60] sm:$0xff] }
 0x284   :  { %v2902_v38 = vpack.c.bf16 %v722_v37, %v717_v36  ;;  %v2920_v60 = vpack.c.bf16 %v1076_v58, %v1073_v57  ;;  %v1082_v3 = vld [vmem:[#allocation7 + $0x78] sm:$0xff]  ;;  %v1081_v4 = vld [vmem:[#allocation7 + $0x70] sm:$0xff]  ;;  %v1100_v36 = vld [vmem:[#allocation7 + $0x108] sm:$0xff] }
 0x285   :  { %v653_v15 = vadd.f32 %v2212_v6, %v644_v7  ;;  %v645_v16 = vmul.f32 %v2211_v0, %v636_v8  ;;  %v638_v17 = vmul.f32 %v630_v12, %v589_v42  ;;  %v646_v21 = vmul.f32 %v2211_v0, %v637_v11  ;;  %v1071_v42 = vld [vmem:[#allocation7 + $0x20] sm:$0xff]  ;;  %v1084_v7 = vld [vmem:[#allocation7 + $0x88] sm:$0xff]  ;;  %v1086_v11 = vld [vmem:[#allocation7 + $0x98] sm:$0xff] }
 0x286   :  { %v2914_v46 = vpack.c.bf16 %v1071_v42, %v1068_v45  ;;  %v2954_v8 = vpack.c.bf16 %v1084_v7, %v1081_v4  ;;  %v1089_v12 = vld [vmem:[#allocation7 + $0xb0] sm:$0xff]  ;;  %v1099_v37 = vld [vmem:[#allocation7 + $0x100] sm:$0xff]  ;;  %v1106_v45 = vld [vmem:[#allocation7 + $0x138] sm:$0xff] }
 0x287   :  { %v3459_v18 = vmax.f32 %v653_v15, 0.0  ;;  %v654_v20 = vadd.f32 %v2212_v6, %v645_v16  ;;  %v655_v26 = vadd.f32 %v2212_v6, %v646_v21  ;;  %v647_v27 = vmul.f32 %v2211_v0, %v638_v17  ;;  %v1083_v0 = vld [vmem:[#allocation7 + $0x80] sm:$0xff]  ;;  %v1088_v15 = vld [vmem:[#allocation7 + $0xa8] sm:$0xff]  ;;  %v1105_v42 = vld [vmem:[#allocation7 + $0x130] sm:$0xff] }
 0x288   :  { %2915 = vmatprep.subr.bf16.mxu1 %v2914_v46  ;;  %v2922_v1 = vpack.c.bf16 %v1083_v0, %v1080_v63  ;;  %v2926_v13 = vpack.c.bf16 %v1089_v12, %v1086_v11  ;;  %v1087_v16 = vld [vmem:[#allocation7 + $0xa0] sm:$0xff]  ;;  %v2928_v17 = vpack.c.bf16 %v1088_v15, %v1085_v14  ;;  %v2970_v9 = vpack.c.bf16 %v1108_v47, %v1105_v42  ;;  %v1114_v57 = vld [vmem:[#allocation7 + $0x178] sm:$0xff] }
 0x289   :  { %4341 = vst [vmem:[#allocation19_spill] sm:$0xff] %v3459_v18  ;;  %808 = vmatmul.mubr.f32.vlgmr.msra.gmra.mrb[6].mxu0 %v3459_v18  ;;  %897 = vmatmul.mubr.f32.vlgmr.msra.gmra.mrb[6].mxu1 %v3459_v18  ;;  %v3466_v24 = vmax.f32 %v654_v20, 0.0  ;;  %v656_v31 = vadd.f32 %v2212_v6, %v647_v27  ;;  %v2924_v6 = vpack.c.bf16 %v1082_v3, %v1079_v2  ;;  %v1092_v20 = vld [vmem:[#allocation7 + $0xc8] sm:$0xff]  ;;  %v1095_v21 = vld [vmem:[#allocation7 + $0xe0] sm:$0xff]  ;;  %v1093_v27 = vld [vmem:[#allocation7 + $0xd0] sm:$0xff] }
 0x28a   :  { %2885 = vmatpush3.bf16.msra.mxu0 %v3444_v10  ;;  %813 = vmatprep.mubr.f32.mxu0 %v3273_v5  ;;  %v3472_v10 = vmax.f32 %v655_v26, 0.0  ;;  %v2930_v23 = vpack.c.bf16 %v1095_v21, %v1092_v20  ;;  %v1094_v26 = vld [vmem:[#allocation7 + $0xd8] sm:$0xff]  ;;  %v2962_v32 = vpack.c.bf16 %v1096_v29, %v1093_v27  ;;  %v2974_v58 = vpack.c.bf16 %v1114_v57, %v1111_v48 }
 0x28b   :  { %902 = vmatprep.mubr.f32.mxu1 %v3273_v5  ;;  %2887 = vmatprep.subr.bf16.mxu0 %v2886_v19  ;;  %4342 = vst [vmem:[#allocation20_spill] sm:$0xff] %v3466_v24  ;;  %v3478_v34 = vmax.f32 %v656_v31, 0.0  ;;  %v1101_v31 = vld [vmem:[#allocation7 + $0x110] sm:$0xff] }
 0x28c   :  { %4343 = vst [vmem:[#allocation21_spill] sm:$0xff] %v3472_v10  ;;  %2917 = vmatpush1.bf16.msra.mxu1 %v2916_v50  ;;  %v1113_v50 = vld [vmem:[#allocation7 + $0x170] sm:$0xff] }
 0x28d   :  { %814 = vmatmul.mubr.f32.gmra.mrb[8].mxu0 %v3466_v24  ;;  %903 = vmatmul.mubr.f32.gmra.mrb[8].mxu1 %v3466_v24  ;;  %4344 = vst [vmem:[#allocation22_spill] sm:$0xff] %v3478_v34  ;;  %v2942_v51 = vpack.c.bf16 %v1113_v50, %v1110_v49 }
 0x28e   :  { %2889 = vmatpush3.bf16.msra.mxu0 %v2886_v19  ;;  %819 = vmatprep.mubr.f32.mxu0 %v3273_v5  ;;  %v1090_v19 = vld [vmem:[#allocation7 + $0xb8] sm:$0xff] }
 0x28f   :  { %908 = vmatprep.mubr.f32.mxu1 %v3273_v5  ;;  %2891 = vmatprep.subr.bf16.mxu0 %v2890_v25  ;;  %v2958_v22 = vpack.c.bf16 %v1090_v19, %v1087_v16 }
 0x290   :  { %2919 = vmatprep.subr.bf16.mxu1 %v2918_v55  ;;  %v4418_v54 = vld [vmem:[#allocation19_spill] sm:$0xff] }
 0x291   :  { %820 = vmatmul.mubr.f32.gmra.mrb[10].mxu0 %v3472_v10  ;;  %909 = vmatmul.mubr.f32.gmra.mrb[10].mxu1 %v3472_v10 }
 0x292   :  { %2893 = vmatpush3.bf16.msra.mxu0 %v2890_v25  ;;  %825 = vmatprep.mubr.f32.mxu0 %v3273_v5  ;;  %v1091_v25 = vld [vmem:[#allocation7 + $0xc0] sm:$0xff] }
 0x293   :  { %914 = vmatprep.mubr.f32.mxu1 %v3273_v5  ;;  %2895 = vmatprep.subr.bf16.mxu0 %v2894_v30  ;;  %v2932_v28 = vpack.c.bf16 %v1094_v26, %v1091_v25 }
 0x294   :  { %2921 = vmatpush1.bf16.msra.mxu1 %v2920_v60 }
 0x295   :  { %826 = vmatmul.mubr.f32.gmra.mrb[12].mxu0 %v3478_v34  ;;  %915 = vmatmul.mubr.f32.gmra.mrb[12].mxu1 %v3478_v34 }
 0x296   :  { %2897 = vmatpush3.bf16.msra.mxu0 %v2894_v30  ;;  %2586 = vmatprep.mubr.f32.mxu0 %v3459_v18  ;;  %v1098_v30 = vld [vmem:[#allocation7 + $0xf8] sm:$0xff] }
 0x297   :  { %2899 = vmatprep.subr.bf16.mxu0 %v2898_v35  ;;  %1179 = vmatprep.mubr.f32.mxu1 %v3273_v5  ;;  %v2934_v33 = vpack.c.bf16 %v1101_v31, %v1098_v30 }
 0x298   :  { %2923 = vmatprep.subr.bf16.mxu1 %v2922_v1 }
 0x299   :  { %2925 = vmatpush1.bf16.msra.mxu1 %v2924_v6 }
 0x29a   :  { %2901 = vmatpush3.bf16.msra.mxu0 %v2898_v35  ;;  %2927 = vmatprep.subr.bf16.mxu1 %v2926_v13  ;;  %v1097_v35 = vld [vmem:[#allocation7 + $0xf0] sm:$0xff] }
 0x29b   :  { %2903 = vmatprep.subr.bf16.mxu0 %v2902_v38  ;;  %v2936_v40 = vpack.c.bf16 %v1100_v36, %v1097_v35 }
 0x29d   :  { %2929 = vmatpush1.bf16.msra.mxu1 %v2928_v17 }
 0x29e   :  { %2905 = vmatpush3.bf16.msra.mxu0 %v2902_v38  ;;  %2931 = vmatprep.subr.bf16.mxu1 %v2930_v23  ;;  %v1102_v38 = vld [vmem:[#allocation7 + $0x118] sm:$0xff] }
 0x29f   :  { %2907 = vmatprep.subr.bf16.mxu0 %v2906_v41  ;;  %v2966_v39 = vpack.c.bf16 %v1102_v38, %v1099_v37 }
 0x2a1   :  { %2933 = vmatpush1.bf16.msra.mxu1 %v2932_v28 }
 0x2a2   :  { %2909 = vmatpush3.bf16.msra.mxu0 %v2906_v41  ;;  %2935 = vmatprep.subr.bf16.mxu1 %v2934_v33  ;;  %v1104_v41 = vld [vmem:[#allocation7 + $0x128] sm:$0xff] }
 0x2a3   :  { %2911 = vmatprep.subr.bf16.mxu0 %v2910_v44  ;;  %v2938_v43 = vpack.c.bf16 %v1107_v52, %v1104_v41 }
 0x2a5   :  { %2937 = vmatpush1.bf16.msra.mxu1 %v2936_v40 }
 0x2a6   :  { %2913 = vmatpush3.bf16.msra.mxu0 %v2910_v44  ;;  %v1103_v44 = vld [vmem:[#allocation7 + $0x120] sm:$0xff]  ;;  %2939 = vmatprep.subr.bf16.mxu1 %v2938_v43 }
 0x2a7   :  { %2947 = vmatprep.subr.bf16.mxu0 %v2946_v56  ;;  %v2940_v46 = vpack.c.bf16 %v1106_v45, %v1103_v44 }
 0x2a9   :  { %2587 = vmatmul.mubr.f32.vlgmr.msra.gmra.mrb[14].mxu0 %v3466_v24  ;;  %2941 = vmatpush1.bf16.msra.mxu1 %v2940_v46  ;;  %v3742_v24 = vld [vmem:[#allocation8 + $0xc] ss:$0 sm:$0xff] }
 0x2aa   :  { %2589 = vmatprep.mubr.f32.mxu0 %v3472_v10  ;;  %2949 = vmatpush3.bf16.msra.mxu0 %v2946_v56  ;;  %v1109_v56 = vld [vmem:[#allocation7 + $0x150] sm:$0xff] }
 0x2ab   :  { %2951 = vmatprep.subr.bf16.mxu0 %v2950_v62  ;;  %v2944_v55 = vpack.c.bf16 %v1112_v53, %v1109_v56  ;;  %2943 = vmatprep.subr.bf16.mxu1 %v2942_v51 }
 0x2ad   :  { %2590 = vmatmul.mubr.f32.gmra.mrb[16].mxu0 %v3478_v34  ;;  %2945 = vmatpush1.bf16.msra.mxu1 %v2944_v55 }
 0x2ae   :  { %2953 = vmatpush3.bf16.msra.mxu0 %v2950_v62 }
 0x2af   :  { %2955 = vmatprep.subr.bf16.mxu0 %v2954_v8 }
 0x2b2   :  { %2957 = vmatpush3.bf16.msra.mxu0 %v2954_v8 }
 0x2b3   :  { %2959 = vmatprep.subr.bf16.mxu0 %v2958_v22 }
 0x2b6   :  { %2961 = vmatpush3.bf16.msra.mxu0 %v2958_v22 }
 0x2b7   :  { %2963 = vmatprep.subr.bf16.mxu0 %v2962_v32 }
 0x2ba   :  { %2965 = vmatpush3.bf16.msra.mxu0 %v2962_v32 }
 0x2bb   :  { %2967 = vmatprep.subr.bf16.mxu0 %v2966_v39 }
 0x2be   :  { %2969 = vmatpush3.bf16.msra.mxu0 %v2966_v39 }
 0x2bf   :  { %2971 = vmatprep.subr.bf16.mxu0 %v2970_v9 }
 0x2c2   :  { %2973 = vmatpush3.bf16.msra.mxu0 %v2970_v9 }
 0x2c3   :  { %2975 = vmatprep.subr.bf16.mxu0 %v2974_v58 }
 0x2c6   :  { %2977 = vmatpush3.bf16.msra.mxu0 %v2974_v58 }
 0x35c   :  { %v809_v59 = vpop.f32.mrb[6].mxu0  ;;  %v898_v60 = vpop.f32.mrb[6].mxu1 }
 0x35d   :  { %v1006_v61 = vrot.slane %v809_v59, 6  ;;  %v811_v62 = vpop.f32.mrb[7].mxu0  ;;  %v900_v63 = vpop.f32.mrb[7].mxu1  ;;  %v2213_v59 = vld [vmem:[#allocation10 + $0x2] ss:$0 sm:$0xff] }
 0x35e   :  { %v1019_v0 = vrot.slane %v811_v62, 7  ;;  %v1032_v2 = vrot.slane %v900_v63, 1 }
 0x35f   :  { %v1011_v1 = vsel %vm1010_vm4, %v1006_v61, 0.0 }
 0x360   :  { %v1015_v3 = vadd.f32 %v1011_v1, %v898_v60  ;;  %v1024_v4 = vsel %vm1023_vm5, %v1019_v0, 0.0  ;;  %v815_v6 = vpop.f32.mrb[8].mxu0  ;;  %v904_v7 = vpop.f32.mrb[8].mxu1  ;;  %v1037_v15 = vsel %vm1036_vm6, %v1032_v2, 0.0 }
 0x361   :  { %v1007_v8 = vrot.slane %v815_v6, 6  ;;  %v817_v11 = vpop.f32.mrb[9].mxu0  ;;  %v906_v12 = vpop.f32.mrb[9].mxu1 }
 0x362   :  { %v1028_v13 = vadd.f32 %v1024_v4, %v1015_v3  ;;  %v1020_v14 = vrot.slane %v817_v11, 7  ;;  %v1033_v17 = vrot.slane %v906_v12, 1 }
 0x363   :  { %v1012_v16 = vsel %vm1010_vm4, %v1007_v8, 0.0 }
 0x364   :  { %v1041_v19 = vadd.f32 %v1037_v15, %v1028_v13  ;;  %v1016_v20 = vadd.f32 %v1012_v16, %v904_v7  ;;  %v1025_v21 = vsel %vm1023_vm5, %v1020_v14, 0.0  ;;  %v821_v22 = vpop.f32.mrb[10].mxu0  ;;  %v910_v23 = vpop.f32.mrb[10].mxu1  ;;  %v1038_v30 = vsel %vm1036_vm6, %v1033_v17, 0.0  ;;  %v1983_v13 = vld [vmem:[#allocation11 + $0x200] sm:$0xff]  ;;  %v1984_v14 = vld [vmem:[#allocation11 + $0x208] sm:$0xff] }
 0x365   :  { %v1008_v25 = vrot.slane %v821_v22, 6  ;;  %v823_v26 = vpop.f32.mrb[11].mxu0  ;;  %v912_v27 = vpop.f32.mrb[11].mxu1  ;;  %v3542_v15 = vpack.c.bf16 %v1984_v14, %v1983_v13  ;;  %v1985_v16 = vld [vmem:[#allocation11 + $0x210] sm:$0xff]  ;;  %v1986_v17 = vld [vmem:[#allocation11 + $0x218] sm:$0xff] }
 0x366   :  { %v1029_v28 = vadd.f32 %v1025_v21, %v1016_v20  ;;  %v1021_v29 = vrot.slane %v823_v26, 7  ;;  %v1034_v32 = vrot.slane %v912_v27, 1  ;;  %v3548_v20 = vpack.c.bf16 %v1986_v17, %v1985_v16  ;;  %v1989_v22 = vld [vmem:[#allocation11 + $0x230] sm:$0xff]  ;;  %v1991_v26 = vld [vmem:[#allocation11 + $0x240] sm:$0xff]  ;;  %v1992_v27 = vld [vmem:[#allocation11 + $0x248] sm:$0xff] }
 0x367   :  { %v1013_v31 = vsel %vm1010_vm4, %v1008_v25, 0.0  ;;  %4347 = vst [vmem:[#allocation25_spill] sm:$0xff] %v3542_v15  ;;  %2979 = vmatprep.subr.bf16.mxu1 %v3542_v15  ;;  %3011 = vmatprep.subr.bf16.mxu0 %v3542_v15 }
 0x368   :  { %v1042_v33 = vadd.f32 %v1038_v30, %v1029_v28  ;;  %v1017_v35 = vadd.f32 %v1013_v31, %v910_v23  ;;  %v1026_v36 = vsel %vm1023_vm5, %v1021_v29, 0.0  ;;  %v827_v37 = vpop.f32.mrb[12].mxu0  ;;  %v916_v38 = vpop.f32.mrb[12].mxu1  ;;  %v1039_v44 = vsel %vm1036_vm6, %v1034_v32, 0.0  ;;  %4348 = vst [vmem:[#allocation26_spill] sm:$0xff] %v3548_v20  ;;  %v1990_v23 = vld [vmem:[#allocation11 + $0x238] sm:$0xff] }
 0x369   :  { %v1009_v39 = vrot.slane %v827_v37, 6  ;;  %v829_v40 = vpop.f32.mrb[13].mxu0  ;;  %v918_v41 = vpop.f32.mrb[13].mxu1  ;;  %v3557_v25 = vpack.c.bf16 %v1990_v23, %v1989_v22  ;;  %v3563_v28 = vpack.c.bf16 %v1992_v27, %v1991_v26  ;;  %v1993_v29 = vld [vmem:[#allocation11 + $0x250] sm:$0xff]  ;;  %v1994_v30 = vld [vmem:[#allocation11 + $0x258] sm:$0xff]  ;;  %v1995_v32 = vld [vmem:[#allocation11 + $0x260] sm:$0xff] }
 0x36a   :  { %v1030_v52 = vadd.f32 %v1026_v36, %v1017_v35  ;;  %v1022_v43 = vrot.slane %v829_v40, 7  ;;  %v1035_v42 = vrot.slane %v918_v41, 1  ;;  %v3569_v31 = vpack.c.bf16 %v1994_v30, %v1993_v29  ;;  %v1997_v36 = vld [vmem:[#allocation11 + $0x270] sm:$0xff]  ;;  %v1998_v37 = vld [vmem:[#allocation11 + $0x278] sm:$0xff] }
 0x36b   :  { %v1014_v45 = vsel %vm1010_vm4, %v1009_v39, 0.0  ;;  %4350 = vst [vmem:[#allocation28_spill] sm:$0xff] %v3557_v25  ;;  %4351 = vst [vmem:[#allocation29_spill] sm:$0xff] %v3563_v28  ;;  %v2214_v39 = vld [vmem:[#allocation10 + $0x3] ss:$0 sm:$0xff] }
 0x36c   :  { %v1043_v46 = vadd.f32 %v1039_v44, %v1030_v52  ;;  %v1018_v47 = vadd.f32 %v1014_v45, %v916_v38  ;;  %v1027_v9 = vsel %vm1023_vm5, %v1022_v43, 0.0  ;;  %v1040_v50 = vsel %vm1036_vm6, %v1035_v42, 0.0  ;;  %4352 = vst [vmem:[#allocation30_spill] sm:$0xff] %v3569_v31  ;;  %v3591_v41 = vld [vmem:[#allocation10 + $0x7] ss:$0 sm:$0xff] }
 0x36d   :  { %v3581_v38 = vpack.c.bf16 %v1998_v37, %v1997_v36  ;;  %v2223_v45 = vld [vmem:[#allocation10 + $0x5] ss:$0 sm:$0xff] }
 0x36e   :  { %v1031_v49 = vadd.f32 %v1027_v9, %v1018_v47 }
 0x36f   :  { %4354 = vst [vmem:[#allocation32_spill] sm:$0xff] %v3581_v38 }
 0x370   :  { %v1044_v51 = vadd.f32 %v1040_v50, %v1031_v49  ;;  %v3601_v50 = vld [vmem:[#allocation8] ss:$0 sm:$0xff] }
 0x371   :  { %4355 = vst [vmem:[#allocation33_spill] sm:$0xff] %v3601_v50 }
 0x37c   :  { %v2588_v56 = vpop.f32.mrb[14].mxu0 }
 0x37d   :  { %v1046_v53 = vrot.slane %v2588_v56, 2  ;;  %v987_v48 = vpop.f32.mrb[15].mxu0 }
 0x37e   :  { %v1045_v55 = vrot.slane %v987_v48, 2 }
 0x37f   :  { %v1051_v57 = vsel %vm1049_vm7, %v1046_v53, 0.0 }
 0x380   :  { %v1055_v58 = vadd.f32 %v1051_v57, %v1042_v33  ;;  %v1050_v60 = vsel %vm1049_vm7, %v1045_v55, 0.0  ;;  %v2591_v61 = vpop.f32.mrb[16].mxu0  ;;  %v1996_v33 = vld [vmem:[#allocation11 + $0x268] sm:$0xff] }
 0x381   :  { %v1054_v62 = vadd.f32 %v1050_v60, %v1041_v19  ;;  %v1048_v63 = vrot.slane %v2591_v61, 2  ;;  %v997_v0 = vpop.f32.mrb[17].mxu0  ;;  %v1987_v19 = vld [vmem:[#allocation11 + $0x220] sm:$0xff]  ;;  %v3575_v35 = vpack.c.bf16 %v1996_v33, %v1995_v32  ;;  %v3613_v57 = vld [vmem:[#allocation8 + $0x1] ss:$0 sm:$0xff] }
 0x382   :  { %v1047_v1 = vrot.slane %v997_v0, 2  ;;  %v3523_v4 = vadd.f32 %v2213_v59, %v1055_v58  ;;  %4357 = vst [vmem:[#allocation35_spill] sm:$0xff] %v3613_v57  ;;  %v3647_v33 = vld [vmem:[#allocation8 + $0x2] ss:$0 sm:$0xff] }
 0x383   :  { %v3519_v2 = vadd.f32 %v2213_v59, %v1054_v62  ;;  %v1053_v3 = vsel %vm1049_vm7, %v1048_v63, 0.0  ;;  %4353 = vst [vmem:[#allocation31_spill] sm:$0xff] %v3575_v35  ;;  %4359 = vst [vmem:[#allocation37_spill] sm:$0xff] %v3647_v33 }
 0x384   :  { %v1057_v6 = vadd.f32 %v1053_v3, %v1044_v51  ;;  %v1052_v7 = vsel %vm1049_vm7, %v1047_v1, 0.0  ;;  %v3603_v51 = vld [vmem:[#allocation8 + $0x3] ss:$0 sm:$0xff] }
 0x385   :  { %v1056_v8 = vadd.f32 %v1052_v7, %v1043_v46  ;;  %1180 = vmatmul.mubr.f32.vlgmr.msra.gmra.mrb[14].mxu1 %v3519_v2  ;;  %2624 = vmatprep.mubr.f32.mxu0 %v3519_v2  ;;  %4356 = vst [vmem:[#allocation34_spill] sm:$0xff] %v3603_v51 }
 0x386   :  { %2625 = vmatmul.mubr.f32.vlgmr.msra.gmra.mrb[18].mxu0 %v3523_v4  ;;  %1185 = vmatprep.mubr.f32.mxu1 %v3273_v5  ;;  %v3533_v12 = vadd.f32 %v2213_v59, %v1057_v6 }
 0x387   :  { %v3531_v11 = vadd.f32 %v2213_v59, %v1056_v8  ;;  %2981 = vmatpush3.bf16.msra.mxu1 %v3542_v15  ;;  %3013 = vmatpush3.bf16.msra.mxu0 %v3542_v15 }
 0x388   :  { %4346 = vst [vmem:[#allocation24_spill] sm:$0xff] %v3533_v12  ;;  %2983 = vmatprep.subr.bf16.mxu1 %v3548_v20  ;;  %3015 = vmatprep.subr.bf16.mxu0 %v3548_v20 }
 0x389   :  { %4345 = vst [vmem:[#allocation23_spill] sm:$0xff] %v3531_v11  ;;  %1186 = vmatmul.mubr.f32.gmra.mrb[16].mxu1 %v3523_v4  ;;  %2627 = vmatprep.mubr.f32.mxu0 %v3531_v11 }
 0x38a   :  { %2628 = vmatmul.mubr.f32.gmra.mrb[20].mxu0 %v3533_v12  ;;  %1191 = vmatprep.mubr.f32.mxu1 %v3273_v5 }
 0x38b   :  { %2985 = vmatpush3.bf16.msra.mxu1 %v3548_v20  ;;  %3017 = vmatpush3.bf16.msra.mxu0 %v3548_v20 }
 0x38d   :  { %1192 = vmatmul.mubr.f32.gmra.mrb[18].mxu1 %v3531_v11 }
 0x38e   :  { %1197 = vmatprep.mubr.f32.mxu1 %v3273_v5  ;;  %v1988_v5 = vld [vmem:[#allocation11 + $0x228] sm:$0xff] }
 0x38f   :  { %v3550_v21 = vpack.c.bf16 %v1988_v5, %v1987_v19 }
 0x391   :  { %1198 = vmatmul.mubr.f32.gmra.mrb[20].mxu1 %v3533_v12  ;;  %4349 = vst [vmem:[#allocation27_spill] sm:$0xff] %v3550_v21  ;;  %2987 = vmatprep.subr.bf16.mxu1 %v3550_v21 }
 0x392   :  { %3019 = vmatprep.subr.bf16.mxu0 %v3550_v21  ;;  %2989 = vmatpush3.bf16.msra.mxu1 %v3550_v21 }
 0x393   :  { %3021 = vmatpush3.bf16.msra.mxu0 %v3550_v21  ;;  %2991 = vmatprep.subr.bf16.mxu1 %v3557_v25 }
 0x394   :  { %3023 = vmatprep.subr.bf16.mxu0 %v3557_v25 }
 0x396   :  { %2993 = vmatpush3.bf16.msra.mxu1 %v3557_v25 }
 0x397   :  { %3025 = vmatpush3.bf16.msra.mxu0 %v3557_v25  ;;  %2995 = vmatprep.subr.bf16.mxu1 %v3563_v28 }
 0x398   :  { %3027 = vmatprep.subr.bf16.mxu0 %v3563_v28 }
 0x39a   :  { %2997 = vmatpush3.bf16.msra.mxu1 %v3563_v28 }
 0x39b   :  { %3029 = vmatpush3.bf16.msra.mxu0 %v3563_v28  ;;  %2999 = vmatprep.subr.bf16.mxu1 %v3569_v31 }
 0x39c   :  { %3031 = vmatprep.subr.bf16.mxu0 %v3569_v31 }
 0x39e   :  { %3001 = vmatpush3.bf16.msra.mxu1 %v3569_v31 }
 0x39f   :  { %3033 = vmatpush3.bf16.msra.mxu0 %v3569_v31  ;;  %3003 = vmatprep.subr.bf16.mxu1 %v3575_v35 }
 0x3a0   :  { %3035 = vmatprep.subr.bf16.mxu0 %v3575_v35 }
 0x3a2   :  { %3005 = vmatpush3.bf16.msra.mxu1 %v3575_v35 }
 0x3a3   :  { %3037 = vmatpush3.bf16.msra.mxu0 %v3575_v35  ;;  %3007 = vmatprep.subr.bf16.mxu1 %v3581_v38 }
 0x3a4   :  { %3039 = vmatprep.subr.bf16.mxu0 %v3581_v38 }
 0x3a6   :  { %3009 = vmatpush3.bf16.msra.mxu1 %v3581_v38 }
 0x3a7   :  { %3041 = vmatpush3.bf16.msra.mxu0 %v3581_v38  ;;  %3042 = vmatprep.subr.bf16.mxu1 %v3542_v15  ;;  %v3779_v38 = vld [vmem:[#allocation8 + $0x15] ss:$0 sm:$0xff] }
 0x3a8   :  { %4369 = vst [vmem:[#allocation47_spill] sm:$0xff] %v3779_v38 }
 0x458   :  { %v1181_v40 = vpop.f32.mrb[14].mxu1 }
 0x459   :  { %v3593_v52 = vadd.f32 %v2214_v39, %v1181_v40  ;;  %v1183_v43 = vpop.f32.mrb[15].mxu1  ;;  %v2626_v44 = vpop.f32.mrb[18].mxu0 }
 0x45a   :  { %v1270_v42 = vpop.f32.mrb[19].mxu0  ;;  %v3599_v9 = vadd.f32 %v2626_v44, %v3591_v41  ;;  %v3609_v48 = vadd.f32 %v2223_v45, %v1183_v43 }
 0x45b   :  { %v1299_v46 = vrot.slane %v3593_v52, 5  ;;  %v1317_v47 = vrot.slane %v3593_v52, 6  ;;  %v1338_v60 = vrot.slane %v3593_v52, 7  ;;  %v3617_v61 = vadd.f32 %v3591_v41, %v1270_v42 }
 0x45c   :  { %v1187_v49 = vpop.f32.mrb[16].mxu1  ;;  %v1363_v17 = vmul.f32 %v3603_v51, %v3593_v52  ;;  %v1372_v40 = vrot.slane %v3593_v52, 1  ;;  %v1393_v43 = vrot.slane %v3593_v52, 2 }
 0x45d   :  { %v1304_v56 = vsel %vm1303_vm8, %v1299_v46, 0.0  ;;  %v1321_v53 = vsel %vm1010_vm4, %v1317_v47, 0.0  ;;  %v3611_v55 = vadd.f32 %v2214_v39, %v1187_v49  ;;  %v1189_v58 = vpop.f32.mrb[17].mxu1  ;;  %v2629_v59 = vpop.f32.mrb[20].mxu0  ;;  %v1342_v37 = vsel %vm1023_vm5, %v1338_v60, 0.0 }
 0x45e   :  { %v3619_v62 = vadd.f32 %v2223_v45, %v1189_v58  ;;  %v3622_v63 = vadd.f32 %v2629_v59, %v3591_v41  ;;  %v1280_v0 = vpop.f32.mrb[21].mxu0  ;;  %v1312_v14 = vmul.f32 %v3601_v50, %v1304_v56  ;;  %v1329_v16 = vmul.f32 %v3613_v57, %v1321_v53 }
 0x45f   :  { %v1300_v3 = vrot.slane %v3611_v55, 5  ;;  %v1318_v6 = vrot.slane %v3611_v55, 6  ;;  %v1339_v7 = vrot.slane %v3611_v55, 7  ;;  %v1373_v8 = vrot.slane %v3611_v55, 1 }
 0x460   :  { %4358 = vst [vmem:[#allocation36_spill] sm:$0xff] %v3622_v63  ;;  %v1193_v13 = vpop.f32.mrb[18].mxu1  ;;  %v1394_v23 = vrot.slane %v3611_v55, 2  ;;  %v1520_v30 = vrot.slane %v3619_v62, 6  ;;  %v1541_v32 = vrot.slane %v3619_v62, 7  ;;  %v1364_v36 = vmul.f32 %v3603_v51, %v3611_v55 }
 0x461   :  { %v1305_v19 = vsel %vm1303_vm8, %v1300_v3, 0.0  ;;  %v1322_v5 = vsel %vm1010_vm4, %v1318_v6, 0.0  ;;  %v1343_v22 = vsel %vm1023_vm5, %v1339_v7, 0.0  ;;  %v1195_v26 = vpop.f32.mrb[19].mxu1  ;;  %v3657_v47 = vadd.f32 %v2214_v39, %v1193_v13  ;;  %v3832_v51 = vld [vmem:[#allocation8 + $0x1a] ss:$0 sm:$0xff] }
 0x462   :  { %v1313_v27 = vmul.f32 %v3601_v50, %v1305_v19  ;;  %v1330_v29 = vmul.f32 %v3613_v57, %v1322_v5  ;;  %v1351_v42 = vmul.f32 %v3647_v33, %v1343_v22  ;;  %v3661_v56 = vsel %vm1036_vm6, %v1373_v8, 0.0  ;;  %v3844_v57 = vld [vmem:[#allocation8 + $0x1d] ss:$0 sm:$0xff] }
 0x463   :  { %4360 = vst [vmem:[#allocation38_spill] sm:$0xff] %v3657_v47  ;;  %v3665_v53 = vsel %vm1049_vm7, %v1394_v23, 0.0  ;;  %v1333_v60 = vadd.f32 %v1329_v16, %v1312_v14  ;;  %v3671_v3 = vsel %vm1010_vm4, %v1520_v30, 0.0  ;;  %v3675_v6 = vsel %vm1023_vm5, %v1541_v32, 0.0  ;;  %v3686_v14 = vld [vmem:[#allocation8 + $0x4] ss:$0 sm:$0xff] }
 0x464   :  { %v1334_v44 = vadd.f32 %v1330_v29, %v1313_v27  ;;  %v1199_v49 = vpop.f32.mrb[20].mxu1  ;;  %v1350_v8 = vmul.f32 %v3647_v33, %v1342_v37  ;;  %v3680_v13 = vadd.f32 %v3591_v41, %v1280_v0  ;;  %v3682_v19 = vadd.f32 %v2223_v45, %v1195_v26  ;;  %v3692_v29 = vld [vmem:[#allocation8 + $0x5] ss:$0 sm:$0xff]  ;;  %v3701_v37 = vld [vmem:[#allocation8 + $0x6] ss:$0 sm:$0xff] }
 0x465   :  { %v3667_v58 = vadd.f32 %v2214_v39, %v1199_v49  ;;  %v1201_v59 = vpop.f32.mrb[21].mxu1  ;;  %v1376_v16 = vsel %vm1036_vm6, %v1372_v40, 0.0  ;;  %v1301_v22 = vrot.slane %v3657_v47, 5  ;;  %v1319_v23 = vrot.slane %v3657_v47, 6 }
 0x466   :  { %4362 = vst [vmem:[#allocation40_spill] sm:$0xff] %v3680_v13  ;;  %4363 = vst [vmem:[#allocation41_spill] sm:$0xff] %v3682_v19  ;;  %v3684_v39 = vadd.f32 %v2223_v45, %v1201_v59  ;;  %v1355_v5 = vadd.f32 %v1351_v42, %v1334_v44  ;;  %v1354_v27 = vadd.f32 %v1350_v8, %v1333_v60  ;;  %v1397_v26 = vsel %vm1049_vm7, %v1393_v43, 0.0  ;;  %v3704_v44 = vld [vmem:[#allocation8 + $0x7] ss:$0 sm:$0xff] }
 0x467   :  { %4361 = vst [vmem:[#allocation39_spill] sm:$0xff] %v3667_v58  ;;  %v1302_v45 = vrot.slane %v3667_v58, 5  ;;  %v1384_v32 = vmul.f32 %v3686_v14, %v1376_v16  ;;  %v1414_v40 = vrot.slane %v3593_v52, 3  ;;  %v1458_v42 = vrot.slane %v3609_v48, 3  ;;  %v3709_v59 = vld [vmem:[#allocation8 + $0x8] ss:$0 sm:$0xff] }
 0x468   :  { %4364 = vst [vmem:[#allocation42_spill] sm:$0xff] %v3684_v39  ;;  %v1367_v30 = vadd.f32 %v1363_v17, %v1354_v27  ;;  %v1405_v49 = vmul.f32 %v3692_v29, %v1397_v26  ;;  %v1476_v60 = vrot.slane %v3609_v48, 4  ;;  %v4292_v17 = vrot.slane %v3609_v48, 5  ;;  %v3718_v27 = vld [vmem:[#allocation8 + $0x9] ss:$0 sm:$0xff] }
 0x469   :  { %v1519_v43 = vrot.slane %v3609_v48, 6  ;;  %v1419_v52 = vsel %vm1418_vm9, %v1414_v40, 0.0  ;;  %v1463_v16 = vsel %vm1462_vm10, %v1458_v42, 0.0  ;;  %v1540_v0 = vrot.slane %v3609_v48, 7  ;;  %v3735_v26 = vld [vmem:[#allocation8 + $0xa] ss:$0 sm:$0xff] }
 0x46a   :  { %v1388_v8 = vadd.f32 %v1384_v32, %v1367_v30  ;;  %v1471_v41 = vmul.f32 %v3704_v44, %v1463_v16  ;;  %v1481_v7 = vsel %vm1480_vm11, %v1476_v60, 0.0  ;;  %v1502_v30 = vsel %vm1303_vm8, %v4292_v17, 0.0  ;;  %v3737_v16 = vld [vmem:[#allocation8 + $0xb] ss:$0 sm:$0xff]  ;;  %v3820_v58 = vld [vmem:[#allocation8 + $0x18] ss:$0 sm:$0xff] }
 0x46b   :  { %v3731_v32 = vadd.f32 %v1364_v36, %v1355_v5  ;;  %v1427_v46 = vmul.f32 %v3701_v37, %v1419_v52  ;;  %v1489_v1 = vmul.f32 %v3709_v59, %v1481_v7  ;;  %v1510_v34 = vmul.f32 %v3718_v27, %v1502_v30  ;;  %v3750_v52 = vld [vmem:[#allocation8 + $0xf] ss:$0 sm:$0xff]  ;;  %v3830_v13 = vld [vmem:[#allocation8 + $0x1c] ss:$0 sm:$0xff] }
 0x46c   :  { %v1409_v40 = vadd.f32 %v1405_v49, %v1388_v8  ;;  %v1523_v10 = vsel %vm1010_vm4, %v1519_v43, 0.0  ;;  %v1574_v17 = vrot.slane %v3609_v48, 1  ;;  %v1595_v36 = vrot.slane %v3609_v48, 2  ;;  %v3748_v8 = vld [vmem:[#allocation8 + $0xd] ss:$0 sm:$0xff]  ;;  %4365 = vst [vmem:[#allocation43_spill] sm:$0xff] %v3750_v52 }
 0x46d   :  { %v1493_v49 = vadd.f32 %v1489_v1, %v1471_v41  ;;  %v1544_v7 = vsel %vm1023_vm5, %v1540_v0, 0.0  ;;  %v1616_v30 = vsel %vm1418_vm9, %v1458_v42, 0.0  ;;  %v3756_v43 = vsel %vm1303_vm8, %v1301_v22, 0.0 }
 0x46e   :  { %v1431_v5 = vadd.f32 %v1427_v46, %v1409_v40  ;;  %4366 = vst [vmem:[#allocation44_spill] sm:$0xff] %v3756_v43  ;;  %v3760_v18 = vsel %vm1010_vm4, %v1319_v23, 0.0  ;;  %v1578_v1 = vsel %vm1036_vm6, %v1574_v17, 0.0  ;;  %v3764_v46 = vld [vmem:[#allocation8 + $0xe] ss:$0 sm:$0xff]  ;;  %v1599_v41 = vsel %vm1049_vm7, %v1595_v36, 0.0 }
 0x46f   :  { %4367 = vst [vmem:[#allocation45_spill] sm:$0xff] %v3760_v18  ;;  %v3770_v0 = vsel %vm1303_vm8, %v1302_v45, 0.0  ;;  %v1514_v42 = vadd.f32 %v1510_v34, %v1493_v49  ;;  %v1531_v22 = vmul.f32 %v3735_v26, %v1523_v10  ;;  %v1565_v40 = vmul.f32 %v3742_v24, %v3609_v48  ;;  %v3785_v49 = vld [vmem:[#allocation8 + $0x10] ss:$0 sm:$0xff]  ;;  %v3853_v43 = vld [vmem:[#allocation8 + $0x1f] ss:$0 sm:$0xff] }
 0x470   :  { %4368 = vst [vmem:[#allocation46_spill] sm:$0xff] %v3770_v0  ;;  %v1552_v23 = vmul.f32 %v3737_v16, %v1544_v7  ;;  %v1624_v12 = vmul.f32 %v3750_v52, %v1616_v30  ;;  %v1634_v17 = vsel %vm1633_vm12, %v1476_v60, 0.0  ;;  %v1691_v36 = vrot.slane %v3617_v61, 1  ;;  %4370 = vst [vmem:[#allocation48_spill] sm:$0xff] %v3785_v49  ;;  %v3789_v30 = vld [vmem:[#allocation8 + $0x16] ss:$0 sm:$0xff] }
 0x471   :  { %v1435_v45 = vadd.f32 %v1431_v5, %v3519_v2  ;;  %v1535_v35 = vadd.f32 %v1531_v22, %v1514_v42  ;;  %v1586_v34 = vmul.f32 %v3748_v8, %v1578_v1  ;;  %v1607_v10 = vmul.f32 %v3764_v46, %v1599_v41  ;;  %4371 = vst [vmem:[#allocation49_spill] sm:$0xff] %v3789_v30  ;;  %v3795_v2 = vld [vmem:[#allocation10 + $0x4] ss:$0 sm:$0xff]  ;;  %v3798_v41 = vld [vmem:[#allocation8 + $0x17] ss:$0 sm:$0xff] }
 0x472   :  { %v1696_v7 = vsel %vm1695_vm13, %v1691_v36, 0.0  ;;  %v1709_v60 = vrot.slane %v3617_v61, 2  ;;  %v1731_v63 = vrot.slane %v3617_v61, 3  ;;  %v1752_v31 = vrot.slane %v3617_v61, 4  ;;  %4372 = vst [vmem:[#allocation50_spill] sm:$0xff] %v3795_v2  ;;  %4376 = vst [vmem:[#allocation52_spill] sm:$0xff] %v3853_v43 }
 0x473   :  { %v1556_v5 = vadd.f32 %v1552_v23, %v1535_v35  ;;  %v1704_v1 = vmul.f32 %v3779_v38, %v1696_v7  ;;  %v1773_v42 = vrot.slane %v3617_v61, 5  ;;  %v1794_v22 = vrot.slane %v3617_v61, 6  ;;  %v3809_v23 = vld [vmem:[#allocation8 + $0x11] ss:$0 sm:$0xff] }
 0x474   :  { %v1642_v28 = vmul.f32 %v3785_v49, %v1634_v17  ;;  %v1714_v25 = vsel %vm1713_vm14, %v1709_v60, 0.0  ;;  %v1735_v39 = vsel %vm1462_vm10, %v1731_v63, 0.0  ;;  %v1815_v21 = vrot.slane %v3617_v61, 7  ;;  %4373 = vst [vmem:[#allocation51_spill] sm:$0xff] %v3809_v23 }
 0x475   :  { %v1569_v35 = vadd.f32 %v1565_v40, %v1556_v5  ;;  %v4374_v7 = vrot.slane %v3609_v48, 5  ;;  %v4375_v17 = vrot.slane %v3599_v9, 1  ;;  %v1722_v15 = vmul.f32 %v3789_v30, %v1714_v25  ;;  %v3826_v48 = vld [vmem:[#allocation8 + $0x19] ss:$0 sm:$0xff] }
 0x476   :  { %v1444_v11 = vadd.f32 %v3795_v2, %v1435_v45  ;;  %v1743_v40 = vmul.f32 %v3798_v41, %v1735_v39  ;;  %v1756_v5 = vsel %vm1480_vm11, %v1752_v31, 0.0  ;;  %v1798_v25 = vsel %vm1010_vm4, %v1794_v22, 0.0  ;;  %v3836_v45 = vld [vmem:[#allocation8 + $0x1b] ss:$0 sm:$0xff] }
 0x477   :  { %v1652_v0 = vsel %vm1651_vm15, %v4374_v7, 0.0  ;;  %v1697_v20 = vsel %vm1695_vm13, %v4375_v17, 0.0  ;;  %v1777_v7 = vsel %vm1303_vm8, %v1773_v42, 0.0  ;;  %v1590_v19 = vadd.f32 %v1586_v34, %v1569_v35  ;;  %v3848_v34 = vld [vmem:[#allocation8 + $0x1e] ss:$0 sm:$0xff] }
 0x478   :  { %v1726_v17 = vadd.f32 %v1722_v15, %v1704_v1  ;;  %v1819_v39 = vsel %vm1023_vm5, %v1815_v21, 0.0  ;;  %v1660_v33 = vmul.f32 %v3809_v23, %v1652_v0  ;;  %v3842_v47 = vmul.f32 %v3779_v38, %v1697_v20 }
 0x479   :  { %v1849_v15 = vsel %vm1036_vm6, %v1691_v36, 0.0  ;;  %v1866_v1 = vsel %vm1049_vm7, %v1709_v60, 0.0  ;;  %v1611_v35 = vadd.f32 %v1607_v10, %v1590_v19  ;;  %v1764_v50 = vmul.f32 %v3820_v58, %v1756_v5 }
 0x47a   :  { %v1747_v18 = vadd.f32 %v1743_v40, %v1726_v17  ;;  %v1883_v20 = vsel %vm1418_vm9, %v1731_v63, 0.0  ;;  %v1785_v0 = vmul.f32 %v3826_v48, %v1777_v7  ;;  %v1806_v38 = vmul.f32 %v3832_v51, %v1798_v25 }
 0x47b   :  { %v1827_v36 = vmul.f32 %v3836_v45, %v1819_v39  ;;  %v1840_v23 = vmul.f32 %v3830_v13, %v3617_v61  ;;  %v1628_v49 = vadd.f32 %v1624_v12, %v1611_v35  ;;  %v1857_v19 = vmul.f32 %v3844_v57, %v1849_v15  ;;  %v3884_v15 = vld [vmem:[#allocation8 + $0x21] ss:$0 sm:$0xff] }
 0x47c   :  { %v1768_v60 = vadd.f32 %v1764_v50, %v1747_v18  ;;  %v1874_v10 = vmul.f32 %v3848_v34, %v1866_v1  ;;  %v1891_v40 = vmul.f32 %v3853_v43, %v1883_v20  ;;  %v1900_v63 = vsel %vm1633_vm12, %v1752_v31, 0.0  ;;  %v3894_v20 = vld [vmem:[#allocation8 + $0x22] ss:$0 sm:$0xff] }
 0x47d   :  { %v1917_v5 = vsel %vm1651_vm15, %v1773_v42, 0.0  ;;  %v1385_v7 = vmul.f32 %v3686_v14, %v3661_v56  ;;  %v1646_v17 = vadd.f32 %v1642_v28, %v1628_v49  ;;  %v1935_v18 = vsel %vm1934_vm0, %v1794_v22, 0.0  ;;  %v3882_v49 = vld [vmem:[#allocation8 + $0x20] ss:$0 sm:$0xff] }
 0x47e   :  { %v1789_v25 = vadd.f32 %v1785_v0, %v1768_v60  ;;  %v4377_v12 = vrot.slane %v3611_v55, 3  ;;  %v1406_v31 = vmul.f32 %v3692_v29, %v3665_v53  ;;  %v1459_v42 = vrot.slane %v3619_v62, 3  ;;  %v3896_v0 = vld [vmem:[#allocation8 + $0x23] ss:$0 sm:$0xff] }
 0x47f   :  { %v1389_v61 = vadd.f32 %v1385_v7, %v3731_v32  ;;  %v1477_v39 = vrot.slane %v3619_v62, 4  ;;  %v1664_v56 = vadd.f32 %v1660_v33, %v1646_v17  ;;  %v1953_v55 = vsel %vm1952_vm1, %v1815_v21, 0.0 }
 0x480   :  { %v1420_v50 = vsel %vm1418_vm9, %v4377_v12, 0.0  ;;  %v1810_v28 = vadd.f32 %v1806_v38, %v1789_v25  ;;  %v1499_v22 = vrot.slane %v3619_v62, 5  ;;  %v1464_v53 = vsel %vm1462_vm10, %v1459_v42, 0.0 }
 0x481   :  { %v1410_v1 = vadd.f32 %v1406_v31, %v1389_v61  ;;  %v1428_v32 = vmul.f32 %v3701_v37, %v1420_v50  ;;  %v1482_v35 = vsel %vm1480_vm11, %v1477_v39, 0.0  ;;  %v1668_v33 = vadd.f32 %v1664_v56, %v1444_v11  ;;  %v3904_v50 = vld [vmem:[#allocation10 + $0x6] ss:$0 sm:$0xff] }
 0x482   :  { %v1831_v38 = vadd.f32 %v1827_v36, %v1810_v28  ;;  %v1472_v60 = vmul.f32 %v3704_v44, %v1464_v53  ;;  %v1490_v21 = vmul.f32 %v3709_v59, %v1482_v35  ;;  %v1908_v7 = vmul.f32 %v3882_v49, %v1900_v63 }
 0x483   :  { %v1925_v17 = vmul.f32 %v3884_v15, %v1917_v5  ;;  %v1432_v25 = vadd.f32 %v1428_v32, %v1410_v1  ;;  %v1503_v12 = vsel %vm1303_vm8, %v1499_v22, 0.0  ;;  %v4378_v31 = vrot.slane %v3619_v62, 1 }
 0x484   :  { %v1844_v11 = vadd.f32 %v1840_v23, %v1831_v38  ;;  %v1494_v36 = vadd.f32 %v1490_v21, %v1472_v60  ;;  %v1511_v61 = vmul.f32 %v3718_v27, %v1503_v12  ;;  %v1943_v28 = vmul.f32 %v3894_v20, %v1935_v18 }
 0x485   :  { %v1579_v56 = vsel %vm1036_vm6, %v4378_v31, 0.0  ;;  %v1961_v63 = vmul.f32 %v3896_v0, %v1953_v55  ;;  %v1596_v5 = vrot.slane %v3619_v62, 2  ;;  %v1617_v1 = vsel %vm1418_vm9, %v1459_v42, 0.0 }
 0x486   :  { %v1861_v32 = vadd.f32 %v1857_v19, %v1844_v11  ;;  %v1515_v53 = vadd.f32 %v1511_v61, %v1494_v36  ;;  %v1532_v23 = vmul.f32 %v3735_v26, %v3671_v3  ;;  %v1553_v35 = vmul.f32 %v3737_v16, %v3675_v6 }
 0x487   :  { %v1677_v38 = vadd.f32 %v3904_v50, %v1668_v33  ;;  %v1436_v60 = vadd.f32 %v1432_v25, %v3523_v4  ;;  %v1566_v18 = vmul.f32 %v3742_v24, %v3619_v62  ;;  %v1587_v55 = vmul.f32 %v3748_v8, %v1579_v56 }
 0x488   :  { %v1878_v21 = vadd.f32 %v1874_v10, %v1861_v32  ;;  %v1536_v12 = vadd.f32 %v1532_v23, %v1515_v53  ;;  %v1600_v19 = vsel %vm1049_vm7, %v1596_v5, 0.0  ;;  %v1625_v42 = vmul.f32 %v3750_v52, %v1617_v1 }
 0x489   :  { %v1710_v3 = vrot.slane %v3599_v9, 2  ;;  %v1732_v6 = vrot.slane %v3599_v9, 3  ;;  %v1753_v33 = vrot.slane %v3599_v9, 4  ;;  %v1774_v4 = vrot.slane %v3599_v9, 5 }
 0x48a   :  { %v1895_v25 = vadd.f32 %v1891_v40, %v1878_v21  ;;  %v1557_v11 = vadd.f32 %v1553_v35, %v1536_v12  ;;  %v4334_v62 = vrot.slane %v3599_v9, 6  ;;  %v4333_v10 = vrot.slane %v3599_v9, 7 }
 0x48b   :  { %v1635_v36 = vsel %vm1633_vm12, %v1477_v39, 0.0  ;;  %v1653_v61 = vsel %vm1651_vm15, %v1499_v22, 0.0  ;;  %v1715_v31 = vsel %vm1713_vm14, %v1710_v3, 0.0  ;;  %v1736_v56 = vsel %vm1462_vm10, %v1732_v6, 0.0 }
 0x48c   :  { %v1912_v5 = vadd.f32 %v1908_v7, %v1895_v25  ;;  %v1570_v1 = vadd.f32 %v1566_v18, %v1557_v11  ;;  %v1723_v40 = vmul.f32 %v3789_v30, %v1715_v31  ;;  %v1757_v32 = vsel %vm1480_vm11, %v1753_v33, 0.0 }
 0x48d   :  { %v1608_v53 = vmul.f32 %v3764_v46, %v1600_v19  ;;  %v1744_v39 = vmul.f32 %v3798_v41, %v1736_v56  ;;  %v1778_v22 = vsel %vm1303_vm8, %v1774_v4, 0.0  ;;  %v1799_v23 = vsel %vm1010_vm4, %v4334_v62, 0.0  ;;  %v4379_v19 = vld [vmem:[#allocation48_spill] sm:$0xff] }
 0x48e   :  { %v1929_v35 = vadd.f32 %v1925_v17, %v1912_v5  ;;  %v1591_v7 = vadd.f32 %v1587_v55, %v1570_v1  ;;  %v1727_v18 = vadd.f32 %v1723_v40, %v3842_v47  ;;  %v1820_v21 = vsel %vm1023_vm5, %v4333_v10, 0.0  ;;  %v4381_v1 = vld [vmem:[#allocation51_spill] sm:$0xff] }
 0x48f   :  { %v1445_v12 = vadd.f32 %v3795_v2, %v1436_v60  ;;  %v1643_v25 = vmul.f32 %v4379_v19, %v1635_v36  ;;  %v1765_v11 = vmul.f32 %v3820_v58, %v1757_v32  ;;  %v4380_v31 = vrot.slane %v3599_v9, 1 }
 0x490   :  { %v1947_v17 = vadd.f32 %v1943_v28, %v1929_v35  ;;  %v1612_v55 = vadd.f32 %v1608_v53, %v1591_v7  ;;  %v1748_v5 = vadd.f32 %v1744_v39, %v1727_v18  ;;  %v1867_v47 = vsel %vm1049_vm7, %v1710_v3, 0.0  ;;  %v3973_v28 = vld [vmem:[#allocation10 + $0x8] ss:$0 sm:$0xff]  ;;  %v4382_v35 = vld [vmem:[#allocation44_spill] sm:$0xff]  ;;  %v4383_v7 = vld [vmem:[#allocation33_spill] sm:$0xff] }
 0x491   :  { %v1850_v56 = vsel %vm1036_vm6, %v4380_v31, 0.0  ;;  %v1661_v40 = vmul.f32 %v4381_v1, %v1653_v61  ;;  %v1786_v10 = vmul.f32 %v3826_v48, %v1778_v22  ;;  %v1807_v60 = vmul.f32 %v3832_v51, %v1799_v23 }
 0x492   :  { %v1828_v36 = vmul.f32 %v3836_v45, %v1820_v21  ;;  %v1965_v32 = vadd.f32 %v1961_v63, %v1947_v17  ;;  %v1629_v62 = vadd.f32 %v1625_v42, %v1612_v55  ;;  %v1769_v2 = vadd.f32 %v1765_v11, %v1748_v5  ;;  %v4384_v21 = vld [vmem:[#allocation45_spill] sm:$0xff]  ;;  %v4385_v11 = vld [vmem:[#allocation35_spill] sm:$0xff] }
 0x493   :  { %v1884_v31 = vsel %vm1418_vm9, %v1732_v6, 0.0  ;;  %v1841_v53 = vmul.f32 %v3830_v13, %v3599_v9  ;;  %v1858_v3 = vmul.f32 %v3844_v57, %v1850_v56  ;;  %v1875_v61 = vmul.f32 %v3848_v34, %v1867_v47  ;;  %v4386_v56 = vld [vmem:[#allocation38_spill] sm:$0xff] }
 0x494   :  { %v1901_v39 = vsel %vm1633_vm12, %v1753_v33, 0.0  ;;  %v1969_v22 = vadd.f32 %v1965_v32, %v1677_v38  ;;  %v1647_v23 = vadd.f32 %v1643_v25, %v1629_v62  ;;  %v1790_v63 = vadd.f32 %v1786_v10, %v1769_v2  ;;  %v4388_v10 = vld [vmem:[#allocation37_spill] sm:$0xff] }
 0x495   :  { %v1918_v42 = vsel %vm1651_vm15, %v1774_v4, 0.0  ;;  %v1892_v6 = vmul.f32 %v3853_v43, %v1884_v31  ;;  %v1314_v18 = vmul.f32 %v4383_v7, %v4382_v35  ;;  %v1331_v17 = vmul.f32 %v4385_v11, %v4384_v21  ;;  %v4389_v21 = vld [vmem:[#allocation34_spill] sm:$0xff] }
 0x496   :  { %v4387_v55 = vrot.slane %v4386_v56, 7  ;;  %v1978_v38 = vadd.f32 %v3973_v28, %v1969_v22  ;;  %v1665_v33 = vadd.f32 %v1661_v40, %v1647_v23  ;;  %v1811_v2 = vadd.f32 %v1807_v60, %v1790_v63 }
 0x497   :  { %v1909_v62 = vmul.f32 %v3882_v49, %v1901_v39  ;;  %v1335_v4 = vadd.f32 %v1331_v17, %v1314_v18  ;;  %v1374_v47 = vrot.slane %v4386_v56, 1  ;;  %v1395_v32 = vrot.slane %v4386_v56, 2 }
 0x498   :  { %v1344_v5 = vsel %vm1023_vm5, %v4387_v55, 0.0  ;;  %2662 = vmatprep.mubr.f32.mxu1 %v1978_v38  ;;  %v1669_v31 = vadd.f32 %v1665_v33, %v1445_v12  ;;  %v1832_v35 = vadd.f32 %v1828_v36, %v1811_v2  ;;  %v1365_v43 = vmul.f32 %v4389_v21, %v4386_v56  ;;  %v4390_v55 = vld [vmem:[#allocation41_spill] sm:$0xff] }
 0x499   :  { %v1352_v25 = vmul.f32 %v4388_v10, %v1344_v5  ;;  %v1460_v11 = vrot.slane %v4390_v55, 3  ;;  %v1378_v40 = vsel %vm1036_vm6, %v1374_v47, 0.0  ;;  %v1399_v60 = vsel %vm1049_vm7, %v1395_v32, 0.0 }
 0x49a   :  { %v1478_v39 = vrot.slane %v4390_v55, 4  ;;  %v1845_v23 = vadd.f32 %v1841_v53, %v1832_v35  ;;  %v1926_v63 = vmul.f32 %v3884_v15, %v1918_v42  ;;  %v4391_v12 = vrot.slane %v3599_v9, 6 }
 0x49b   :  { %v1356_v22 = vadd.f32 %v1352_v25, %v1335_v4  ;;  %v1416_v18 = vrot.slane %v4386_v56, 3  ;;  %v1386_v5 = vmul.f32 %v3686_v14, %v1378_v40  ;;  %v1465_v38 = vsel %vm1462_vm10, %v1460_v11, 0.0 }
 0x49c   :  { %v1936_v36 = vsel %vm1934_vm0, %v4391_v12, 0.0  ;;  %v1483_v33 = vsel %vm1480_vm11, %v1478_v39, 0.0  ;;  %v1862_v2 = vadd.f32 %v1858_v3, %v1845_v23  ;;  %v1407_v53 = vmul.f32 %v3692_v29, %v1399_v60 }
 0x49d   :  { %v1369_v17 = vadd.f32 %v1365_v43, %v1356_v22  ;;  %v1473_v42 = vmul.f32 %v3704_v44, %v1465_v38  ;;  %v1491_v4 = vmul.f32 %v3709_v59, %v1483_v33  ;;  %v1500_v47 = vrot.slane %v4390_v55, 5 }
 0x49e   :  { %v1521_v43 = vrot.slane %v4390_v55, 6  ;;  %v1542_v56 = vrot.slane %v4390_v55, 7  ;;  %v1879_v32 = vadd.f32 %v1875_v61, %v1862_v2  ;;  %v1421_v35 = vsel %vm1418_vm9, %v1416_v18, 0.0 }
 0x49f   :  { %v1390_v25 = vadd.f32 %v1386_v5, %v1369_v17  ;;  %v1495_v22 = vadd.f32 %v1491_v4, %v1473_v42  ;;  %v1576_v3 = vrot.slane %v4390_v55, 1  ;;  %v4392_v40 = vrot.slane %v3599_v9, 7 }
 0x4a0   :  { %v1504_v12 = vsel %vm1303_vm8, %v1500_v47, 0.0  ;;  %v1525_v17 = vsel %vm1010_vm4, %v1521_v43, 0.0  ;;  %v1896_v5 = vadd.f32 %v1892_v6, %v1879_v32  ;;  %v1944_v61 = vmul.f32 %v3894_v20, %v1936_v36 }
 0x4a1   :  { %v1954_v60 = vsel %vm1952_vm1, %v4392_v40, 0.0  ;;  %v1411_v23 = vadd.f32 %v1407_v53, %v1390_v25  ;;  %v1512_v18 = vmul.f32 %v3718_v27, %v1504_v12  ;;  %v1546_v38 = vsel %vm1023_vm5, %v1542_v56, 0.0 }
 0x4a2   :  { %v1429_v9 = vmul.f32 %v3701_v37, %v1421_v35  ;;  %v1580_v33 = vsel %vm1036_vm6, %v1576_v3, 0.0  ;;  %v1597_v2 = vrot.slane %v4390_v55, 2  ;;  %v1618_v53 = vsel %vm1418_vm9, %v1460_v11, 0.0 }
 0x4a3   :  { %v1913_v42 = vadd.f32 %v1909_v62, %v1896_v5  ;;  %v1962_v6 = vmul.f32 %v3896_v0, %v1954_v60  ;;  %v1516_v4 = vadd.f32 %v1512_v18, %v1495_v22  ;;  %v1533_v36 = vmul.f32 %v3735_v26, %v1525_v17  ;;  %v4393_v60 = vld [vmem:[#allocation40_spill] sm:$0xff] }
 0x4a4   :  { %v1678_v25 = vadd.f32 %v3904_v50, %v1669_v31  ;;  %v1433_v43 = vadd.f32 %v1429_v9, %v1411_v23  ;;  %v1554_v56 = vmul.f32 %v3737_v16, %v1546_v38  ;;  %v1567_v32 = vmul.f32 %v3742_v24, %v4390_v55 }
 0x4a5   :  { %v1930_v35 = vadd.f32 %v1926_v63, %v1913_v42  ;;  %v1537_v3 = vadd.f32 %v1533_v36, %v1516_v4  ;;  %v1588_v40 = vmul.f32 %v3748_v8, %v1580_v33  ;;  %v1626_v11 = vmul.f32 %v3750_v52, %v1618_v53 }
 0x4a6   :  { %v1601_v62 = vsel %vm1049_vm7, %v1597_v2, 0.0  ;;  %v1636_v22 = vsel %vm1633_vm12, %v1478_v39, 0.0  ;;  %v1693_v31 = vrot.slane %v4393_v60, 1  ;;  %v1711_v23 = vrot.slane %v4393_v60, 2  ;;  %v4394_v2 = vld [vmem:[#allocation47_spill] sm:$0xff] }
 0x4a7   :  { %v1948_v12 = vadd.f32 %v1944_v61, %v1930_v35  ;;  %v1558_v17 = vadd.f32 %v1554_v56, %v1537_v3  ;;  %v1733_v55 = vrot.slane %v4393_v60, 3  ;;  %v1754_v63 = vrot.slane %v4393_v60, 4 }
 0x4a8   :  { %v1698_v5 = vsel %vm1695_vm13, %v1693_v31, 0.0  ;;  %v1716_v18 = vsel %vm1713_vm14, %v1711_v23, 0.0  ;;  %v1775_v38 = vrot.slane %v4393_v60, 5  ;;  %v1609_v42 = vmul.f32 %v3764_v46, %v1601_v62 }
 0x4a9   :  { %v1966_v9 = vadd.f32 %v1962_v6, %v1948_v12  ;;  %v1571_v33 = vadd.f32 %v1567_v32, %v1558_v17  ;;  %v1706_v53 = vmul.f32 %v4394_v2, %v1698_v5  ;;  %v1724_v61 = vmul.f32 %v3789_v30, %v1716_v18  ;;  %v4395_v32 = vld [vmem:[#allocation23_spill] sm:$0xff] }
 0x4aa   :  { %v1737_v4 = vsel %vm1462_vm10, %v1733_v55, 0.0  ;;  %v1758_v36 = vsel %vm1480_vm11, %v1754_v63, 0.0  ;;  %v1779_v56 = vsel %vm1303_vm8, %v1775_v38, 0.0  ;;  %v1437_v12 = vadd.f32 %v1433_v43, %v4395_v32 }
 0x4ab   :  { %v1970_v35 = vadd.f32 %v1966_v9, %v1678_v25  ;;  %v1592_v3 = vadd.f32 %v1588_v40, %v1571_v33  ;;  %v1728_v39 = vadd.f32 %v1724_v61, %v1706_v53  ;;  %v1745_v6 = vmul.f32 %v3798_v41, %v1737_v4  ;;  %v4397_v9 = vld [vmem:[#allocation39_spill] sm:$0xff] }
 0x4ac   :  { %v1654_v17 = vsel %vm1651_vm15, %v1500_v47, 0.0  ;;  %v4396_v62 = vrot.slane %v4393_v60, 6  ;;  %v1817_v18 = vrot.slane %v4393_v60, 7  ;;  %v1766_v40 = vmul.f32 %v3820_v58, %v1758_v36  ;;  %v4399_v36 = vld [vmem:[#allocation50_spill] sm:$0xff] }
 0x4ad   :  { %v1979_v52 = vadd.f32 %v3973_v28, %v1970_v35  ;;  %v1613_v30 = vadd.f32 %v1609_v42, %v1592_v3  ;;  %v1749_v25 = vadd.f32 %v1745_v6, %v1728_v39  ;;  %v4398_v33 = vrot.slane %v4397_v9, 6  ;;  %v4400_v6 = vld [vmem:[#allocation25_spill] sm:$0xff] }
 0x4ae   :  { %v1800_v5 = vsel %vm1010_vm4, %v4396_v62, 0.0  ;;  %v1644_v47 = vmul.f32 %v4379_v19, %v1636_v22  ;;  %v1787_v53 = vmul.f32 %v3826_v48, %v1779_v56  ;;  %v1821_v61 = vsel %vm1023_vm5, %v1817_v18, 0.0  ;;  %v4401_v62 = vld [vmem:[#allocation26_spill] sm:$0xff] }
 0x4af   :  { %v1324_v43 = vsel %vm1010_vm4, %v4398_v33, 0.0  ;;  %2663 = vmatmul.mubr.f32.vlgmr.msra.gmra.mrb[22].mxu1 %v1979_v52  ;;  %v1630_v4 = vadd.f32 %v1626_v11, %v1613_v30  ;;  %v1770_v32 = vadd.f32 %v1766_v40, %v1749_v25  ;;  %v1851_v39 = vsel %vm1036_vm6, %v1693_v31, 0.0  ;;  %v4403_v25 = vld [vmem:[#allocation35_spill] sm:$0xff] }
 0x4b0   :  { %v1868_v42 = vsel %vm1049_vm7, %v1711_v23, 0.0  ;;  %v1446_v35 = vadd.f32 %v4399_v36, %v1437_v12  ;;  %v1662_v3 = vmul.f32 %v4381_v1, %v1654_v17  ;;  %v1808_v22 = vmul.f32 %v3832_v51, %v1800_v5  ;;  %3050 = vmatpush3.bf16.msra.mxu1 %v4400_v6  ;;  %v4402_v17 = vld [vmem:[#allocation46_spill] sm:$0xff] }
 0x4b1   :  { %v1885_v56 = vsel %vm1418_vm9, %v1733_v55, 0.0  ;;  %v1648_v52 = vadd.f32 %v1644_v47, %v1630_v4  ;;  %v1791_v30 = vadd.f32 %v1787_v53, %v1770_v32  ;;  %v1829_v11 = vmul.f32 %v3836_v45, %v1821_v61  ;;  %3043 = vmatprep.subr.bf16.mxu1 %v4401_v62  ;;  %v4404_v47 = vld [vmem:[#allocation52_spill] sm:$0xff] }
 0x4b2   :  { %v1842_v31 = vmul.f32 %v3830_v13, %v4393_v60  ;;  %v1859_v23 = vmul.f32 %v3844_v57, %v1851_v39  ;;  %v1876_v12 = vmul.f32 %v3848_v34, %v1868_v42  ;;  %v1315_v5 = vmul.f32 %v4383_v7, %v4402_v17 }
 0x4b3   :  { %v1332_v55 = vmul.f32 %v4403_v25, %v1324_v43  ;;  %v1666_v40 = vadd.f32 %v1662_v3, %v1648_v52  ;;  %v1812_v33 = vadd.f32 %v1808_v22, %v1791_v30  ;;  %v1893_v53 = vmul.f32 %v4404_v47, %v1885_v56  ;;  %v4407_v52 = vld [vmem:[#allocation42_spill] sm:$0xff] }
 0x4b4   :  { %v1902_v61 = vsel %vm1633_vm12, %v1754_v63, 0.0  ;;  %v1919_v4 = vsel %vm1651_vm15, %v1775_v38, 0.0  ;;  %v4405_v39 = vrot.slane %v4397_v9, 7  ;;  %v1375_v7 = vrot.slane %v4397_v9, 1  ;;  %3051 = vmatpush3.bf16.msra.mxu1 %v4401_v62  ;;  %v4406_v63 = vld [vmem:[#allocation27_spill] sm:$0xff] }
 0x4b5   :  { %v1336_v32 = vadd.f32 %v1332_v55, %v1315_v5  ;;  %v1670_v43 = vadd.f32 %v1666_v40, %v1446_v35  ;;  %v1833_v3 = vadd.f32 %v1829_v11, %v1812_v33  ;;  %v1396_v56 = vrot.slane %v4397_v9, 2  ;;  %3044 = vmatprep.subr.bf16.mxu1 %v4406_v63 }
 0x4b6   :  { %v1345_v42 = vsel %vm1023_vm5, %v4405_v39, 0.0  ;;  %v1910_v38 = vmul.f32 %v3882_v49, %v1902_v61  ;;  %v1379_v6 = vsel %vm1036_vm6, %v1375_v7, 0.0  ;;  %v1461_v30 = vrot.slane %v4407_v52, 3 }
 0x4b7   :  { %v1353_v22 = vmul.f32 %v4388_v10, %v1345_v42  ;;  %v1479_v17 = vrot.slane %v4407_v52, 4  ;;  %v1846_v5 = vadd.f32 %v1842_v31, %v1833_v3  ;;  %v4408_v62 = vrot.slane %v4393_v60, 6 }
 0x4b8   :  { %v1366_v11 = vmul.f32 %v4389_v21, %v4397_v9  ;;  %v1955_v25 = vsel %vm1952_vm1, %v1817_v18, 0.0  ;;  %v1400_v55 = vsel %vm1049_vm7, %v1396_v56, 0.0  ;;  %v1466_v40 = vsel %vm1462_vm10, %v1461_v30, 0.0  ;;  %3052 = vmatpush3.bf16.msra.mxu1 %v4406_v63  ;;  %v4409_v18 = vld [vmem:[#allocation28_spill] sm:$0xff] }
 0x4b9   :  { %v1937_v35 = vsel %vm1934_vm0, %v4408_v62, 0.0  ;;  %v1357_v10 = vadd.f32 %v1353_v22, %v1336_v32  ;;  %v1484_v60 = vsel %vm1480_vm11, %v1479_v17, 0.0  ;;  %v1863_v31 = vadd.f32 %v1859_v23, %v1846_v5  ;;  %3045 = vmatprep.subr.bf16.mxu1 %v4409_v18  ;;  %v4410_v5 = vld [vmem:[#allocation29_spill] sm:$0xff] }
 0x4ba   :  { %v1387_v21 = vmul.f32 %v3686_v14, %v1379_v6  ;;  %v1417_v61 = vrot.slane %v4397_v9, 3  ;;  %v1474_v32 = vmul.f32 %v3704_v44, %v1466_v40  ;;  %v1492_v39 = vmul.f32 %v3709_v59, %v1484_v60 }
 0x4bb   :  { %v1370_v33 = vadd.f32 %v1366_v11, %v1357_v10  ;;  %v1501_v42 = vrot.slane %v4407_v52, 5  ;;  %v1522_v7 = vrot.slane %v4407_v52, 6  ;;  %v1880_v3 = vadd.f32 %v1876_v12, %v1863_v31 }
 0x4bc   :  { %v1408_v56 = vmul.f32 %v3692_v29, %v1400_v55  ;;  %v1543_v23 = vrot.slane %v4407_v52, 7  ;;  %v1496_v63 = vadd.f32 %v1492_v39, %v1474_v32  ;;  %v1577_v59 = vrot.slane %v4407_v52, 1  ;;  %3053 = vmatpush3.bf16.msra.mxu1 %v4409_v18  ;;  %v4412_v18 = vld [vmem:[#allocation36_spill] sm:$0xff] }
 0x4bd   :  { %v1391_v22 = vadd.f32 %v1387_v21, %v1370_v33  ;;  %v1505_v14 = vsel %vm1303_vm8, %v1501_v42, 0.0  ;;  %v1526_v44 = vsel %vm1010_vm4, %v1522_v7, 0.0  ;;  %v1897_v9 = vadd.f32 %v1893_v53, %v1880_v3  ;;  %3046 = vmatprep.subr.bf16.mxu1 %v4410_v5 }
 0x4be   :  { %v1927_v12 = vmul.f32 %v3884_v15, %v1919_v4  ;;  %v1422_v29 = vsel %vm1418_vm9, %v1417_v61, 0.0  ;;  %v1513_v6 = vmul.f32 %v3718_v27, %v1505_v14  ;;  %v1945_v62 = vmul.f32 %v3894_v20, %v1937_v35 }
 0x4bf   :  { %v1412_v10 = vadd.f32 %v1408_v56, %v1391_v22  ;;  %v1547_v11 = vsel %vm1023_vm5, %v1543_v23, 0.0  ;;  %v1598_v55 = vrot.slane %v4407_v52, 2  ;;  %v1914_v40 = vadd.f32 %v1910_v38, %v1897_v9  ;;  %v4414_v9 = vld [vmem:[#allocation31_spill] sm:$0xff] }
 0x4c0   :  { %v1963_v53 = vmul.f32 %v3896_v0, %v1955_v25  ;;  %v1517_v60 = vadd.f32 %v1513_v6, %v1496_v63  ;;  %v1534_v4 = vmul.f32 %v3735_v26, %v1526_v44  ;;  %v1679_v31 = vadd.f32 %v3904_v50, %v1670_v43  ;;  %3054 = vmatpush3.bf16.msra.mxu1 %v4410_v5  ;;  %v4411_v26 = vld [vmem:[#allocation30_spill] sm:$0xff] }
 0x4c1   :  { %v1430_v27 = vmul.f32 %v3701_v37, %v1422_v29  ;;  %v1581_v33 = vsel %vm1036_vm6, %v1577_v59, 0.0  ;;  %v1602_v35 = vsel %vm1049_vm7, %v1598_v55, 0.0  ;;  %v1931_v21 = vadd.f32 %v1927_v12, %v1914_v40  ;;  %3047 = vmatprep.subr.bf16.mxu1 %v4411_v26  ;;  %v4413_v59 = vld [vmem:[#allocation49_spill] sm:$0xff] }
 0x4c2   :  { %v1538_v61 = vadd.f32 %v1534_v4, %v1517_v60  ;;  %v1555_v38 = vmul.f32 %v3737_v16, %v1547_v11  ;;  %v1568_v25 = vmul.f32 %v3742_v24, %v4407_v52  ;;  %v1619_v37 = vsel %vm1418_vm9, %v1461_v30, 0.0 }
 0x4c3   :  { %v1434_v43 = vadd.f32 %v1430_v27, %v1412_v10  ;;  %v1694_v32 = vrot.slane %v4412_v18, 1  ;;  %v1712_v39 = vrot.slane %v4412_v18, 2  ;;  %v1949_v7 = vadd.f32 %v1945_v62, %v1931_v21 }
 0x4c4   :  { %v1559_v3 = vadd.f32 %v1555_v38, %v1538_v61  ;;  %v1589_v22 = vmul.f32 %v3748_v8, %v1581_v33  ;;  %v1610_v56 = vmul.f32 %v3764_v46, %v1602_v35  ;;  %v1734_v23 = vrot.slane %v4412_v18, 3  ;;  %3055 = vmatpush3.bf16.msra.mxu1 %v4411_v26  ;;  %v4416_v33 = vld [vmem:[#allocation32_spill] sm:$0xff] }
 0x4c5   :  { %v1699_v16 = vsel %vm1695_vm13, %v1694_v32, 0.0  ;;  %v1717_v24 = vsel %vm1713_vm14, %v1712_v39, 0.0  ;;  %v1755_v30 = vrot.slane %v4412_v18, 4  ;;  %v1967_v63 = vadd.f32 %v1963_v53, %v1949_v7  ;;  %3048 = vmatprep.subr.bf16.mxu1 %v4414_v9  ;;  %v4417_v35 = vld [vmem:[#allocation24_spill] sm:$0xff] }
 0x4c6   :  { %v1572_v14 = vadd.f32 %v1568_v25, %v1559_v3  ;;  %v1707_v44 = vmul.f32 %v4394_v2, %v1699_v16  ;;  %v1725_v8 = vmul.f32 %v4413_v59, %v1717_v24  ;;  %v1738_v46 = vsel %vm1462_vm10, %v1734_v23, 0.0  ;;  %v4415_v2 = vld [vmem:[#allocation43_spill] sm:$0xff] }
 0x4c7   :  { %v1759_v12 = vsel %vm1480_vm11, %v1755_v30, 0.0  ;;  %v1776_v29 = vrot.slane %v4412_v18, 5  ;;  %v1797_v6 = vrot.slane %v4412_v18, 6  ;;  %v1971_v5 = vadd.f32 %v1967_v63, %v1679_v31 }
 0x4c8   :  { %v1593_v62 = vadd.f32 %v1589_v22, %v1572_v14  ;;  %v1729_v10 = vadd.f32 %v1725_v8, %v1707_v44  ;;  %v1746_v11 = vmul.f32 %v3798_v41, %v1738_v46  ;;  %v1627_v55 = vmul.f32 %v4415_v2, %v1619_v37  ;;  %3056 = vmatpush3.bf16.msra.mxu1 %v4414_v9 }
 0x4c9   :  { %v1637_v40 = vsel %vm1633_vm12, %v1479_v17, 0.0  ;;  %v1780_v53 = vsel %vm1303_vm8, %v1776_v29, 0.0  ;;  %v1818_v60 = vrot.slane %v4412_v18, 7  ;;  %v1980_v4 = vadd.f32 %v3973_v28, %v1971_v5  ;;  %3049 = vmatprep.subr.bf16.mxu1 %v4416_v33 }
 0x4ca   :  { %v1614_v31 = vadd.f32 %v1610_v56, %v1593_v62  ;;  %v1750_v27 = vadd.f32 %v1746_v11, %v1729_v10  ;;  %v1767_v41 = vmul.f32 %v3820_v58, %v1759_v12  ;;  %v1438_v21 = vadd.f32 %v1434_v43, %v4417_v35 }
 0x4cb   :  { %v1655_v17 = vsel %vm1651_vm15, %v1501_v42, 0.0  ;;  %v1801_v61 = vsel %vm1010_vm4, %v1797_v6, 0.0  ;;  %2665 = vmatprep.mubr.f32.mxu1 %v1980_v4  ;;  %v1645_v25 = vmul.f32 %v4379_v19, %v1637_v40  ;;  %v1788_v37 = vmul.f32 %v3826_v48, %v1780_v53  ;;  %v4419_v40 = vld [vmem:[#allocation20_spill] sm:$0xff]  ;;  %v4420_v4 = vld [vmem:[#allocation21_spill] sm:$0xff] }
 0x4cc   :  { %v1631_v38 = vadd.f32 %v1627_v55, %v1614_v31  ;;  %v1771_v26 = vadd.f32 %v1767_v41, %v1750_v27  ;;  %v1822_v58 = vsel %vm1023_vm5, %v1818_v60, 0.0  ;;  %3057 = vmatpush3.bf16.msra.mxu1 %v4416_v33  ;;  %v1663_v52 = vmul.f32 %v4381_v1, %v1655_v17  ;;  %v4421_v27 = vld [vmem:[#allocation22_spill] sm:$0xff] }
 0x4cd   :  { %v1809_v42 = vmul.f32 %v3832_v51, %v1801_v61  ;;  %v1447_v3 = vadd.f32 %v4399_v36, %v1438_v21  ;;  %v1830_v19 = vmul.f32 %v3836_v45, %v1822_v58  ;;  %v1852_v48 = vsel %vm1036_vm6, %v1694_v32, 0.0 }
 0x4ce   :  { %v1649_v43 = vadd.f32 %v1645_v25, %v1631_v38  ;;  %v1792_v7 = vadd.f32 %v1788_v37, %v1771_v26  ;;  %v1843_v63 = vmul.f32 %v3830_v13, %v4412_v18  ;;  %v1869_v1 = vsel %vm1049_vm7, %v1712_v39, 0.0 }
 0x4cf   :  { %v1860_v51 = vmul.f32 %v3844_v57, %v1852_v48  ;;  %v1886_v36 = vsel %vm1418_vm9, %v1734_v23, 0.0  ;;  %v1877_v45 = vmul.f32 %v3848_v34, %v1869_v1  ;;  %v1903_v32 = vsel %vm1633_vm12, %v1755_v30, 0.0 }
 0x4d0   :  { %v1667_v22 = vadd.f32 %v1663_v52, %v1649_v43  ;;  %v1813_v56 = vadd.f32 %v1809_v42, %v1792_v7  ;;  %v1894_v8 = vmul.f32 %v4404_v47, %v1886_v36  ;;  %v1920_v13 = vsel %vm1651_vm15, %v1776_v29, 0.0 }
 0x4d1   :  { %v1911_v39 = vmul.f32 %v3882_v49, %v1903_v32  ;;  %v1938_v57 = vsel %vm1934_vm0, %v1797_v6, 0.0  ;;  %v1928_v23 = vmul.f32 %v3884_v15, %v1920_v13  ;;  %v1956_v34 = vsel %vm1952_vm1, %v1818_v60, 0.0  ;;  %v2253_v6 = vld [vmem:[#allocation10 + $0xa] ss:$0 sm:$0xff] }
 0x4d2   :  { %v1671_v16 = vadd.f32 %v1667_v22, %v1447_v3  ;;  %v1834_v24 = vadd.f32 %v1830_v19, %v1813_v56  ;;  %v1946_v30 = vmul.f32 %v3894_v20, %v1938_v57  ;;  %v1964_v29 = vmul.f32 %v3896_v0, %v1956_v34 }
 0x4d4   :  { %v1847_v14 = vadd.f32 %v1843_v63, %v1834_v24  ;;  %v1680_v47 = vadd.f32 %v3904_v50, %v1671_v16 }
 0x4d6   :  { %v1864_v44 = vadd.f32 %v1860_v51, %v1847_v14 }
 0x4d8   :  { %v1881_v59 = vadd.f32 %v1877_v45, %v1864_v44 }
 0x4da   :  { %v1898_v18 = vadd.f32 %v1894_v8, %v1881_v59 }
 0x4dc   :  { %v1915_v9 = vadd.f32 %v1911_v39, %v1898_v18 }
 0x4de   :  { %v1932_v46 = vadd.f32 %v1928_v23, %v1915_v9 }
 0x4e0   :  { %v1950_v12 = vadd.f32 %v1946_v30, %v1932_v46 }
 0x4e2   :  { %v1968_v5 = vadd.f32 %v1964_v29, %v1950_v12 }
 0x4e4   :  { %v1972_v62 = vadd.f32 %v1968_v5, %v1680_v47 }
 0x4e6   :  { %v1981_v49 = vadd.f32 %v3973_v28, %v1972_v62 }
 0x4e8   :  { %2666 = vmatmul.mubr.f32.gmra.mrb[24].mxu1 %v1981_v49 }
 0x582   :  { %v2664_v10 = vpop.f32.mrb[22].mxu1 }
 0x583   :  { %v2076_v11 = vadd.f32 %v2664_v10, %v2253_v6  ;;  %v2070_v15 = vpop.f32.mrb[23].mxu1 }
 0x584   :  { %v2071_v2 = vadd.f32 %v2253_v6, %v2070_v15 }
 0x585   :  { %v2090_v53 = vmul.f32 %v2076_v11, %v4419_v40 }
 0x586   :  { %v2089_v55 = vmul.f32 %v2071_v2, %v4418_v54 }
 0x588   :  { %2700 = vmatprep.mubr.f32.mxu0 %v2089_v55 }
 0x589   :  { %2701 = vmatmul.mubr.f32.vlgmr.msra.gmra.mrb[22].mxu0 %v2090_v53 }
 0x5bb   :  { %v2667_v20 = vpop.f32.mrb[24].mxu1 }
 0x5bc   :  { %v2086_v50 = vadd.f32 %v2667_v20, %v2253_v6  ;;  %v2080_v60 = vpop.f32.mrb[25].mxu1 }
 0x5bd   :  { %v2081_v0 = vadd.f32 %v2253_v6, %v2080_v60 }
 0x5be   :  { %v2092_v28 = vmul.f32 %v2086_v50, %v4421_v27 }
 0x5bf   :  { %v2091_v31 = vmul.f32 %v2081_v0, %v4420_v4 }
 0x5c1   :  { %2703 = vmatprep.mubr.f32.mxu1 %v2091_v31 }
 0x5c2   :  { %2704 = vmatmul.mubr.f32.vlgmr.msra.gmra.mrb[26].mxu1 %v2092_v28 }
 0x65c   :  { %v2702_v41 = vpop.f32.mrb[22].mxu0 }
 0x65d   :  { %v2165_v33 = vadd.f32 %v2702_v41, %v2253_v6  ;;  %v2159_v35 = vpop.f32.mrb[23].mxu0 }
 0x65e   :  { %v2160_v21 = vadd.f32 %v2253_v6, %v2159_v35 }
 0x65f   :  { %2179 = vst [vmem:[#allocation13 + $0x8] sm:$0xff] %v2165_v33 }
 0x660   :  { %2178 = vst [vmem:[#allocation13] sm:$0xff] %v2160_v21 }
 0x695   :  { %v2705_v17 = vpop.f32.mrb[26].mxu1 }
 0x696   :  { %v2175_v61 = vadd.f32 %v2705_v17, %v2253_v6  ;;  %v2169_v38 = vpop.f32.mrb[27].mxu1 }
 0x697   :  { %v2170_v25 = vadd.f32 %v2253_v6, %v2169_v38 }
 0x698   :  { %2181 = vst [vmem:[#allocation13 + $0x18] sm:$0xff] %v2175_v61 }
 0x699   :  { %2180 = vst [vmem:[#allocation13 + $0x10] sm:$0xff] %v2170_v25 }
 0x69a   :  { %3238 = shalt.err (!%p3235_p10)
}
 0x69b   :  { %s3239_s26 = scalar_lea.hbm %s4288_s6, 512 }
 0x69c   :  { %p3240_p11 = scmp.ne.s32.totalorder %s4288_s6, %s3239_s26  ;;  %p3243_p12 = scmp.lt.u32.totalorder %s3239_s26, %s4288_s6 }
 0x69e   :  { %p3245_p13 = pnand %p3243_p12, %p3240_p11 }
 0x6a0   :  { %3248 = shalt.err (!%p3245_p13)
}
 0x6a1   :  { %2193 = dma.vmem_to_hbm [thread:$0]  %s2188_s14, 512, %s4288_s6, [#allocation4], %s3264_s22, %s3264_s22, %s3265_s23  }
 0x6a2   :  { %3257 = dma.done.wait [#allocation4], 512  }
 0x6a3   :  { %3258 = vsyncadd [#allocation4], 4294966784 }
 0x6a4   :  { %2197 = vsyncpa [#allocation3], 1 }
 0x6a5   :  { %2198 = vsyncpa [#allocation6], 1 }
 0x6a6   :  { %2199 = vsyncpa [#allocation9], 1 }
 0x6a7   :  { %2200 = vsyncpa [#allocation12], 1 }
 0x6a8   :  { %2201 = vsyncpa [#allocation4], 1 }

</bundles_post_ra>
